<compile_context>
chip_gen: v7x
topology: tpu7x:2x2x1
jax: 0.10.0
libtpu: 0.0.40
codegen_flags: <defaults>
</compile_context>

<pallas_src>
import jax
import jax.numpy as jnp
from jax import lax
from jax.experimental import pallas as pl
from jax.experimental.pallas import tpu as pltpu


# ---------------------------------------------------------------------------
# Fused multi-stage kernel body
# ---------------------------------------------------------------------------
def _make_fused_kernel(n_stage):
    def kernel(x_ref, *refs):
        stage_in = [refs[3 * s: 3 * (s + 1)] for s in range(n_stage)]
        out_refs = refs[3 * n_stage:]
        x = x_ref[...]                                     # (B*H, W*Cin) bf16
        for s in range(n_stage):
            r_ref, m_ref, sb_ref = stage_in[s]
            acc = jnp.zeros((r_ref.shape[1], m_ref.shape[2]), jnp.float32)
            for di in range(3):
                # Row selection (stride-2 + H zero-pad) as a 0/1 matmul.  Each
                # selected row is an exact copy of bf16 data, so the f32->bf16
                # cast below is exact.
                rows = jnp.dot(r_ref[di], x,
                               preferred_element_type=jnp.float32)
                rows = rows.astype(jnp.bfloat16)
                # Banded weight matmul: folds the 3 kw taps, the stride-2
                # column selection and the W zero-pad into one 2-D matmul.
                acc = acc + jnp.dot(rows, m_ref[di],
                                    preferred_element_type=jnp.float32)
            # Folded-BN affine (f32) + ReLU, packed as sb = [scale; bias].
            y = jnp.maximum(acc * sb_ref[0:1, :] + sb_ref[1:2, :], 0.0)
            x = y.astype(jnp.bfloat16)                     # next-stage input
            if s >= 1:                                     # x4, x8, x16, x32
                out_refs[s - 1][...] = x
    return kernel


def fused_backbone_call(x2d, packed):
    """Run the whole backbone in one pallas_call.

    x2d:    (B*H, W*Cin) bf16 row-slab of the NHWC input.
    packed: list of (R, M, sb) per stage (see pack_params_for_kernel).
    Returns (x4, x8, x16, x32) as bf16 row-slabs (B*Ho, Wo*Cout).
    """
    n_stage = len(packed)
    operands = [x2d]
    in_specs = [pl.BlockSpec(x2d.shape, lambda i: (0, 0))]
    for (r, m, sb) in packed:
        operands += [r, m, sb]
        in_specs += [
            pl.BlockSpec(r.shape, lambda i: (0, 0, 0)),
            pl.BlockSpec(m.shape, lambda i: (0, 0, 0)),
            pl.BlockSpec(sb.shape, lambda i: (0, 0)),
        ]

    out_shapes, out_specs = [], []
    bytes_accessed = sum(int(op.size) * op.dtype.itemsize for op in operands)
    for (r, m, sb) in packed[1:]:                      # outputs of stages 1..4
        shp = (int(r.shape[1]), int(m.shape[2]))
        out_shapes.append(jax.ShapeDtypeStruct(shp, jnp.bfloat16))
        out_specs.append(pl.BlockSpec(shp, lambda i: (0, 0)))
        bytes_accessed += shp[0] * shp[1] * 2

    flops = 0
    for (r, m, sb) in packed:
        bho, bh = int(r.shape[1]), int(r.shape[2])
        k, n = int(m.shape[1]), int(m.shape[2])
        flops += 3 * (2 * bho * bh * k + 2 * bho * k * n)

    return pl.pallas_call(
        _make_fused_kernel(n_stage),
        out_shape=tuple(out_shapes),
        grid_spec=pltpu.PrefetchScalarGridSpec(
            num_scalar_prefetch=0,
            grid=(1,),                               # whole net fits in VMEM
            in_specs=in_specs,
            out_specs=tuple(out_specs)),
        compiler_params=pltpu.CompilerParams(
            dimension_semantics=("arbitrary",)),
        cost_estimate=pl.CostEstimate(flops=int(flops), transcendentals=0,
                                      bytes_accessed=int(bytes_accessed)),
    )(*operands)


# ---------------------------------------------------------------------------
# Parameter construction / packing (wrapper side, runs once)
# ---------------------------------------------------------------------------
def init_model_params(key, in_c, basewidth, expand):
    chans_in = [in_c, basewidth, basewidth, basewidth * expand,
                basewidth * expand ** 2]
    chans_out = [basewidth, basewidth, basewidth * expand,
                 basewidth * expand ** 2, basewidth * expand ** 3]
    eps = 1e-5
    params = []
    for s, (ci, co) in enumerate(zip(chans_in, chans_out)):
        k = jax.random.fold_in(key, s)
        kw_, kg, kb, km, kv = jax.random.split(k, 5)
        fan_in = 3 * 3 * ci
        w = jax.random.normal(kw_, (3, 3, ci, co), jnp.float32) * jnp.sqrt(2.0 / fan_in)
        gamma = 1.0 + 0.1 * jax.random.normal(kg, (co,), jnp.float32)
        beta = 0.1 * jax.random.normal(kb, (co,), jnp.float32)
        mean = 0.1 * jax.random.normal(km, (co,), jnp.float32)
        var = jnp.abs(jax.random.normal(kv, (co,), jnp.float32)) + 0.5
        scale = gamma / jnp.sqrt(var + eps)     # fold BN into affine
        bias = beta - mean * scale
        params.append((w, scale, bias))
    return params


def pack_params_for_kernel(params, B, H, W):
    """Build per-stage (R, M, sb) operands for the fused kernel."""
    packed = []
    h, w = H, W
    for (wt, scale, bias) in params:
        kh, kw, cin, cout = wt.shape
        assert (kh, kw) == (3, 3)
        assert h % 2 == 0 and w % 2 == 0, (h, w)
        ho, wo = h // 2, w // 2

        # R[di, b*ho+o, b*h+hh] = 1  iff  hh == 2*o + di - 1 (same batch b)
        di = jnp.arange(3)[:, None, None]
        o = jnp.arange(ho)[None, :, None]
        hh = jnp.arange(h)[None, None, :]
        r1 = (hh == 2 * o + di - 1).astype(jnp.float32)          # (3, ho, h)
        eyeb = jnp.eye(B, dtype=jnp.float32)
        r = jnp.einsum('pq,doh->dpoqh', eyeb, r1)
        r = r.reshape(3, B * ho, B * h).astype(jnp.bfloat16)

        # M[di, w'*cin+c, wo*cout+co] = W[di, dj, c, co]  iff  w' == 2*wo+dj-1
        dj = jnp.arange(3)[:, None, None]
        ww = jnp.arange(w)[None, :, None]
        vo = jnp.arange(wo)[None, None, :]
        s_w = (ww == 2 * vo + dj - 1).astype(jnp.float32)        # (3, w, wo)
        m = jnp.einsum('jwv,ijcd->iwcvd', s_w, wt.astype(jnp.float32))
        m = m.reshape(3, w * cin, wo * cout).astype(jnp.bfloat16)

        # Packed folded-BN affine, tiled to the lane-dense output layout.
        sb = jnp.stack([jnp.tile(scale.astype(jnp.float32), wo),
                        jnp.tile(bias.astype(jnp.float32), wo)])  # (2, wo*cout)

        packed.append((r, m, sb))
        h, w = ho, wo
    return packed


# ---------------------------------------------------------------------------
# Model forward / forwardMS
# ---------------------------------------------------------------------------
def forward_ms(x_nchw, packed):
    B, C, H, W = x_nchw.shape
    x2d = jnp.transpose(x_nchw, (0, 2, 3, 1)).reshape(B * H, W * C)
    x2d = x2d.astype(jnp.bfloat16)
    outs = fused_backbone_call(x2d, packed)
    feats = []
    for s, o in enumerate(outs, start=1):            # strides 4, 8, 16, 32
        ho, wo = H // (2 ** (s + 1)), W // (2 ** (s + 1))
        cout = o.shape[1] // wo
        f = o.reshape(B, ho, wo, cout).transpose(0, 3, 1, 2)   # back to NCHW
        feats.append(f)
    return tuple(feats)


def random_model_forward(x_nchw, packed, num_out=1, do_cls=False):
    feats = forward_ms(x_nchw, packed)
    # do_cls=False branch of RandomModel.forward (head not implemented).
    index = len(feats) - num_out
    assert 0 <= index < len(feats)
    out = feats[index:]
    return out if len(out) > 1 else out[0]


# ---------------------------------------------------------------------------
# Pure-JAX reference (lax.conv) mirroring the kernel's numerics contract:
# bf16 operands, f32 accumulation, f32 folded-BN affine + ReLU, bf16 features.
# ---------------------------------------------------------------------------
def reference_forward(x_nchw, params, num_out=1):
    x = jnp.transpose(x_nchw, (0, 2, 3, 1)).astype(jnp.bfloat16)
    feats = []
    for i, (w, scale, bias) in enumerate(params):
        y = lax.conv_general_dilated(
            x, w.astype(jnp.bfloat16),
            window_strides=(2, 2), padding=((1, 1), (1, 1)),
            dimension_numbers=('NHWC', 'HWIO', 'NHWC'),
            preferred_element_type=jnp.float32)
        a = jnp.maximum(y * scale + bias, 0.0)
        x = a.astype(jnp.bfloat16)
        if i >= 1:
            feats.append(jnp.transpose(x, (0, 3, 1, 2)).astype(jnp.float32))
    out = tuple(feats)[len(feats) - num_out:]
    return out if len(out) > 1 else out[0]


if __name__ == "__main__":
    key = jax.random.PRNGKey(0)
    in_c, basewidth, expand = 3, 16, 2
    B, H, W = 2, 64, 64

    params = init_model_params(key, in_c, basewidth, expand)
    packed = pack_params_for_kernel(params, B, H, W)
    x = jax.random.normal(jax.random.fold_in(key, 1234), (B, in_c, H, W),
                          jnp.float32)

    fwd = jax.jit(lambda xx, pp: random_model_forward(xx, pp, num_out=1))
    out = jax.block_until_ready(fwd(x, packed))

    out_channels = basewidth * expand ** 3
    assert out.shape == (B, out_channels, H // 32, W // 32), out.shape

    ref = jax.block_until_ready(reference_forward(x, params, num_out=1))
    out_f32 = out.astype(jnp.float32)
    err = float(jnp.max(jnp.abs(out_f32 - ref)))
    assert jnp.allclose(out_f32, ref, rtol=5e-2, atol=5e-2), err

    print("KERNEL_OK")
</pallas_src>

<mosaic_0001>
module attributes {stable_mosaic.version = 11 : i64} {
  func.func @kernel(%arg0: i32, %arg1: memref<128x192xbf16, #tpu.memory_space<vmem>>, %arg2: memref<3x64x128xbf16, #tpu.memory_space<vmem>>, %arg3: memref<3x192x512xbf16, #tpu.memory_space<vmem>>, %arg4: memref<2x512xf32, #tpu.memory_space<vmem>>, %arg5: memref<3x32x64xbf16, #tpu.memory_space<vmem>>, %arg6: memref<3x512x256xbf16, #tpu.memory_space<vmem>>, %arg7: memref<2x256xf32, #tpu.memory_space<vmem>>, %arg8: memref<3x16x32xbf16, #tpu.memory_space<vmem>>, %arg9: memref<3x256x256xbf16, #tpu.memory_space<vmem>>, %arg10: memref<2x256xf32, #tpu.memory_space<vmem>>, %arg11: memref<3x8x16xbf16, #tpu.memory_space<vmem>>, %arg12: memref<3x256x256xbf16, #tpu.memory_space<vmem>>, %arg13: memref<2x256xf32, #tpu.memory_space<vmem>>, %arg14: memref<3x4x8xbf16, #tpu.memory_space<vmem>>, %arg15: memref<3x256x256xbf16, #tpu.memory_space<vmem>>, %arg16: memref<2x256xf32, #tpu.memory_space<vmem>>, %arg17: memref<32x256xbf16, #tpu.memory_space<vmem>>, %arg18: memref<16x256xbf16, #tpu.memory_space<vmem>>, %arg19: memref<8x256xbf16, #tpu.memory_space<vmem>>, %arg20: memref<4x256xbf16, #tpu.memory_space<vmem>>) attributes {dimension_semantics = [#tpu.dimension_semantics<arbitrary>], iteration_bounds = array<i64: 1>, scalar_prefetch = 0 : i64, scratch_operands = 0 : i64, tpu.core_type = #tpu.core_type<tc>, window_params = [{pipeline_mode = #tpu.pipeline_mode<synchronous>, transform_indices = @transform_0, window_bounds = array<i64: 128, 192>}, {pipeline_mode = #tpu.pipeline_mode<synchronous>, transform_indices = @transform_1, window_bounds = array<i64: 3, 64, 128>}, {pipeline_mode = #tpu.pipeline_mode<synchronous>, transform_indices = @transform_2, window_bounds = array<i64: 3, 192, 512>}, {pipeline_mode = #tpu.pipeline_mode<synchronous>, transform_indices = @transform_3, window_bounds = array<i64: 2, 512>}, {pipeline_mode = #tpu.pipeline_mode<synchronous>, transform_indices = @transform_4, window_bounds = array<i64: 3, 32, 64>}, {pipeline_mode = #tpu.pipeline_mode<synchronous>, transform_indices = @transform_5, window_bounds = array<i64: 3, 512, 256>}, {pipeline_mode = #tpu.pipeline_mode<synchronous>, transform_indices = @transform_6, window_bounds = array<i64: 2, 256>}, {pipeline_mode = #tpu.pipeline_mode<synchronous>, transform_indices = @transform_7, window_bounds = array<i64: 3, 16, 32>}, {pipeline_mode = #tpu.pipeline_mode<synchronous>, transform_indices = @transform_8, window_bounds = array<i64: 3, 256, 256>}, {pipeline_mode = #tpu.pipeline_mode<synchronous>, transform_indices = @transform_9, window_bounds = array<i64: 2, 256>}, {pipeline_mode = #tpu.pipeline_mode<synchronous>, transform_indices = @transform_10, window_bounds = array<i64: 3, 8, 16>}, {pipeline_mode = #tpu.pipeline_mode<synchronous>, transform_indices = @transform_11, window_bounds = array<i64: 3, 256, 256>}, {pipeline_mode = #tpu.pipeline_mode<synchronous>, transform_indices = @transform_12, window_bounds = array<i64: 2, 256>}, {pipeline_mode = #tpu.pipeline_mode<synchronous>, transform_indices = @transform_13, window_bounds = array<i64: 3, 4, 8>}, {pipeline_mode = #tpu.pipeline_mode<synchronous>, transform_indices = @transform_14, window_bounds = array<i64: 3, 256, 256>}, {pipeline_mode = #tpu.pipeline_mode<synchronous>, transform_indices = @transform_15, window_bounds = array<i64: 2, 256>}, {pipeline_mode = #tpu.pipeline_mode<synchronous>, transform_indices = @transform_16, window_bounds = array<i64: 32, 256>}, {pipeline_mode = #tpu.pipeline_mode<synchronous>, transform_indices = @transform_17, window_bounds = array<i64: 16, 256>}, {pipeline_mode = #tpu.pipeline_mode<synchronous>, transform_indices = @transform_18, window_bounds = array<i64: 8, 256>}, {pipeline_mode = #tpu.pipeline_mode<synchronous>, transform_indices = @transform_19, window_bounds = array<i64: 4, 256>}]} {
    %c0 = arith.constant 0 : index
    %c0_0 = arith.constant 0 : index
    %0 = vector.load %arg1[%c0, %c0_0] : memref<128x192xbf16, #tpu.memory_space<vmem>>, vector<128x192xbf16>
    %cst = arith.constant 0.000000e+00 : f32
    %1 = vector.broadcast %cst : f32 to vector<64x512xf32>
    %c0_1 = arith.constant 0 : index
    %c0_2 = arith.constant 0 : index
    %c0_3 = arith.constant 0 : index
    %2 = vector.load %arg2[%c0_1, %c0_2, %c0_3] : memref<3x64x128xbf16, #tpu.memory_space<vmem>>, vector<1x64x128xbf16>
    %3 = vector.shape_cast %2 : vector<1x64x128xbf16> to vector<64x128xbf16>
    %cst_4 = arith.constant dense<0.000000e+00> : vector<64x192xf32>
    %4 = tpu.matmul %3, %0, %cst_4 {dimension_numbers = #tpu.dot_dimension_numbers<[1], [0], [0], [1], [0, 0, 1, 1], [], []>} : vector<64x128xbf16>, vector<128x192xbf16>, vector<64x192xf32> -> vector<64x192xf32>
    %5 = arith.truncf %4 : vector<64x192xf32> to vector<64x192xbf16>
    %c0_5 = arith.constant 0 : index
    %c0_6 = arith.constant 0 : index
    %c0_7 = arith.constant 0 : index
    %6 = vector.load %arg3[%c0_5, %c0_6, %c0_7] : memref<3x192x512xbf16, #tpu.memory_space<vmem>>, vector<1x192x512xbf16>
    %7 = vector.shape_cast %6 : vector<1x192x512xbf16> to vector<192x512xbf16>
    %cst_8 = arith.constant dense<0.000000e+00> : vector<64x512xf32>
    %8 = tpu.matmul %5, %7, %cst_8 {dimension_numbers = #tpu.dot_dimension_numbers<[1], [0], [0], [1], [0, 0, 1, 1], [], []>} : vector<64x192xbf16>, vector<192x512xbf16>, vector<64x512xf32> -> vector<64x512xf32>
    %9 = arith.addf %1, %8 : vector<64x512xf32>
    %c1 = arith.constant 1 : index
    %c0_9 = arith.constant 0 : index
    %c0_10 = arith.constant 0 : index
    %10 = vector.load %arg2[%c1, %c0_9, %c0_10] : memref<3x64x128xbf16, #tpu.memory_space<vmem>>, vector<1x64x128xbf16>
    %11 = vector.shape_cast %10 : vector<1x64x128xbf16> to vector<64x128xbf16>
    %cst_11 = arith.constant dense<0.000000e+00> : vector<64x192xf32>
    %12 = tpu.matmul %11, %0, %cst_11 {dimension_numbers = #tpu.dot_dimension_numbers<[1], [0], [0], [1], [0, 0, 1, 1], [], []>} : vector<64x128xbf16>, vector<128x192xbf16>, vector<64x192xf32> -> vector<64x192xf32>
    %13 = arith.truncf %12 : vector<64x192xf32> to vector<64x192xbf16>
    %c1_12 = arith.constant 1 : index
    %c0_13 = arith.constant 0 : index
    %c0_14 = arith.constant 0 : index
    %14 = vector.load %arg3[%c1_12, %c0_13, %c0_14] : memref<3x192x512xbf16, #tpu.memory_space<vmem>>, vector<1x192x512xbf16>
    %15 = vector.shape_cast %14 : vector<1x192x512xbf16> to vector<192x512xbf16>
    %cst_15 = arith.constant dense<0.000000e+00> : vector<64x512xf32>
    %16 = tpu.matmul %13, %15, %cst_15 {dimension_numbers = #tpu.dot_dimension_numbers<[1], [0], [0], [1], [0, 0, 1, 1], [], []>} : vector<64x192xbf16>, vector<192x512xbf16>, vector<64x512xf32> -> vector<64x512xf32>
    %17 = arith.addf %9, %16 : vector<64x512xf32>
    %c2 = arith.constant 2 : index
    %c0_16 = arith.constant 0 : index
    %c0_17 = arith.constant 0 : index
    %18 = vector.load %arg2[%c2, %c0_16, %c0_17] : memref<3x64x128xbf16, #tpu.memory_space<vmem>>, vector<1x64x128xbf16>
    %19 = vector.shape_cast %18 : vector<1x64x128xbf16> to vector<64x128xbf16>
    %cst_18 = arith.constant dense<0.000000e+00> : vector<64x192xf32>
    %20 = tpu.matmul %19, %0, %cst_18 {dimension_numbers = #tpu.dot_dimension_numbers<[1], [0], [0], [1], [0, 0, 1, 1], [], []>} : vector<64x128xbf16>, vector<128x192xbf16>, vector<64x192xf32> -> vector<64x192xf32>
    %21 = arith.truncf %20 : vector<64x192xf32> to vector<64x192xbf16>
    %c2_19 = arith.constant 2 : index
    %c0_20 = arith.constant 0 : index
    %c0_21 = arith.constant 0 : index
    %22 = vector.load %arg3[%c2_19, %c0_20, %c0_21] : memref<3x192x512xbf16, #tpu.memory_space<vmem>>, vector<1x192x512xbf16>
    %23 = vector.shape_cast %22 : vector<1x192x512xbf16> to vector<192x512xbf16>
    %cst_22 = arith.constant dense<0.000000e+00> : vector<64x512xf32>
    %24 = tpu.matmul %21, %23, %cst_22 {dimension_numbers = #tpu.dot_dimension_numbers<[1], [0], [0], [1], [0, 0, 1, 1], [], []>} : vector<64x192xbf16>, vector<192x512xbf16>, vector<64x512xf32> -> vector<64x512xf32>
    %25 = arith.addf %17, %24 : vector<64x512xf32>
    %c0_23 = arith.constant 0 : index
    %c0_24 = arith.constant 0 : index
    %26 = vector.load %arg4[%c0_23, %c0_24] : memref<2x512xf32, #tpu.memory_space<vmem>>, vector<1x512xf32>
    %27 = vector.broadcast %26 : vector<1x512xf32> to vector<64x512xf32>
    %28 = arith.mulf %25, %27 : vector<64x512xf32>
    %c1_25 = arith.constant 1 : index
    %c0_26 = arith.constant 0 : index
    %29 = vector.load %arg4[%c1_25, %c0_26] : memref<2x512xf32, #tpu.memory_space<vmem>>, vector<1x512xf32>
    %30 = vector.broadcast %29 : vector<1x512xf32> to vector<64x512xf32>
    %31 = arith.addf %28, %30 : vector<64x512xf32>
    %cst_27 = arith.constant 0.000000e+00 : f32
    %32 = vector.broadcast %cst_27 : f32 to vector<64x512xf32>
    %33 = arith.maximumf %31, %32 : vector<64x512xf32>
    %34 = arith.truncf %33 : vector<64x512xf32> to vector<64x512xbf16>
    %cst_28 = arith.constant 0.000000e+00 : f32
    %35 = vector.broadcast %cst_28 : f32 to vector<32x256xf32>
    %c0_29 = arith.constant 0 : index
    %c0_30 = arith.constant 0 : index
    %c0_31 = arith.constant 0 : index
    %36 = vector.load %arg5[%c0_29, %c0_30, %c0_31] : memref<3x32x64xbf16, #tpu.memory_space<vmem>>, vector<1x32x64xbf16>
    %37 = vector.shape_cast %36 : vector<1x32x64xbf16> to vector<32x64xbf16>
    %cst_32 = arith.constant dense<0.000000e+00> : vector<32x512xf32>
    %38 = tpu.matmul %37, %34, %cst_32 {dimension_numbers = #tpu.dot_dimension_numbers<[1], [0], [0], [1], [0, 0, 1, 1], [], []>} : vector<32x64xbf16>, vector<64x512xbf16>, vector<32x512xf32> -> vector<32x512xf32>
    %39 = arith.truncf %38 : vector<32x512xf32> to vector<32x512xbf16>
    %c0_33 = arith.constant 0 : index
    %c0_34 = arith.constant 0 : index
    %c0_35 = arith.constant 0 : index
    %40 = vector.load %arg6[%c0_33, %c0_34, %c0_35] : memref<3x512x256xbf16, #tpu.memory_space<vmem>>, vector<1x512x256xbf16>
    %41 = vector.shape_cast %40 : vector<1x512x256xbf16> to vector<512x256xbf16>
    %cst_36 = arith.constant dense<0.000000e+00> : vector<32x256xf32>
    %42 = tpu.matmul %39, %41, %cst_36 {dimension_numbers = #tpu.dot_dimension_numbers<[1], [0], [0], [1], [0, 0, 1, 1], [], []>} : vector<32x512xbf16>, vector<512x256xbf16>, vector<32x256xf32> -> vector<32x256xf32>
    %43 = arith.addf %35, %42 : vector<32x256xf32>
    %c1_37 = arith.constant 1 : index
    %c0_38 = arith.constant 0 : index
    %c0_39 = arith.constant 0 : index
    %44 = vector.load %arg5[%c1_37, %c0_38, %c0_39] : memref<3x32x64xbf16, #tpu.memory_space<vmem>>, vector<1x32x64xbf16>
    %45 = vector.shape_cast %44 : vector<1x32x64xbf16> to vector<32x64xbf16>
    %cst_40 = arith.constant dense<0.000000e+00> : vector<32x512xf32>
    %46 = tpu.matmul %45, %34, %cst_40 {dimension_numbers = #tpu.dot_dimension_numbers<[1], [0], [0], [1], [0, 0, 1, 1], [], []>} : vector<32x64xbf16>, vector<64x512xbf16>, vector<32x512xf32> -> vector<32x512xf32>
    %47 = arith.truncf %46 : vector<32x512xf32> to vector<32x512xbf16>
    %c1_41 = arith.constant 1 : index
    %c0_42 = arith.constant 0 : index
    %c0_43 = arith.constant 0 : index
    %48 = vector.load %arg6[%c1_41, %c0_42, %c0_43] : memref<3x512x256xbf16, #tpu.memory_space<vmem>>, vector<1x512x256xbf16>
    %49 = vector.shape_cast %48 : vector<1x512x256xbf16> to vector<512x256xbf16>
    %cst_44 = arith.constant dense<0.000000e+00> : vector<32x256xf32>
    %50 = tpu.matmul %47, %49, %cst_44 {dimension_numbers = #tpu.dot_dimension_numbers<[1], [0], [0], [1], [0, 0, 1, 1], [], []>} : vector<32x512xbf16>, vector<512x256xbf16>, vector<32x256xf32> -> vector<32x256xf32>
    %51 = arith.addf %43, %50 : vector<32x256xf32>
    %c2_45 = arith.constant 2 : index
    %c0_46 = arith.constant 0 : index
    %c0_47 = arith.constant 0 : index
    %52 = vector.load %arg5[%c2_45, %c0_46, %c0_47] : memref<3x32x64xbf16, #tpu.memory_space<vmem>>, vector<1x32x64xbf16>
    %53 = vector.shape_cast %52 : vector<1x32x64xbf16> to vector<32x64xbf16>
    %cst_48 = arith.constant dense<0.000000e+00> : vector<32x512xf32>
    %54 = tpu.matmul %53, %34, %cst_48 {dimension_numbers = #tpu.dot_dimension_numbers<[1], [0], [0], [1], [0, 0, 1, 1], [], []>} : vector<32x64xbf16>, vector<64x512xbf16>, vector<32x512xf32> -> vector<32x512xf32>
    %55 = arith.truncf %54 : vector<32x512xf32> to vector<32x512xbf16>
    %c2_49 = arith.constant 2 : index
    %c0_50 = arith.constant 0 : index
    %c0_51 = arith.constant 0 : index
    %56 = vector.load %arg6[%c2_49, %c0_50, %c0_51] : memref<3x512x256xbf16, #tpu.memory_space<vmem>>, vector<1x512x256xbf16>
    %57 = vector.shape_cast %56 : vector<1x512x256xbf16> to vector<512x256xbf16>
    %cst_52 = arith.constant dense<0.000000e+00> : vector<32x256xf32>
    %58 = tpu.matmul %55, %57, %cst_52 {dimension_numbers = #tpu.dot_dimension_numbers<[1], [0], [0], [1], [0, 0, 1, 1], [], []>} : vector<32x512xbf16>, vector<512x256xbf16>, vector<32x256xf32> -> vector<32x256xf32>
    %59 = arith.addf %51, %58 : vector<32x256xf32>
    %c0_53 = arith.constant 0 : index
    %c0_54 = arith.constant 0 : index
    %60 = vector.load %arg7[%c0_53, %c0_54] : memref<2x256xf32, #tpu.memory_space<vmem>>, vector<1x256xf32>
    %61 = vector.broadcast %60 : vector<1x256xf32> to vector<32x256xf32>
    %62 = arith.mulf %59, %61 : vector<32x256xf32>
    %c1_55 = arith.constant 1 : index
    %c0_56 = arith.constant 0 : index
    %63 = vector.load %arg7[%c1_55, %c0_56] : memref<2x256xf32, #tpu.memory_space<vmem>>, vector<1x256xf32>
    %64 = vector.broadcast %63 : vector<1x256xf32> to vector<32x256xf32>
    %65 = arith.addf %62, %64 : vector<32x256xf32>
    %cst_57 = arith.constant 0.000000e+00 : f32
    %66 = vector.broadcast %cst_57 : f32 to vector<32x256xf32>
    %67 = arith.maximumf %65, %66 : vector<32x256xf32>
    %68 = arith.truncf %67 : vector<32x256xf32> to vector<32x256xbf16>
    %c0_58 = arith.constant 0 : index
    %c0_59 = arith.constant 0 : index
    %69 = vector.load %arg17[%c0_58, %c0_59] : memref<32x256xbf16, #tpu.memory_space<vmem>>, vector<32x256xbf16>
    tpu.vector_store %arg17[%c0_58, %c0_59], %68 {strides = array<i32>} : memref<32x256xbf16, #tpu.memory_space<vmem>>, vector<32x256xbf16>,
    %cst_60 = arith.constant 0.000000e+00 : f32
    %70 = vector.broadcast %cst_60 : f32 to vector<16x256xf32>
    %c0_61 = arith.constant 0 : index
    %c0_62 = arith.constant 0 : index
    %c0_63 = arith.constant 0 : index
    %71 = vector.load %arg8[%c0_61, %c0_62, %c0_63] : memref<3x16x32xbf16, #tpu.memory_space<vmem>>, vector<1x16x32xbf16>
    %72 = vector.shape_cast %71 : vector<1x16x32xbf16> to vector<16x32xbf16>
    %cst_64 = arith.constant dense<0.000000e+00> : vector<16x256xf32>
    %73 = tpu.matmul %72, %68, %cst_64 {dimension_numbers = #tpu.dot_dimension_numbers<[1], [0], [0], [1], [0, 0, 1, 1], [], []>} : vector<16x32xbf16>, vector<32x256xbf16>, vector<16x256xf32> -> vector<16x256xf32>
    %74 = arith.truncf %73 : vector<16x256xf32> to vector<16x256xbf16>
    %c0_65 = arith.constant 0 : index
    %c0_66 = arith.constant 0 : index
    %c0_67 = arith.constant 0 : index
    %75 = vector.load %arg9[%c0_65, %c0_66, %c0_67] : memref<3x256x256xbf16, #tpu.memory_space<vmem>>, vector<1x256x256xbf16>
    %76 = vector.shape_cast %75 : vector<1x256x256xbf16> to vector<256x256xbf16>
    %cst_68 = arith.constant dense<0.000000e+00> : vector<16x256xf32>
    %77 = tpu.matmul %74, %76, %cst_68 {dimension_numbers = #tpu.dot_dimension_numbers<[1], [0], [0], [1], [0, 0, 1, 1], [], []>} : vector<16x256xbf16>, vector<256x256xbf16>, vector<16x256xf32> -> vector<16x256xf32>
    %78 = arith.addf %70, %77 : vector<16x256xf32>
    %c1_69 = arith.constant 1 : index
    %c0_70 = arith.constant 0 : index
    %c0_71 = arith.constant 0 : index
    %79 = vector.load %arg8[%c1_69, %c0_70, %c0_71] : memref<3x16x32xbf16, #tpu.memory_space<vmem>>, vector<1x16x32xbf16>
    %80 = vector.shape_cast %79 : vector<1x16x32xbf16> to vector<16x32xbf16>
    %cst_72 = arith.constant dense<0.000000e+00> : vector<16x256xf32>
    %81 = tpu.matmul %80, %68, %cst_72 {dimension_numbers = #tpu.dot_dimension_numbers<[1], [0], [0], [1], [0, 0, 1, 1], [], []>} : vector<16x32xbf16>, vector<32x256xbf16>, vector<16x256xf32> -> vector<16x256xf32>
    %82 = arith.truncf %81 : vector<16x256xf32> to vector<16x256xbf16>
    %c1_73 = arith.constant 1 : index
    %c0_74 = arith.constant 0 : index
    %c0_75 = arith.constant 0 : index
    %83 = vector.load %arg9[%c1_73, %c0_74, %c0_75] : memref<3x256x256xbf16, #tpu.memory_space<vmem>>, vector<1x256x256xbf16>
    %84 = vector.shape_cast %83 : vector<1x256x256xbf16> to vector<256x256xbf16>
    %cst_76 = arith.constant dense<0.000000e+00> : vector<16x256xf32>
    %85 = tpu.matmul %82, %84, %cst_76 {dimension_numbers = #tpu.dot_dimension_numbers<[1], [0], [0], [1], [0, 0, 1, 1], [], []>} : vector<16x256xbf16>, vector<256x256xbf16>, vector<16x256xf32> -> vector<16x256xf32>
    %86 = arith.addf %78, %85 : vector<16x256xf32>
    %c2_77 = arith.constant 2 : index
    %c0_78 = arith.constant 0 : index
    %c0_79 = arith.constant 0 : index
    %87 = vector.load %arg8[%c2_77, %c0_78, %c0_79] : memref<3x16x32xbf16, #tpu.memory_space<vmem>>, vector<1x16x32xbf16>
    %88 = vector.shape_cast %87 : vector<1x16x32xbf16> to vector<16x32xbf16>
    %cst_80 = arith.constant dense<0.000000e+00> : vector<16x256xf32>
    %89 = tpu.matmul %88, %68, %cst_80 {dimension_numbers = #tpu.dot_dimension_numbers<[1], [0], [0], [1], [0, 0, 1, 1], [], []>} : vector<16x32xbf16>, vector<32x256xbf16>, vector<16x256xf32> -> vector<16x256xf32>
    %90 = arith.truncf %89 : vector<16x256xf32> to vector<16x256xbf16>
    %c2_81 = arith.constant 2 : index
    %c0_82 = arith.constant 0 : index
    %c0_83 = arith.constant 0 : index
    %91 = vector.load %arg9[%c2_81, %c0_82, %c0_83] : memref<3x256x256xbf16, #tpu.memory_space<vmem>>, vector<1x256x256xbf16>
    %92 = vector.shape_cast %91 : vector<1x256x256xbf16> to vector<256x256xbf16>
    %cst_84 = arith.constant dense<0.000000e+00> : vector<16x256xf32>
    %93 = tpu.matmul %90, %92, %cst_84 {dimension_numbers = #tpu.dot_dimension_numbers<[1], [0], [0], [1], [0, 0, 1, 1], [], []>} : vector<16x256xbf16>, vector<256x256xbf16>, vector<16x256xf32> -> vector<16x256xf32>
    %94 = arith.addf %86, %93 : vector<16x256xf32>
    %c0_85 = arith.constant 0 : index
    %c0_86 = arith.constant 0 : index
    %95 = vector.load %arg10[%c0_85, %c0_86] : memref<2x256xf32, #tpu.memory_space<vmem>>, vector<1x256xf32>
    %96 = vector.broadcast %95 : vector<1x256xf32> to vector<16x256xf32>
    %97 = arith.mulf %94, %96 : vector<16x256xf32>
    %c1_87 = arith.constant 1 : index
    %c0_88 = arith.constant 0 : index
    %98 = vector.load %arg10[%c1_87, %c0_88] : memref<2x256xf32, #tpu.memory_space<vmem>>, vector<1x256xf32>
    %99 = vector.broadcast %98 : vector<1x256xf32> to vector<16x256xf32>
    %100 = arith.addf %97, %99 : vector<16x256xf32>
    %cst_89 = arith.constant 0.000000e+00 : f32
    %101 = vector.broadcast %cst_89 : f32 to vector<16x256xf32>
    %102 = arith.maximumf %100, %101 : vector<16x256xf32>
    %103 = arith.truncf %102 : vector<16x256xf32> to vector<16x256xbf16>
    %c0_90 = arith.constant 0 : index
    %c0_91 = arith.constant 0 : index
    %104 = vector.load %arg18[%c0_90, %c0_91] : memref<16x256xbf16, #tpu.memory_space<vmem>>, vector<16x256xbf16>
    tpu.vector_store %arg18[%c0_90, %c0_91], %103 {strides = array<i32>} : memref<16x256xbf16, #tpu.memory_space<vmem>>, vector<16x256xbf16>,
    %cst_92 = arith.constant 0.000000e+00 : f32
    %105 = vector.broadcast %cst_92 : f32 to vector<8x256xf32>
    %c0_93 = arith.constant 0 : index
    %c0_94 = arith.constant 0 : index
    %c0_95 = arith.constant 0 : index
    %106 = vector.load %arg11[%c0_93, %c0_94, %c0_95] : memref<3x8x16xbf16, #tpu.memory_space<vmem>>, vector<1x8x16xbf16>
    %107 = vector.shape_cast %106 : vector<1x8x16xbf16> to vector<8x16xbf16>
    %cst_96 = arith.constant dense<0.000000e+00> : vector<8x256xf32>
    %108 = tpu.matmul %107, %103, %cst_96 {dimension_numbers = #tpu.dot_dimension_numbers<[1], [0], [0], [1], [0, 0, 1, 1], [], []>} : vector<8x16xbf16>, vector<16x256xbf16>, vector<8x256xf32> -> vector<8x256xf32>
    %109 = arith.truncf %108 : vector<8x256xf32> to vector<8x256xbf16>
    %c0_97 = arith.constant 0 : index
    %c0_98 = arith.constant 0 : index
    %c0_99 = arith.constant 0 : index
    %110 = vector.load %arg12[%c0_97, %c0_98, %c0_99] : memref<3x256x256xbf16, #tpu.memory_space<vmem>>, vector<1x256x256xbf16>
    %111 = vector.shape_cast %110 : vector<1x256x256xbf16> to vector<256x256xbf16>
    %cst_100 = arith.constant dense<0.000000e+00> : vector<8x256xf32>
    %112 = tpu.matmul %109, %111, %cst_100 {dimension_numbers = #tpu.dot_dimension_numbers<[1], [0], [0], [1], [0, 0, 1, 1], [], []>} : vector<8x256xbf16>, vector<256x256xbf16>, vector<8x256xf32> -> vector<8x256xf32>
    %113 = arith.addf %105, %112 : vector<8x256xf32>
    %c1_101 = arith.constant 1 : index
    %c0_102 = arith.constant 0 : index
    %c0_103 = arith.constant 0 : index
    %114 = vector.load %arg11[%c1_101, %c0_102, %c0_103] : memref<3x8x16xbf16, #tpu.memory_space<vmem>>, vector<1x8x16xbf16>
    %115 = vector.shape_cast %114 : vector<1x8x16xbf16> to vector<8x16xbf16>
    %cst_104 = arith.constant dense<0.000000e+00> : vector<8x256xf32>
    %116 = tpu.matmul %115, %103, %cst_104 {dimension_numbers = #tpu.dot_dimension_numbers<[1], [0], [0], [1], [0, 0, 1, 1], [], []>} : vector<8x16xbf16>, vector<16x256xbf16>, vector<8x256xf32> -> vector<8x256xf32>
    %117 = arith.truncf %116 : vector<8x256xf32> to vector<8x256xbf16>
    %c1_105 = arith.constant 1 : index
    %c0_106 = arith.constant 0 : index
    %c0_107 = arith.constant 0 : index
    %118 = vector.load %arg12[%c1_105, %c0_106, %c0_107] : memref<3x256x256xbf16, #tpu.memory_space<vmem>>, vector<1x256x256xbf16>
    %119 = vector.shape_cast %118 : vector<1x256x256xbf16> to vector<256x256xbf16>
    %cst_108 = arith.constant dense<0.000000e+00> : vector<8x256xf32>
    %120 = tpu.matmul %117, %119, %cst_108 {dimension_numbers = #tpu.dot_dimension_numbers<[1], [0], [0], [1], [0, 0, 1, 1], [], []>} : vector<8x256xbf16>, vector<256x256xbf16>, vector<8x256xf32> -> vector<8x256xf32>
    %121 = arith.addf %113, %120 : vector<8x256xf32>
    %c2_109 = arith.constant 2 : index
    %c0_110 = arith.constant 0 : index
    %c0_111 = arith.constant 0 : index
    %122 = vector.load %arg11[%c2_109, %c0_110, %c0_111] : memref<3x8x16xbf16, #tpu.memory_space<vmem>>, vector<1x8x16xbf16>
    %123 = vector.shape_cast %122 : vector<1x8x16xbf16> to vector<8x16xbf16>
    %cst_112 = arith.constant dense<0.000000e+00> : vector<8x256xf32>
    %124 = tpu.matmul %123, %103, %cst_112 {dimension_numbers = #tpu.dot_dimension_numbers<[1], [0], [0], [1], [0, 0, 1, 1], [], []>} : vector<8x16xbf16>, vector<16x256xbf16>, vector<8x256xf32> -> vector<8x256xf32>
    %125 = arith.truncf %124 : vector<8x256xf32> to vector<8x256xbf16>
    %c2_113 = arith.constant 2 : index
    %c0_114 = arith.constant 0 : index
    %c0_115 = arith.constant 0 : index
    %126 = vector.load %arg12[%c2_113, %c0_114, %c0_115] : memref<3x256x256xbf16, #tpu.memory_space<vmem>>, vector<1x256x256xbf16>
    %127 = vector.shape_cast %126 : vector<1x256x256xbf16> to vector<256x256xbf16>
    %cst_116 = arith.constant dense<0.000000e+00> : vector<8x256xf32>
    %128 = tpu.matmul %125, %127, %cst_116 {dimension_numbers = #tpu.dot_dimension_numbers<[1], [0], [0], [1], [0, 0, 1, 1], [], []>} : vector<8x256xbf16>, vector<256x256xbf16>, vector<8x256xf32> -> vector<8x256xf32>
    %129 = arith.addf %121, %128 : vector<8x256xf32>
    %c0_117 = arith.constant 0 : index
    %c0_118 = arith.constant 0 : index
    %130 = vector.load %arg13[%c0_117, %c0_118] : memref<2x256xf32, #tpu.memory_space<vmem>>, vector<1x256xf32>
    %131 = vector.broadcast %130 : vector<1x256xf32> to vector<8x256xf32>
    %132 = arith.mulf %129, %131 : vector<8x256xf32>
    %c1_119 = arith.constant 1 : index
    %c0_120 = arith.constant 0 : index
    %133 = vector.load %arg13[%c1_119, %c0_120] : memref<2x256xf32, #tpu.memory_space<vmem>>, vector<1x256xf32>
    %134 = vector.broadcast %133 : vector<1x256xf32> to vector<8x256xf32>
    %135 = arith.addf %132, %134 : vector<8x256xf32>
    %cst_121 = arith.constant 0.000000e+00 : f32
    %136 = vector.broadcast %cst_121 : f32 to vector<8x256xf32>
    %137 = arith.maximumf %135, %136 : vector<8x256xf32>
    %138 = arith.truncf %137 : vector<8x256xf32> to vector<8x256xbf16>
    %c0_122 = arith.constant 0 : index
    %c0_123 = arith.constant 0 : index
    %139 = vector.load %arg19[%c0_122, %c0_123] : memref<8x256xbf16, #tpu.memory_space<vmem>>, vector<8x256xbf16>
    tpu.vector_store %arg19[%c0_122, %c0_123], %138 {strides = array<i32>} : memref<8x256xbf16, #tpu.memory_space<vmem>>, vector<8x256xbf16>,
    %cst_124 = arith.constant 0.000000e+00 : f32
    %140 = vector.broadcast %cst_124 : f32 to vector<4x256xf32>
    %c0_125 = arith.constant 0 : index
    %c0_126 = arith.constant 0 : index
    %c0_127 = arith.constant 0 : index
    %141 = vector.load %arg14[%c0_125, %c0_126, %c0_127] : memref<3x4x8xbf16, #tpu.memory_space<vmem>>, vector<1x4x8xbf16>
    %142 = vector.shape_cast %141 : vector<1x4x8xbf16> to vector<4x8xbf16>
    %cst_128 = arith.constant dense<0.000000e+00> : vector<4x256xf32>
    %143 = tpu.matmul %142, %138, %cst_128 {dimension_numbers = #tpu.dot_dimension_numbers<[1], [0], [0], [1], [0, 0, 1, 1], [], []>} : vector<4x8xbf16>, vector<8x256xbf16>, vector<4x256xf32> -> vector<4x256xf32>
    %144 = arith.truncf %143 : vector<4x256xf32> to vector<4x256xbf16>
    %c0_129 = arith.constant 0 : index
    %c0_130 = arith.constant 0 : index
    %c0_131 = arith.constant 0 : index
    %145 = vector.load %arg15[%c0_129, %c0_130, %c0_131] : memref<3x256x256xbf16, #tpu.memory_space<vmem>>, vector<1x256x256xbf16>
    %146 = vector.shape_cast %145 : vector<1x256x256xbf16> to vector<256x256xbf16>
    %cst_132 = arith.constant dense<0.000000e+00> : vector<4x256xf32>
    %147 = tpu.matmul %144, %146, %cst_132 {dimension_numbers = #tpu.dot_dimension_numbers<[1], [0], [0], [1], [0, 0, 1, 1], [], []>} : vector<4x256xbf16>, vector<256x256xbf16>, vector<4x256xf32> -> vector<4x256xf32>
    %148 = arith.addf %140, %147 : vector<4x256xf32>
    %c1_133 = arith.constant 1 : index
    %c0_134 = arith.constant 0 : index
    %c0_135 = arith.constant 0 : index
    %149 = vector.load %arg14[%c1_133, %c0_134, %c0_135] : memref<3x4x8xbf16, #tpu.memory_space<vmem>>, vector<1x4x8xbf16>
    %150 = vector.shape_cast %149 : vector<1x4x8xbf16> to vector<4x8xbf16>
    %cst_136 = arith.constant dense<0.000000e+00> : vector<4x256xf32>
    %151 = tpu.matmul %150, %138, %cst_136 {dimension_numbers = #tpu.dot_dimension_numbers<[1], [0], [0], [1], [0, 0, 1, 1], [], []>} : vector<4x8xbf16>, vector<8x256xbf16>, vector<4x256xf32> -> vector<4x256xf32>
    %152 = arith.truncf %151 : vector<4x256xf32> to vector<4x256xbf16>
    %c1_137 = arith.constant 1 : index
    %c0_138 = arith.constant 0 : index
    %c0_139 = arith.constant 0 : index
    %153 = vector.load %arg15[%c1_137, %c0_138, %c0_139] : memref<3x256x256xbf16, #tpu.memory_space<vmem>>, vector<1x256x256xbf16>
    %154 = vector.shape_cast %153 : vector<1x256x256xbf16> to vector<256x256xbf16>
    %cst_140 = arith.constant dense<0.000000e+00> : vector<4x256xf32>
    %155 = tpu.matmul %152, %154, %cst_140 {dimension_numbers = #tpu.dot_dimension_numbers<[1], [0], [0], [1], [0, 0, 1, 1], [], []>} : vector<4x256xbf16>, vector<256x256xbf16>, vector<4x256xf32> -> vector<4x256xf32>
    %156 = arith.addf %148, %155 : vector<4x256xf32>
    %c2_141 = arith.constant 2 : index
    %c0_142 = arith.constant 0 : index
    %c0_143 = arith.constant 0 : index
    %157 = vector.load %arg14[%c2_141, %c0_142, %c0_143] : memref<3x4x8xbf16, #tpu.memory_space<vmem>>, vector<1x4x8xbf16>
    %158 = vector.shape_cast %157 : vector<1x4x8xbf16> to vector<4x8xbf16>
    %cst_144 = arith.constant dense<0.000000e+00> : vector<4x256xf32>
    %159 = tpu.matmul %158, %138, %cst_144 {dimension_numbers = #tpu.dot_dimension_numbers<[1], [0], [0], [1], [0, 0, 1, 1], [], []>} : vector<4x8xbf16>, vector<8x256xbf16>, vector<4x256xf32> -> vector<4x256xf32>
    %160 = arith.truncf %159 : vector<4x256xf32> to vector<4x256xbf16>
    %c2_145 = arith.constant 2 : index
    %c0_146 = arith.constant 0 : index
    %c0_147 = arith.constant 0 : index
    %161 = vector.load %arg15[%c2_145, %c0_146, %c0_147] : memref<3x256x256xbf16, #tpu.memory_space<vmem>>, vector<1x256x256xbf16>
    %162 = vector.shape_cast %161 : vector<1x256x256xbf16> to vector<256x256xbf16>
    %cst_148 = arith.constant dense<0.000000e+00> : vector<4x256xf32>
    %163 = tpu.matmul %160, %162, %cst_148 {dimension_numbers = #tpu.dot_dimension_numbers<[1], [0], [0], [1], [0, 0, 1, 1], [], []>} : vector<4x256xbf16>, vector<256x256xbf16>, vector<4x256xf32> -> vector<4x256xf32>
    %164 = arith.addf %156, %163 : vector<4x256xf32>
    %c0_149 = arith.constant 0 : index
    %c0_150 = arith.constant 0 : index
    %165 = vector.load %arg16[%c0_149, %c0_150] : memref<2x256xf32, #tpu.memory_space<vmem>>, vector<1x256xf32>
    %166 = vector.broadcast %165 : vector<1x256xf32> to vector<4x256xf32>
    %167 = arith.mulf %164, %166 : vector<4x256xf32>
    %c1_151 = arith.constant 1 : index
    %c0_152 = arith.constant 0 : index
    %168 = vector.load %arg16[%c1_151, %c0_152] : memref<2x256xf32, #tpu.memory_space<vmem>>, vector<1x256xf32>
    %169 = vector.broadcast %168 : vector<1x256xf32> to vector<4x256xf32>
    %170 = arith.addf %167, %169 : vector<4x256xf32>
    %cst_153 = arith.constant 0.000000e+00 : f32
    %171 = vector.broadcast %cst_153 : f32 to vector<4x256xf32>
    %172 = arith.maximumf %170, %171 : vector<4x256xf32>
    %173 = arith.truncf %172 : vector<4x256xf32> to vector<4x256xbf16>
    %c0_154 = arith.constant 0 : index
    %c0_155 = arith.constant 0 : index
    %174 = vector.load %arg20[%c0_154, %c0_155] : memref<4x256xbf16, #tpu.memory_space<vmem>>, vector<4x256xbf16>
    tpu.vector_store %arg20[%c0_154, %c0_155], %173 {strides = array<i32>} : memref<4x256xbf16, #tpu.memory_space<vmem>>, vector<4x256xbf16>,
    return
  }
  func.func @transform_0(%arg0: i32) -> (i32, i32) {
    %c0_i32 = arith.constant 0 : i32
    %c0_i32_0 = arith.constant 0 : i32
    %c0_i32_1 = arith.constant 0 : i32
    return %c0_i32, %c0_i32_0 : i32, i32
  }
  func.func @transform_1(%arg0: i32) -> (i32, i32, i32) {
    %c0_i32 = arith.constant 0 : i32
    %c0_i32_0 = arith.constant 0 : i32
    %c0_i32_1 = arith.constant 0 : i32
    %c0_i32_2 = arith.constant 0 : i32
    return %c0_i32, %c0_i32_0, %c0_i32_1 : i32, i32, i32
  }
  func.func @transform_2(%arg0: i32) -> (i32, i32, i32) {
    %c0_i32 = arith.constant 0 : i32
    %c0_i32_0 = arith.constant 0 : i32
    %c0_i32_1 = arith.constant 0 : i32
    %c0_i32_2 = arith.constant 0 : i32
    return %c0_i32, %c0_i32_0, %c0_i32_1 : i32, i32, i32
  }
  func.func @transform_3(%arg0: i32) -> (i32, i32) {
    %c0_i32 = arith.constant 0 : i32
    %c0_i32_0 = arith.constant 0 : i32
    %c0_i32_1 = arith.constant 0 : i32
    return %c0_i32, %c0_i32_0 : i32, i32
  }
  func.func @transform_4(%arg0: i32) -> (i32, i32, i32) {
    %c0_i32 = arith.constant 0 : i32
    %c0_i32_0 = arith.constant 0 : i32
    %c0_i32_1 = arith.constant 0 : i32
    %c0_i32_2 = arith.constant 0 : i32
    return %c0_i32, %c0_i32_0, %c0_i32_1 : i32, i32, i32
  }
  func.func @transform_5(%arg0: i32) -> (i32, i32, i32) {
    %c0_i32 = arith.constant 0 : i32
    %c0_i32_0 = arith.constant 0 : i32
    %c0_i32_1 = arith.constant 0 : i32
    %c0_i32_2 = arith.constant 0 : i32
    return %c0_i32, %c0_i32_0, %c0_i32_1 : i32, i32, i32
  }
  func.func @transform_6(%arg0: i32) -> (i32, i32) {
    %c0_i32 = arith.constant 0 : i32
    %c0_i32_0 = arith.constant 0 : i32
    %c0_i32_1 = arith.constant 0 : i32
    return %c0_i32, %c0_i32_0 : i32, i32
  }
  func.func @transform_7(%arg0: i32) -> (i32, i32, i32) {
    %c0_i32 = arith.constant 0 : i32
    %c0_i32_0 = arith.constant 0 : i32
    %c0_i32_1 = arith.constant 0 : i32
    %c0_i32_2 = arith.constant 0 : i32
    return %c0_i32, %c0_i32_0, %c0_i32_1 : i32, i32, i32
  }
  func.func @transform_8(%arg0: i32) -> (i32, i32, i32) {
    %c0_i32 = arith.constant 0 : i32
    %c0_i32_0 = arith.constant 0 : i32
    %c0_i32_1 = arith.constant 0 : i32
    %c0_i32_2 = arith.constant 0 : i32
    return %c0_i32, %c0_i32_0, %c0_i32_1 : i32, i32, i32
  }
  func.func @transform_9(%arg0: i32) -> (i32, i32) {
    %c0_i32 = arith.constant 0 : i32
    %c0_i32_0 = arith.constant 0 : i32
    %c0_i32_1 = arith.constant 0 : i32
    return %c0_i32, %c0_i32_0 : i32, i32
  }
  func.func @transform_10(%arg0: i32) -> (i32, i32, i32) {
    %c0_i32 = arith.constant 0 : i32
    %c0_i32_0 = arith.constant 0 : i32
    %c0_i32_1 = arith.constant 0 : i32
    %c0_i32_2 = arith.constant 0 : i32
    return %c0_i32, %c0_i32_0, %c0_i32_1 : i32, i32, i32
  }
  func.func @transform_11(%arg0: i32) -> (i32, i32, i32) {
    %c0_i32 = arith.constant 0 : i32
    %c0_i32_0 = arith.constant 0 : i32
    %c0_i32_1 = arith.constant 0 : i32
    %c0_i32_2 = arith.constant 0 : i32
    return %c0_i32, %c0_i32_0, %c0_i32_1 : i32, i32, i32
  }
  func.func @transform_12(%arg0: i32) -> (i32, i32) {
    %c0_i32 = arith.constant 0 : i32
    %c0_i32_0 = arith.constant 0 : i32
    %c0_i32_1 = arith.constant 0 : i32
    return %c0_i32, %c0_i32_0 : i32, i32
  }
  func.func @transform_13(%arg0: i32) -> (i32, i32, i32) {
    %c0_i32 = arith.constant 0 : i32
    %c0_i32_0 = arith.constant 0 : i32
    %c0_i32_1 = arith.constant 0 : i32
    %c0_i32_2 = arith.constant 0 : i32
    return %c0_i32, %c0_i32_0, %c0_i32_1 : i32, i32, i32
  }
  func.func @transform_14(%arg0: i32) -> (i32, i32, i32) {
    %c0_i32 = arith.constant 0 : i32
    %c0_i32_0 = arith.constant 0 : i32
    %c0_i32_1 = arith.constant 0 : i32
    %c0_i32_2 = arith.constant 0 : i32
    return %c0_i32, %c0_i32_0, %c0_i32_1 : i32, i32, i32
  }
  func.func @transform_15(%arg0: i32) -> (i32, i32) {
    %c0_i32 = arith.constant 0 : i32
    %c0_i32_0 = arith.constant 0 : i32
    %c0_i32_1 = arith.constant 0 : i32
    return %c0_i32, %c0_i32_0 : i32, i32
  }
  func.func @transform_16(%arg0: i32) -> (i32, i32) {
    %c0_i32 = arith.constant 0 : i32
    %c0_i32_0 = arith.constant 0 : i32
    %c0_i32_1 = arith.constant 0 : i32
    return %c0_i32, %c0_i32_0 : i32, i32
  }
  func.func @transform_17(%arg0: i32) -> (i32, i32) {
    %c0_i32 = arith.constant 0 : i32
    %c0_i32_0 = arith.constant 0 : i32
    %c0_i32_1 = arith.constant 0 : i32
    return %c0_i32, %c0_i32_0 : i32, i32
  }
  func.func @transform_18(%arg0: i32) -> (i32, i32) {
    %c0_i32 = arith.constant 0 : i32
    %c0_i32_0 = arith.constant 0 : i32
    %c0_i32_1 = arith.constant 0 : i32
    return %c0_i32, %c0_i32_0 : i32, i32
  }
  func.func @transform_19(%arg0: i32) -> (i32, i32) {
    %c0_i32 = arith.constant 0 : i32
    %c0_i32_0 = arith.constant 0 : i32
    %c0_i32_1 = arith.constant 0 : i32
    return %c0_i32, %c0_i32_0 : i32, i32
  }
}

</mosaic_0001>

<bundles_post_ra>
// kernel: _lambda_.1
= control target key start
LH: loop header
LB: loop body
LE: loop exit
PB: predicated region body
PF: predicated region fallthrough
CT: control target
= control target key end

     0   :  { %s10280_s0 = inlined_call_operand.vmem [shape: bf16[128,192], index: 0, kind: input, shape index: {}]   ;;  %s10281_s1 = inlined_call_operand.vmem [shape: bf16[3,64,128], index: 1, kind: input, shape index: {}]   ;;  %s10282_s2 = inlined_call_operand.vmem [shape: bf16[3,192,512], index: 2, kind: input, shape index: {}]   ;;  %s10283_s3 = inlined_call_operand.vmem [shape: f32[2,512], index: 3, kind: input, shape index: {}]   ;;  %s10284_s4 = inlined_call_operand.vmem [shape: bf16[3,32,64], index: 4, kind: input, shape index: {}]   ;;  %s10285_s5 = inlined_call_operand.hbm [shape: bf16[3,512,256], index: 5, kind: input, shape index: {}]   ;;  %s10286_s6 = inlined_call_operand.vmem [shape: f32[2,256], index: 6, kind: input, shape index: {}]   ;;  %s10287_s7 = inlined_call_operand.vmem [shape: bf16[3,16,32], index: 7, kind: input, shape index: {}]   ;;  %s10288_s8 = inlined_call_operand.hbm [shape: bf16[3,256,256], index: 8, kind: input, shape index: {}]   ;;  %s10289_s9 = inlined_call_operand.vmem [shape: f32[2,256], index: 9, kind: input, shape index: {}]   ;;  %s10290_s10 = inlined_call_operand.vmem [shape: bf16[3,8,16], index: 10, kind: input, shape index: {}]   ;;  %s10291_s11 = inlined_call_operand.hbm [shape: bf16[3,256,256], index: 11, kind: input, shape index: {}]   ;;  %s10292_s12 = inlined_call_operand.vmem [shape: f32[2,256], index: 12, kind: input, shape index: {}]   ;;  %s10293_s13 = inlined_call_operand.vmem [shape: bf16[3,4,8], index: 13, kind: input, shape index: {}]   ;;  %s10294_s14 = inlined_call_operand.hbm [shape: bf16[3,256,256], index: 14, kind: input, shape index: {}]   ;;  %s10295_s15 = inlined_call_operand.vmem [shape: f32[2,256], index: 15, kind: input, shape index: {}]   ;;  %s10296_s16 = inlined_call_operand.hbm [shape: bf16[32,256], index: 16, kind: output, shape index: {0}]   ;;  %s10297_s17 = inlined_call_operand.hbm [shape: bf16[16,256], index: 17, kind: output, shape index: {1}]   ;;  %s10298_s18 = inlined_call_operand.hbm [shape: bf16[8,256], index: 18, kind: output, shape index: {2}]   ;;  %s10299_s19 = inlined_call_operand.vmem [shape: bf16[4,256], index: 19, kind: output, shape index: {3}]  }
   0x1   :  { %10304 = sst [smem:[#allocation19_spill]] %s10280_s0 }
   0x2   :  { %10305 = sst [smem:[#allocation20_spill]] %s10281_s1 }
   0x3   :  { %10306 = sst [smem:[#allocation21_spill]] %s10282_s2 }
   0x4   :  { %10307 = sst [smem:[#allocation22_spill]] %s10283_s3 }
   0x5   :  { %25 = vsyncpa [#allocation3], 0 }
   0x6   :  { %26 = vsyncpa [#allocation6], 0 }
   0x7   :  { %27 = vsyncpa [#allocation9], 0 }
   0x8   :  { %28 = vsyncpa [#allocation4], 0 }
   0x9   :  { %29 = vsyncpa [#allocation12], 0  ;;  %s8968_s0 = smov [#allocation5]   ;;  %s8969_s20 = smov [#allocation2]  }
   0xa   :  { %s61_s30 = sshll.u32 %s8968_s0, 4  ;;  %s45_s21 = sshll.u32 %s8969_s20, 4  ;;  %s62_s30 = int_to_ptr.vmem [resolvable:$true] %s61_s30  ;;  %s9078_s21 = int_to_ptr.vmem [resolvable:$true] %s45_s21 }
   0xb   :  { %s8804_s2 = scalar_lea.hbm %s10288_s8, 12288 }
   0xc   :  { %p8805_p0 = scmp.ne.s32.totalorder %s10288_s8, %s8804_s2  ;;  %p8808_p1 = scmp.lt.u32.totalorder %s8804_s2, %s10288_s8 }
   0xe   :  { %p8810_p2 = pnand %p8808_p1, %p8805_p0 }
  0x10   :  { %8813 = shalt.err (!%p8810_p2)
}
  0x11   :  { %s8814_s26 = scalar_lea.vmem %s62_s30, 12288  ;;  %p8819_p4 = scmp.lt.s32.totalorder %s62_s30, %s62_s30 }
  0x12   :  { %p8815_p3 = scmp.ne.s32.totalorder %s62_s30, %s8814_s26  ;;  %p8820_p5 = scmp.lt.s32.totalorder %s8814_s26, %s8814_s26 }
  0x14   :  { %p8821_p6 = por %p8820_p5, %p8819_p4 }
  0x16   :  { %p8822_p7 = pnand %p8821_p6, %p8815_p3 }
  0x18   :  { %8825 = shalt.err (!%p8822_p7)
}
  0x19   :  { %s8970_s27 = smov 128   ;;  %s8971_s28 = smov 8  }
  0x1a   :  { %67 = dma.hbm_to_vmem [thread:$0]  %s10288_s8, 12288, %s62_s30, [#allocation6], %s8970_s27, %s8970_s27, %s8971_s28  }
  0x1b   :  { %s8826_s22 = scalar_lea.hbm %s10285_s5, 24576 }
  0x1c   :  { %p8827_p8 = scmp.ne.s32.totalorder %s10285_s5, %s8826_s22  ;;  %p8830_p9 = scmp.lt.u32.totalorder %s8826_s22, %s10285_s5 }
  0x1e   :  { %p8832_p10 = pnand %p8830_p9, %p8827_p8 }
  0x20   :  { %8835 = shalt.err (!%p8832_p10)
}
  0x21   :  { %s8836_s3 = scalar_lea.vmem %s9078_s21, 24576  ;;  %p8841_p12 = scmp.lt.s32.totalorder %s9078_s21, %s9078_s21 }
  0x22   :  { %p8837_p11 = scmp.ne.s32.totalorder %s9078_s21, %s8836_s3  ;;  %p8842_p13 = scmp.lt.s32.totalorder %s8836_s3, %s8836_s3 }
  0x24   :  { %p8843_p0 = por %p8842_p13, %p8841_p12 }
  0x26   :  { %p8844_p1 = pnand %p8843_p0, %p8837_p11 }
  0x28   :  { %8847 = shalt.err (!%p8844_p1)
}
  0x29   :  { %51 = dma.hbm_to_vmem [thread:$0]  %s10285_s5, 24576, %s9078_s21, [#allocation3], %s8970_s27, %s8970_s27, %s8971_s28  }
  0x2a   :  { %s8972_s26 = smov [#allocation7]   ;;  %s8973_s0 = smov [#allocation8]  }
  0x2b   :  { %s77_s29 = sshll.u32 %s8972_s26, 4  ;;  %s93_s20 = sshll.u32 %s8973_s0, 4  ;;  %s78_s29 = int_to_ptr.vmem [resolvable:$true] %s77_s29  ;;  %s9115_s20 = int_to_ptr.vmem [resolvable:$true] %s93_s20 }
  0x2c   :  { %s8848_s2 = scalar_lea.hbm %s10291_s11, 12288 }
  0x2d   :  { %p8849_p2 = scmp.ne.s32.totalorder %s10291_s11, %s8848_s2  ;;  %p8852_p3 = scmp.lt.u32.totalorder %s8848_s2, %s10291_s11 }
  0x2f   :  { %p8854_p4 = pnand %p8852_p3, %p8849_p2 }
  0x31   :  { %8857 = shalt.err (!%p8854_p4)
}
  0x32   :  { %s8858_s5 = scalar_lea.vmem %s78_s29, 12288  ;;  %p8863_p6 = scmp.lt.s32.totalorder %s78_s29, %s78_s29 }
  0x33   :  { %p8859_p5 = scmp.ne.s32.totalorder %s78_s29, %s8858_s5  ;;  %p8864_p7 = scmp.lt.s32.totalorder %s8858_s5, %s8858_s5 }
  0x35   :  { %p8865_p8 = por %p8864_p7, %p8863_p6 }
  0x37   :  { %p8866_p9 = pnand %p8865_p8, %p8859_p5 }
  0x39   :  { %8869 = shalt.err (!%p8866_p9)
}
  0x3a   :  { %83 = dma.hbm_to_vmem [thread:$0]  %s10291_s11, 12288, %s78_s29, [#allocation6], %s8970_s27, %s8970_s27, %s8971_s28  }
  0x3b   :  { %s8870_s0 = scalar_lea.hbm %s10294_s14, 12288 }
  0x3c   :  { %p8871_p10 = scmp.ne.s32.totalorder %s10294_s14, %s8870_s0  ;;  %p8874_p11 = scmp.lt.u32.totalorder %s8870_s0, %s10294_s14 }
  0x3e   :  { %p8876_p12 = pnand %p8874_p11, %p8871_p10 }
  0x40   :  { %8879 = shalt.err (!%p8876_p12)
}
  0x41   :  { %s8880_s24 = scalar_lea.vmem %s9115_s20, 12288  ;;  %p8885_p0 = scmp.lt.s32.totalorder %s9115_s20, %s9115_s20 }
  0x42   :  { %p8881_p13 = scmp.ne.s32.totalorder %s9115_s20, %s8880_s24  ;;  %p8886_p1 = scmp.lt.s32.totalorder %s8880_s24, %s8880_s24 }
  0x44   :  { %p8887_p2 = por %p8886_p1, %p8885_p0 }
  0x46   :  { %p8888_p3 = pnand %p8887_p2, %p8881_p13 }
  0x48   :  { %8891 = shalt.err (!%p8888_p3)
}
  0x49   :  { %99 = dma.hbm_to_vmem [thread:$0]  %s10294_s14, 12288, %s9115_s20, [#allocation9], %s8970_s27, %s8970_s27, %s8971_s28  }
  0x4a   :  { %8958 = dma.done.wait [#allocation3], 24576  }
  0x4b   :  { %8959 = vsyncadd [#allocation3], 4294942720 }
  0x4c   :  { %8960 = dma.done.wait [#allocation6], 24576  }
  0x4d   :  { %8961 = vsyncadd [#allocation6], 4294942720 }
  0x4e   :  { %8962 = dma.done.wait [#allocation9], 12288  }
  0x4f   :  { %8963 = vsyncadd [#allocation9], 4294955008  ;;  %v8974_v0 = vmov 0   ;;  %s10308_s5 = sld [smem:[#allocation19_spill]]  ;;  %s10309_s21 = sld [smem:[#allocation21_spill]]  ;;  %vm775_vm0 = vcmask 523264  }
  0x50   :  { %437 = vmatprep.mubr.bf16.mxu1 %v8974_v0  ;;  %275 = vmatprep.mubr.bf16.mxu0 %v8974_v0  ;;  %s10310_s26 = sld [smem:[#allocation20_spill]]  ;;  %s10311_s8 = sld [smem:[#allocation22_spill]]  ;;  %vm4050_vm1 = vcmask 261120   ;;  %vm4974_vm2 = vcmask 130048   ;;  %vm5865_vm3 = vcmask 1043456   ;;  %vm5861_vm4 = vcmask 64512  }
  0x51   :  { %s8976_s0 = smov [#allocation10]  }
  0x52   :  { %s6764_s1 = sshll.u32 %s8976_s0, 4  ;;  %s6765_s1 = int_to_ptr.vmem [resolvable:$true] %s6764_s1 }
  0x55   :  { %v7807_v1 = vld [vmem:[%s10308_s5 + $0x4] ss:$8 sps:$4 sm:$0xff]   ;;  %v7809_v2 = vld [vmem:[%s10308_s5] ss:$8 sps:$4 sm:$0xff]   ;;  %v7810_v3 = vld [vmem:[%s10308_s5 + $0x14] ss:$8 sps:$4 sm:$0xff]  }
  0x56   :  { %405 = vmatprep.subr.bf16.mxu1 %v7807_v1  ;;  %243 = vmatprep.subr.bf16.mxu0 %v7807_v1  ;;  %v7812_v4 = vld [vmem:[%s10308_s5 + $0x10] ss:$8 sps:$4 sm:$0xff]   ;;  %v7813_v5 = vld [vmem:[%s10308_s5 + $0x24] ss:$8 sps:$4 sm:$0xff]   ;;  %v7815_v6 = vld [vmem:[%s10308_s5 + $0x20] ss:$8 sps:$4 sm:$0xff]  }
  0x57   :  { %406 = vmatpush1.bf16.msra.mxu1 %v7809_v2  ;;  %244 = vmatpush1.bf16.msra.mxu0 %v7809_v2  ;;  %v7816_v7 = vld [vmem:[%s10308_s5 + $0x34] ss:$8 sps:$4 sm:$0xff]   ;;  %v7818_v8 = vld [vmem:[%s10308_s5 + $0x30] ss:$8 sps:$4 sm:$0xff]   ;;  %v7819_v9 = vld [vmem:[%s10308_s5 + $0x44] ss:$8 sps:$4 sm:$0xff]  }
  0x58   :  { %407 = vmatprep.subr.bf16.mxu1 %v7810_v3  ;;  %245 = vmatprep.subr.bf16.mxu0 %v7810_v3  ;;  %v7821_v10 = vld [vmem:[%s10308_s5 + $0x40] ss:$8 sps:$4 sm:$0xff]   ;;  %v7822_v11 = vld [vmem:[%s10308_s5 + $0x54] ss:$8 sps:$4 sm:$0xff]   ;;  %v7824_v12 = vld [vmem:[%s10308_s5 + $0x50] ss:$8 sps:$4 sm:$0xff]  }
  0x59   :  { %v7825_v13 = vld [vmem:[%s10308_s5 + $0x64] ss:$8 sps:$4 sm:$0xff]   ;;  %v7827_v14 = vld [vmem:[%s10308_s5 + $0x60] ss:$8 sps:$4 sm:$0xff]   ;;  %v7828_v15 = vld [vmem:[%s10308_s5 + $0x74] ss:$8 sps:$4 sm:$0xff]  }
  0x5a   :  { %v7830_v16 = vld [vmem:[%s10308_s5 + $0x70] ss:$8 sps:$4 sm:$0xff]   ;;  %v7841_v17 = vld [vmem:[%s10309_s21 + $0x184] ss:$16 sps:$4 sm:$0xff]   ;;  %v7844_v18 = vld [vmem:[%s10309_s21 + $0x18c] ss:$16 sps:$4 sm:$0xff]  }
  0x5b   :  { %408 = vmatpush1.bf16.msra.mxu1 %v7812_v4  ;;  %246 = vmatpush1.bf16.msra.mxu0 %v7812_v4  ;;  %v7831_v19 = vld [vmem:[%s10310_s26 + $0x20] sm:$0xff]   ;;  %v7842_v22 = vld [vmem:[%s10309_s21 + $0x188] ss:$16 sps:$4 sm:$0xff]   ;;  %v7850_v24 = vld [vmem:[%s10309_s21 + $0x1ac] ss:$16 sps:$4 sm:$0xff]  }
  0x5c   :  { %409 = vmatprep.subr.bf16.mxu1 %v7813_v5  ;;  %247 = vmatprep.subr.bf16.mxu0 %v7813_v5  ;;  %v7835_v20 = vld [vmem:[%s10310_s26] sm:$0xff]   ;;  %v7848_v26 = vld [vmem:[%s10309_s21 + $0x1a8] ss:$16 sps:$4 sm:$0xff]   ;;  %v7856_v28 = vld [vmem:[%s10309_s21 + $0x1cc] ss:$16 sps:$4 sm:$0xff]  }
  0x5d   :  { %v7839_v21 = vld [vmem:[%s10309_s21 + $0x180] ss:$16 sps:$4 sm:$0xff]   ;;  %v7847_v23 = vld [vmem:[%s10309_s21 + $0x1a4] ss:$16 sps:$4 sm:$0xff]   ;;  %v7832_v29 = vld [vmem:[%s10310_s26 + $0x28] sm:$0xff]  }
  0x5e   :  { %v7845_v25 = vld [vmem:[%s10309_s21 + $0x1a0] ss:$16 sps:$4 sm:$0xff]   ;;  %v7853_v27 = vld [vmem:[%s10309_s21 + $0x1c4] ss:$16 sps:$4 sm:$0xff]   ;;  %v7836_v30 = vld [vmem:[%s10310_s26 + $0x8] sm:$0xff]  }
  0x5f   :  { %410 = vmatpush1.bf16.msra.mxu1 %v7815_v6  ;;  %248 = vmatpush1.bf16.msra.mxu0 %v7815_v6  ;;  %v7851_v31 = vld [vmem:[%s10309_s21 + $0x1c0] ss:$16 sps:$4 sm:$0xff]   ;;  %v7854_v32 = vld [vmem:[%s10309_s21 + $0x1c8] ss:$16 sps:$4 sm:$0xff]   ;;  %v7859_v33 = vld [vmem:[%s10309_s21 + $0x1e4] ss:$16 sps:$4 sm:$0xff]  }
  0x60   :  { %411 = vmatprep.subr.bf16.mxu1 %v7816_v7  ;;  %249 = vmatprep.subr.bf16.mxu0 %v7816_v7  ;;  %v7862_v34 = vld [vmem:[%s10309_s21 + $0x1ec] ss:$16 sps:$4 sm:$0xff]   ;;  %v7857_v35 = vld [vmem:[%s10309_s21 + $0x1e0] ss:$16 sps:$4 sm:$0xff]   ;;  %v7860_v36 = vld [vmem:[%s10309_s21 + $0x1e8] ss:$16 sps:$4 sm:$0xff]  }
  0x61   :  { %v7833_v37 = vld [vmem:[%s10310_s26 + $0x30] sm:$0xff]   ;;  %v7868_v40 = vld [vmem:[%s10309_s21 + $0x20c] ss:$16 sps:$4 sm:$0xff]   ;;  %v7866_v42 = vld [vmem:[%s10309_s21 + $0x208] ss:$16 sps:$4 sm:$0xff]  }
  0x62   :  { %v7837_v38 = vld [vmem:[%s10310_s26 + $0x10] sm:$0xff]   ;;  %v7874_v44 = vld [vmem:[%s10309_s21 + $0x22c] ss:$16 sps:$4 sm:$0xff]   ;;  %v7872_v46 = vld [vmem:[%s10309_s21 + $0x228] ss:$16 sps:$4 sm:$0xff]  }
  0x63   :  { %412 = vmatpush1.bf16.msra.mxu1 %v7818_v8  ;;  %250 = vmatpush1.bf16.msra.mxu0 %v7818_v8  ;;  %v7865_v39 = vld [vmem:[%s10309_s21 + $0x204] ss:$16 sps:$4 sm:$0xff]   ;;  %v7863_v41 = vld [vmem:[%s10309_s21 + $0x200] ss:$16 sps:$4 sm:$0xff]   ;;  %v7880_v48 = vld [vmem:[%s10309_s21 + $0x24c] ss:$16 sps:$4 sm:$0xff]  }
  0x64   :  { %413 = vmatprep.subr.bf16.mxu1 %v7819_v9  ;;  %251 = vmatprep.subr.bf16.mxu0 %v7819_v9  ;;  %v7871_v43 = vld [vmem:[%s10309_s21 + $0x224] ss:$16 sps:$4 sm:$0xff]   ;;  %v7869_v45 = vld [vmem:[%s10309_s21 + $0x220] ss:$16 sps:$4 sm:$0xff]   ;;  %v7834_v49 = vld [vmem:[%s10310_s26 + $0x38] sm:$0xff]  }
  0x65   :  { %v7877_v47 = vld [vmem:[%s10309_s21 + $0x244] ss:$16 sps:$4 sm:$0xff]   ;;  %v7838_v50 = vld [vmem:[%s10310_s26 + $0x18] sm:$0xff]   ;;  %v7875_v51 = vld [vmem:[%s10309_s21 + $0x240] ss:$16 sps:$4 sm:$0xff]  }
  0x66   :  { %v7878_v52 = vld [vmem:[%s10309_s21 + $0x248] ss:$16 sps:$4 sm:$0xff]   ;;  %v7883_v53 = vld [vmem:[%s10309_s21 + $0x264] ss:$16 sps:$4 sm:$0xff]   ;;  %v7886_v54 = vld [vmem:[%s10309_s21 + $0x26c] ss:$16 sps:$4 sm:$0xff]  }
  0x67   :  { %414 = vmatpush1.bf16.msra.mxu1 %v7821_v10  ;;  %252 = vmatpush1.bf16.msra.mxu0 %v7821_v10  ;;  %v7881_v55 = vld [vmem:[%s10309_s21 + $0x260] ss:$16 sps:$4 sm:$0xff]   ;;  %v7884_v56 = vld [vmem:[%s10309_s21 + $0x268] ss:$16 sps:$4 sm:$0xff]   ;;  %v7889_v57 = vld [vmem:[%s10309_s21 + $0x284] ss:$16 sps:$4 sm:$0xff]  }
  0x68   :  { %415 = vmatprep.subr.bf16.mxu1 %v7822_v11  ;;  %253 = vmatprep.subr.bf16.mxu0 %v7822_v11  ;;  %v7892_v58 = vld [vmem:[%s10309_s21 + $0x28c] ss:$16 sps:$4 sm:$0xff]   ;;  %v7887_v59 = vld [vmem:[%s10309_s21 + $0x280] ss:$16 sps:$4 sm:$0xff]   ;;  %v7890_v60 = vld [vmem:[%s10309_s21 + $0x288] ss:$16 sps:$4 sm:$0xff]  }
  0x69   :  { %v7895_v61 = vld [vmem:[%s10309_s21 + $0x2a4] ss:$16 sps:$4 sm:$0xff]   ;;  %v7898_v62 = vld [vmem:[%s10309_s21 + $0x2ac] ss:$16 sps:$4 sm:$0xff]   ;;  %v7893_v63 = vld [vmem:[%s10309_s21 + $0x2a0] ss:$16 sps:$4 sm:$0xff]  }
  0x6a   :  { %v7896_v1 = vld [vmem:[%s10309_s21 + $0x2a8] ss:$16 sps:$4 sm:$0xff]   ;;  %v7901_v2 = vld [vmem:[%s10309_s21 + $0x2c4] ss:$16 sps:$4 sm:$0xff]   ;;  %v7904_v3 = vld [vmem:[%s10309_s21 + $0x2cc] ss:$16 sps:$4 sm:$0xff]  }
  0x6b   :  { %416 = vmatpush1.bf16.msra.mxu1 %v7824_v12  ;;  %254 = vmatpush1.bf16.msra.mxu0 %v7824_v12  ;;  %v7899_v4 = vld [vmem:[%s10309_s21 + $0x2c0] ss:$16 sps:$4 sm:$0xff]   ;;  %v7902_v5 = vld [vmem:[%s10309_s21 + $0x2c8] ss:$16 sps:$4 sm:$0xff]   ;;  %v7907_v6 = vld [vmem:[%s10309_s21 + $0x2e4] ss:$16 sps:$4 sm:$0xff]  }
  0x6c   :  { %417 = vmatprep.subr.bf16.mxu1 %v7825_v13  ;;  %255 = vmatprep.subr.bf16.mxu0 %v7825_v13  ;;  %v7910_v7 = vld [vmem:[%s10309_s21 + $0x2ec] ss:$16 sps:$4 sm:$0xff]   ;;  %v7905_v8 = vld [vmem:[%s10309_s21 + $0x2e0] ss:$16 sps:$4 sm:$0xff]   ;;  %v7908_v9 = vld [vmem:[%s10309_s21 + $0x2e8] ss:$16 sps:$4 sm:$0xff]  }
  0x6d   :  { %v7913_v10 = vld [vmem:[%s10309_s21 + $0x4] ss:$16 sps:$4 sm:$0xff]   ;;  %v7916_v11 = vld [vmem:[%s10309_s21 + $0xc] ss:$16 sps:$4 sm:$0xff]  }
  0x6f   :  { %418 = vmatpush1.bf16.msra.mxu1 %v7827_v14  ;;  %256 = vmatpush1.bf16.msra.mxu0 %v7827_v14 }
  0x70   :  { %419 = vmatprep.subr.bf16.mxu1 %v7828_v15  ;;  %257 = vmatprep.subr.bf16.mxu0 %v7828_v15 }
  0x73   :  { %420 = vmatpush1.bf16.msra.mxu1 %v7830_v16  ;;  %258 = vmatpush1.bf16.msra.mxu0 %v7830_v16 }
  0x74   :  { %788 = vmatprep.subr.bf16.mxu0 %v7841_v17  ;;  %861 = vmatprep.subr.bf16.mxu1 %v7844_v18  ;;  %v7911_v17 = vld [vmem:[%s10309_s21] ss:$16 sps:$4 sm:$0xff]   ;;  %v7914_v18 = vld [vmem:[%s10309_s21 + $0x8] ss:$16 sps:$4 sm:$0xff]  }
  0x76   :  { %438 = vmatmul.mubr.bf16.vlgmr.msra.gmra.mrb[0].mxu1 %v7831_v19  ;;  %276 = vmatmul.mubr.bf16.vlgmr.msra.gmra.mrb[0].mxu0 %v7835_v20 }
  0x77   :  { %447 = vmatprep.mubr.bf16.mxu1 %v8974_v0  ;;  %285 = vmatprep.mubr.bf16.mxu0 %v8974_v0 }
  0x78   :  { %789 = vmatpush1.bf16.msra.mxu0 %v7839_v21  ;;  %862 = vmatpush1.bf16.msra.mxu1 %v7842_v22  ;;  %v7919_v22 = vld [vmem:[%s10309_s21 + $0x24] ss:$16 sps:$4 sm:$0xff]  }
  0x79   :  { %790 = vmatprep.subr.bf16.mxu0 %v7847_v23  ;;  %863 = vmatprep.subr.bf16.mxu1 %v7850_v24  ;;  %v7922_v23 = vld [vmem:[%s10309_s21 + $0x2c] ss:$16 sps:$4 sm:$0xff]  }
  0x7c   :  { %791 = vmatpush1.bf16.msra.mxu0 %v7845_v25  ;;  %864 = vmatpush1.bf16.msra.mxu1 %v7848_v26 }
  0x7d   :  { %792 = vmatprep.subr.bf16.mxu0 %v7853_v27  ;;  %865 = vmatprep.subr.bf16.mxu1 %v7856_v28  ;;  %v7917_v28 = vld [vmem:[%s10309_s21 + $0x20] ss:$16 sps:$4 sm:$0xff]  }
  0x7e   :  { %448 = vmatmul.mubr.bf16.gmra.mrb[4].mxu1 %v7832_v29  ;;  %286 = vmatmul.mubr.bf16.gmra.mrb[4].mxu0 %v7836_v30  ;;  %v7920_v29 = vld [vmem:[%s10309_s21 + $0x28] ss:$16 sps:$4 sm:$0xff]   ;;  %v7925_v30 = vld [vmem:[%s10309_s21 + $0x44] ss:$16 sps:$4 sm:$0xff]  }
  0x7f   :  { %457 = vmatprep.mubr.bf16.mxu1 %v8974_v0  ;;  %295 = vmatprep.mubr.bf16.mxu0 %v8974_v0 }
  0x80   :  { %793 = vmatpush1.bf16.msra.mxu0 %v7851_v31  ;;  %866 = vmatpush1.bf16.msra.mxu1 %v7854_v32  ;;  %v7928_v31 = vld [vmem:[%s10309_s21 + $0x4c] ss:$16 sps:$4 sm:$0xff]  }
  0x81   :  { %794 = vmatprep.subr.bf16.mxu0 %v7859_v33  ;;  %867 = vmatprep.subr.bf16.mxu1 %v7862_v34 }
  0x84   :  { %795 = vmatpush1.bf16.msra.mxu0 %v7857_v35  ;;  %868 = vmatpush1.bf16.msra.mxu1 %v7860_v36  ;;  %v7923_v36 = vld [vmem:[%s10309_s21 + $0x40] ss:$16 sps:$4 sm:$0xff]  }
  0x85   :  { %796 = vmatprep.subr.bf16.mxu0 %v7865_v39  ;;  %869 = vmatprep.subr.bf16.mxu1 %v7868_v40  ;;  %v7931_v40 = vld [vmem:[%s10309_s21 + $0x64] ss:$16 sps:$4 sm:$0xff]  }
  0x86   :  { %458 = vmatmul.mubr.bf16.gmra.mrb[8].mxu1 %v7833_v37  ;;  %296 = vmatmul.mubr.bf16.gmra.mrb[8].mxu0 %v7837_v38  ;;  %v7926_v37 = vld [vmem:[%s10309_s21 + $0x48] ss:$16 sps:$4 sm:$0xff]  }
  0x87   :  { %467 = vmatprep.mubr.bf16.mxu1 %v8974_v0  ;;  %305 = vmatprep.mubr.bf16.mxu0 %v8974_v0 }
  0x88   :  { %797 = vmatpush1.bf16.msra.mxu0 %v7863_v41  ;;  %870 = vmatpush1.bf16.msra.mxu1 %v7866_v42  ;;  %v7934_v41 = vld [vmem:[%s10309_s21 + $0x6c] ss:$16 sps:$4 sm:$0xff]  }
  0x89   :  { %798 = vmatprep.subr.bf16.mxu0 %v7871_v43  ;;  %871 = vmatprep.subr.bf16.mxu1 %v7874_v44 }
  0x8c   :  { %799 = vmatpush1.bf16.msra.mxu0 %v7869_v45  ;;  %872 = vmatpush1.bf16.msra.mxu1 %v7872_v46 }
  0x8d   :  { %800 = vmatprep.subr.bf16.mxu0 %v7877_v47  ;;  %873 = vmatprep.subr.bf16.mxu1 %v7880_v48  ;;  %v7929_v48 = vld [vmem:[%s10309_s21 + $0x60] ss:$16 sps:$4 sm:$0xff]  }
  0x8e   :  { %468 = vmatmul.mubr.bf16.gmra.mrb[12].mxu1 %v7834_v49  ;;  %306 = vmatmul.mubr.bf16.gmra.mrb[12].mxu0 %v7838_v50  ;;  %v7932_v49 = vld [vmem:[%s10309_s21 + $0x68] ss:$16 sps:$4 sm:$0xff]   ;;  %v7937_v50 = vld [vmem:[%s10309_s21 + $0x84] ss:$16 sps:$4 sm:$0xff]  }
  0x90   :  { %801 = vmatpush1.bf16.msra.mxu0 %v7875_v51  ;;  %874 = vmatpush1.bf16.msra.mxu1 %v7878_v52  ;;  %v7940_v51 = vld [vmem:[%s10309_s21 + $0x8c] ss:$16 sps:$4 sm:$0xff]  }
  0x91   :  { %802 = vmatprep.subr.bf16.mxu0 %v7883_v53  ;;  %875 = vmatprep.subr.bf16.mxu1 %v7886_v54 }
  0x94   :  { %803 = vmatpush1.bf16.msra.mxu0 %v7881_v55  ;;  %876 = vmatpush1.bf16.msra.mxu1 %v7884_v56  ;;  %v7935_v56 = vld [vmem:[%s10309_s21 + $0x80] ss:$16 sps:$4 sm:$0xff]  }
  0x95   :  { %804 = vmatprep.subr.bf16.mxu0 %v7889_v57  ;;  %877 = vmatprep.subr.bf16.mxu1 %v7892_v58  ;;  %v7938_v57 = vld [vmem:[%s10309_s21 + $0x88] ss:$16 sps:$4 sm:$0xff]  }
  0x98   :  { %805 = vmatpush1.bf16.msra.mxu0 %v7887_v59  ;;  %878 = vmatpush1.bf16.msra.mxu1 %v7890_v60  ;;  %v7943_v60 = vld [vmem:[%s10309_s21 + $0xa4] ss:$16 sps:$4 sm:$0xff]  }
  0x99   :  { %806 = vmatprep.subr.bf16.mxu0 %v7895_v61  ;;  %879 = vmatprep.subr.bf16.mxu1 %v7898_v62  ;;  %v7946_v61 = vld [vmem:[%s10309_s21 + $0xac] ss:$16 sps:$4 sm:$0xff]  }
  0x9c   :  { %807 = vmatpush1.bf16.msra.mxu0 %v7893_v63  ;;  %880 = vmatpush1.bf16.msra.mxu1 %v7896_v1 }
  0x9d   :  { %808 = vmatprep.subr.bf16.mxu0 %v7901_v2  ;;  %881 = vmatprep.subr.bf16.mxu1 %v7904_v3 }
  0xa0   :  { %809 = vmatpush1.bf16.msra.mxu0 %v7899_v4  ;;  %882 = vmatpush1.bf16.msra.mxu1 %v7902_v5  ;;  %v7941_v5 = vld [vmem:[%s10309_s21 + $0xa0] ss:$16 sps:$4 sm:$0xff]  }
  0xa1   :  { %810 = vmatprep.subr.bf16.mxu0 %v7907_v6  ;;  %883 = vmatprep.subr.bf16.mxu1 %v7910_v7  ;;  %v7944_v6 = vld [vmem:[%s10309_s21 + $0xa8] ss:$16 sps:$4 sm:$0xff]   ;;  %v7949_v7 = vld [vmem:[%s10309_s21 + $0xc4] ss:$16 sps:$4 sm:$0xff]  }
  0xa4   :  { %811 = vmatpush1.bf16.msra.mxu0 %v7905_v8  ;;  %884 = vmatpush1.bf16.msra.mxu1 %v7908_v9  ;;  %v7952_v8 = vld [vmem:[%s10309_s21 + $0xcc] ss:$16 sps:$4 sm:$0xff]  }
  0xa5   :  { %1186 = vmatprep.subr.bf16.mxu0 %v7913_v10  ;;  %1259 = vmatprep.subr.bf16.mxu1 %v7916_v11 }
 0x149   :  { %v439_v12 = vpop.f32.mrb[0].mxu1  ;;  %v277_v13 = vpop.f32.mrb[0].mxu0 }
 0x14a   :  { %v441_v14 = vpop.f32.mrb[1].mxu1  ;;  %v279_v15 = vpop.f32.mrb[1].mxu0 }
 0x14b   :  { %v443_v16 = vpop.f32.mrb[2].mxu1  ;;  %v281_v19 = vpop.f32.mrb[2].mxu0 }
 0x14c   :  { %v478_v20 = vpack.c.bf16 %v443_v16, %v439_v12  ;;  %v445_v21 = vpop.f32.mrb[3].mxu1  ;;  %v9394_v24 = vpack.c.bf16 %v281_v19, %v277_v13  ;;  %v283_v25 = vpop.f32.mrb[3].mxu0  ;;  %v7947_v13 = vld [vmem:[%s10309_s21 + $0xc0] ss:$16 sps:$4 sm:$0xff]  }
 0x14d   :  { %v479_v26 = vpack.c.bf16 %v445_v21, %v441_v14  ;;  %v9396_v27 = vpack.c.bf16 %v283_v25, %v279_v15  ;;  %v7950_v14 = vld [vmem:[%s10309_s21 + $0xc8] ss:$16 sps:$4 sm:$0xff]  }
 0x14f   :  { %6939 = vmatprep.mubr.msk.bf16.mxu0 %vm775_vm0, %v479_v26  ;;  %6943 = vmatprep.mubr.msk.bf16.mxu1 %vm775_vm0, %v479_v26  ;;  %v7953_v26 = vld [vmem:[%s10309_s21 + $0xe0] ss:$16 sps:$4 sm:$0xff]  }
 0x150   :  { %821 = vmatmul.mubr.bf16.vlgmr.msra.gmra.mrb[16].mxu0 %v478_v20  ;;  %894 = vmatmul.mubr.bf16.vlgmr.msra.gmra.mrb[16].mxu1 %v478_v20 }
 0x151   :  { %1187 = vmatpush1.bf16.msra.mxu0 %v7911_v17  ;;  %1260 = vmatpush1.bf16.msra.mxu1 %v7914_v18  ;;  %v449_v32 = vpop.f32.mrb[4].mxu1  ;;  %v287_v33 = vpop.f32.mrb[4].mxu0  ;;  %v7955_v17 = vld [vmem:[%s10309_s21 + $0xe4] ss:$16 sps:$4 sm:$0xff]   ;;  %v7958_v18 = vld [vmem:[%s10309_s21 + $0xec] ss:$16 sps:$4 sm:$0xff]  }
 0x152   :  { %1188 = vmatprep.subr.bf16.mxu0 %v7919_v22  ;;  %1261 = vmatprep.subr.bf16.mxu1 %v7922_v23  ;;  %v451_v34 = vpop.f32.mrb[5].mxu1  ;;  %v289_v35 = vpop.f32.mrb[5].mxu0 }
 0x153   :  { %v453_v38 = vpop.f32.mrb[6].mxu1  ;;  %v291_v39 = vpop.f32.mrb[6].mxu0 }
 0x154   :  { %v480_v42 = vpack.c.bf16 %v453_v38, %v449_v32  ;;  %v455_v43 = vpop.f32.mrb[7].mxu1  ;;  %v9424_v44 = vpack.c.bf16 %v291_v39, %v287_v33  ;;  %v293_v45 = vpop.f32.mrb[7].mxu0  ;;  %v7962_v32 = vld [vmem:[%s10309_s21 + $0x108] ss:$16 sps:$4 sm:$0xff]   ;;  %v7967_v33 = vld [vmem:[%s10309_s21 + $0x124] ss:$16 sps:$4 sm:$0xff]  }
 0x155   :  { %1189 = vmatpush1.bf16.msra.mxu0 %v7917_v28  ;;  %1262 = vmatpush1.bf16.msra.mxu1 %v7920_v29  ;;  %v481_v46 = vpack.c.bf16 %v455_v43, %v451_v34  ;;  %v9426_v47 = vpack.c.bf16 %v293_v45, %v289_v35  ;;  %v7956_v28 = vld [vmem:[%s10309_s21 + $0xe8] ss:$16 sps:$4 sm:$0xff]   ;;  %v7961_v29 = vld [vmem:[%s10309_s21 + $0x104] ss:$16 sps:$4 sm:$0xff]   ;;  %v7970_v34 = vld [vmem:[%s10309_s21 + $0x12c] ss:$16 sps:$4 sm:$0xff]  }
 0x156   :  { %1190 = vmatprep.subr.bf16.mxu0 %v7925_v30  ;;  %1263 = vmatprep.subr.bf16.mxu1 %v7928_v31  ;;  %v7964_v30 = vld [vmem:[%s10309_s21 + $0x10c] ss:$16 sps:$4 sm:$0xff]   ;;  %v7959_v31 = vld [vmem:[%s10309_s21 + $0x100] ss:$16 sps:$4 sm:$0xff]   ;;  %v7974_v39 = vld [vmem:[%s10309_s21 + $0x148] ss:$16 sps:$4 sm:$0xff]  }
 0x157   :  { %6940 = vmatprep.mubr.msk.bf16.mxu0 %vm775_vm0, %v481_v46  ;;  %6944 = vmatprep.mubr.msk.bf16.mxu1 %vm775_vm0, %v481_v46  ;;  %v7965_v35 = vld [vmem:[%s10309_s21 + $0x120] ss:$16 sps:$4 sm:$0xff]   ;;  %v7980_v43 = vld [vmem:[%s10309_s21 + $0x168] ss:$16 sps:$4 sm:$0xff]   ;;  %v7992_v45 = vld [vmem:[%s10309_s21 + $0x30c] ss:$16 sps:$4 sm:$0xff]  }
 0x158   :  { %831 = vmatmul.mubr.bf16.gmra.mrb[20].mxu0 %v480_v42  ;;  %904 = vmatmul.mubr.bf16.gmra.mrb[20].mxu1 %v480_v42  ;;  %v7971_v38 = vld [vmem:[%s10309_s21 + $0x140] ss:$16 sps:$4 sm:$0xff]   ;;  %v8788_v46 = vld [vmem:[%s10308_s5 + $0x4] ss:$8 sps:$4 sm:$0xff]  }
 0x159   :  { %1191 = vmatpush1.bf16.msra.mxu0 %v7923_v36  ;;  %1264 = vmatpush1.bf16.msra.mxu1 %v7926_v37  ;;  %v459_v52 = vpop.f32.mrb[8].mxu1  ;;  %v297_v53 = vpop.f32.mrb[8].mxu0  ;;  %v7973_v36 = vld [vmem:[%s10309_s21 + $0x144] ss:$16 sps:$4 sm:$0xff]   ;;  %v7976_v37 = vld [vmem:[%s10309_s21 + $0x14c] ss:$16 sps:$4 sm:$0xff]  }
 0x15a   :  { %1192 = vmatprep.subr.bf16.mxu0 %v7931_v40  ;;  %1265 = vmatprep.subr.bf16.mxu1 %v7934_v41  ;;  %v461_v54 = vpop.f32.mrb[9].mxu1  ;;  %v299_v55 = vpop.f32.mrb[9].mxu0  ;;  %v7979_v40 = vld [vmem:[%s10309_s21 + $0x164] ss:$16 sps:$4 sm:$0xff]   ;;  %v7982_v41 = vld [vmem:[%s10309_s21 + $0x16c] ss:$16 sps:$4 sm:$0xff]  }
 0x15b   :  { %v463_v58 = vpop.f32.mrb[10].mxu1  ;;  %v301_v59 = vpop.f32.mrb[10].mxu0  ;;  %v7977_v42 = vld [vmem:[%s10309_s21 + $0x160] ss:$16 sps:$4 sm:$0xff]  }
 0x15c   :  { %v482_v62 = vpack.c.bf16 %v463_v58, %v459_v52  ;;  %v465_v63 = vpop.f32.mrb[11].mxu1  ;;  %v9454_v1 = vpack.c.bf16 %v301_v59, %v297_v53  ;;  %v303_v2 = vpop.f32.mrb[11].mxu0  ;;  %v8791_v52 = vld [vmem:[%s10308_s5 + $0x10] ss:$8 sps:$4 sm:$0xff]   ;;  %v8004_v53 = vld [vmem:[%s10309_s21 + $0x34c] ss:$16 sps:$4 sm:$0xff]  }
 0x15d   :  { %1193 = vmatpush1.bf16.msra.mxu0 %v7929_v48  ;;  %1266 = vmatpush1.bf16.msra.mxu1 %v7932_v49  ;;  %v483_v3 = vpack.c.bf16 %v465_v63, %v461_v54  ;;  %v9456_v4 = vpack.c.bf16 %v303_v2, %v299_v55  ;;  %v7990_v48 = vld [vmem:[%s10309_s21 + $0x308] ss:$16 sps:$4 sm:$0xff]   ;;  %v7998_v49 = vld [vmem:[%s10309_s21 + $0x32c] ss:$16 sps:$4 sm:$0xff]  }
 0x15e   :  { %1194 = vmatprep.subr.bf16.mxu0 %v7937_v50  ;;  %1267 = vmatprep.subr.bf16.mxu1 %v7940_v51  ;;  %v8789_v50 = vld [vmem:[%s10308_s5] ss:$8 sps:$4 sm:$0xff]   ;;  %v8790_v51 = vld [vmem:[%s10308_s5 + $0x14] ss:$8 sps:$4 sm:$0xff]   ;;  %v8796_v58 = vld [vmem:[%s10308_s5 + $0x44] ss:$8 sps:$4 sm:$0xff]  }
 0x15f   :  { %6941 = vmatprep.mubr.msk.bf16.mxu0 %vm775_vm0, %v483_v3  ;;  %6945 = vmatprep.mubr.msk.bf16.mxu1 %vm775_vm0, %v483_v3  ;;  %v8002_v54 = vld [vmem:[%s10309_s21 + $0x348] ss:$16 sps:$4 sm:$0xff]   ;;  %v8800_v2 = vld [vmem:[%s10308_s5 + $0x64] ss:$8 sps:$4 sm:$0xff]  }
 0x160   :  { %841 = vmatmul.mubr.bf16.gmra.mrb[24].mxu0 %v482_v62  ;;  %914 = vmatmul.mubr.bf16.gmra.mrb[24].mxu1 %v482_v62  ;;  %v8793_v55 = vld [vmem:[%s10308_s5 + $0x20] ss:$8 sps:$4 sm:$0xff]   ;;  %v8798_v62 = vld [vmem:[%s10308_s5 + $0x54] ss:$8 sps:$4 sm:$0xff]  }
 0x161   :  { %1195 = vmatpush1.bf16.msra.mxu0 %v7935_v56  ;;  %1268 = vmatpush1.bf16.msra.mxu1 %v7938_v57  ;;  %v469_v9 = vpop.f32.mrb[12].mxu1  ;;  %v307_v10 = vpop.f32.mrb[12].mxu0  ;;  %v8010_v56 = vld [vmem:[%s10309_s21 + $0x36c] ss:$16 sps:$4 sm:$0xff]   ;;  %v8795_v57 = vld [vmem:[%s10308_s5 + $0x30] ss:$8 sps:$4 sm:$0xff]  }
 0x162   :  { %1196 = vmatprep.subr.bf16.mxu0 %v7943_v60  ;;  %1269 = vmatprep.subr.bf16.mxu1 %v7946_v61  ;;  %v471_v11 = vpop.f32.mrb[13].mxu1  ;;  %v309_v12 = vpop.f32.mrb[13].mxu0  ;;  %v8008_v59 = vld [vmem:[%s10309_s21 + $0x368] ss:$16 sps:$4 sm:$0xff]   ;;  %v8016_v60 = vld [vmem:[%s10309_s21 + $0x38c] ss:$16 sps:$4 sm:$0xff]  }
 0x163   :  { %v473_v15 = vpop.f32.mrb[14].mxu1  ;;  %v311_v16 = vpop.f32.mrb[14].mxu0  ;;  %v8797_v61 = vld [vmem:[%s10308_s5 + $0x40] ss:$8 sps:$4 sm:$0xff]   ;;  %v8022_v3 = vld [vmem:[%s10309_s21 + $0x3ac] ss:$16 sps:$4 sm:$0xff]  }
 0x164   :  { %v484_v19 = vpack.c.bf16 %v473_v15, %v469_v9  ;;  %v475_v20 = vpop.f32.mrb[15].mxu1  ;;  %v9484_v21 = vpack.c.bf16 %v311_v16, %v307_v10  ;;  %v313_v22 = vpop.f32.mrb[15].mxu0  ;;  %v8014_v63 = vld [vmem:[%s10309_s21 + $0x388] ss:$16 sps:$4 sm:$0xff]   ;;  %v7983_v10 = vld [vmem:[%s10310_s26 + $0x40] sm:$0xff]  }
 0x165   :  { %1197 = vmatpush1.bf16.msra.mxu0 %v7941_v5  ;;  %1270 = vmatpush1.bf16.msra.mxu1 %v7944_v6  ;;  %v485_v23 = vpack.c.bf16 %v475_v20, %v471_v11  ;;  %v9486_v25 = vpack.c.bf16 %v313_v22, %v309_v12  ;;  %v8028_v5 = vld [vmem:[%s10309_s21 + $0x3cc] ss:$16 sps:$4 sm:$0xff]   ;;  %v8801_v6 = vld [vmem:[%s10308_s5 + $0x60] ss:$8 sps:$4 sm:$0xff]   ;;  %v8803_v12 = vld [vmem:[%s10308_s5 + $0x70] ss:$8 sps:$4 sm:$0xff]  }
 0x166   :  { %1198 = vmatprep.subr.bf16.mxu0 %v7949_v7  ;;  %1271 = vmatprep.subr.bf16.mxu1 %v7952_v8  ;;  %v8802_v7 = vld [vmem:[%s10308_s5 + $0x74] ss:$8 sps:$4 sm:$0xff]   ;;  %v8026_v9 = vld [vmem:[%s10309_s21 + $0x3c8] ss:$16 sps:$4 sm:$0xff]   ;;  %v7999_v22 = vld [vmem:[%s10309_s21 + $0x340] ss:$16 sps:$4 sm:$0xff]  }
 0x167   :  { %6942 = vmatprep.mubr.msk.bf16.mxu0 %vm775_vm0, %v485_v23  ;;  %6946 = vmatprep.mubr.msk.bf16.mxu1 %vm775_vm0, %v485_v23  ;;  %v7989_v8 = vld [vmem:[%s10309_s21 + $0x304] ss:$16 sps:$4 sm:$0xff]   ;;  %v8034_v11 = vld [vmem:[%s10309_s21 + $0x3ec] ss:$16 sps:$4 sm:$0xff]   ;;  %v8032_v15 = vld [vmem:[%s10309_s21 + $0x3e8] ss:$16 sps:$4 sm:$0xff]  }
 0x168   :  { %851 = vmatmul.mubr.bf16.gmra.mrb[28].mxu0 %v484_v19  ;;  %924 = vmatmul.mubr.bf16.gmra.mrb[28].mxu1 %v484_v19  ;;  %v8040_v16 = vld [vmem:[%s10309_s21 + $0x40c] ss:$16 sps:$4 sm:$0xff]   ;;  %v8038_v19 = vld [vmem:[%s10309_s21 + $0x408] ss:$16 sps:$4 sm:$0xff]   ;;  %v8007_v23 = vld [vmem:[%s10309_s21 + $0x364] ss:$16 sps:$4 sm:$0xff]  }
 0x169   :  { %1199 = vmatpush1.bf16.msra.mxu0 %v7947_v13  ;;  %1272 = vmatpush1.bf16.msra.mxu1 %v7950_v14  ;;  %v7987_v13 = vld [vmem:[%s10309_s21 + $0x300] ss:$16 sps:$4 sm:$0xff]   ;;  %v7995_v14 = vld [vmem:[%s10309_s21 + $0x324] ss:$16 sps:$4 sm:$0xff]   ;;  %v7984_v20 = vld [vmem:[%s10310_s26 + $0x48] sm:$0xff]  }
 0x16a   :  { %1200 = vmatprep.subr.bf16.mxu0 %v7955_v17  ;;  %1273 = vmatprep.subr.bf16.mxu1 %v7958_v18  ;;  %v7993_v17 = vld [vmem:[%s10309_s21 + $0x320] ss:$16 sps:$4 sm:$0xff]   ;;  %v8001_v18 = vld [vmem:[%s10309_s21 + $0x344] ss:$16 sps:$4 sm:$0xff]  }
 0x16b   :  { %6995 = vmatprep.mubr.msk.bf16.mxu0 %vm775_vm0, %v9396_v27  ;;  %6999 = vmatprep.mubr.msk.bf16.mxu1 %vm775_vm0, %v9396_v27  ;;  %v7968_v27 = vld [vmem:[%s10309_s21 + $0x128] ss:$16 sps:$4 sm:$0xff]  }
 0x16d   :  { %1201 = vmatpush1.bf16.msra.mxu0 %v7953_v26  ;;  %1274 = vmatpush1.bf16.msra.mxu1 %v7956_v28  ;;  %v8052_v26 = vld [vmem:[%s10309_s21 + $0x44c] ss:$16 sps:$4 sm:$0xff]   ;;  %v8005_v28 = vld [vmem:[%s10309_s21 + $0x360] ss:$16 sps:$4 sm:$0xff]  }
 0x16e   :  { %1202 = vmatprep.subr.bf16.mxu0 %v7961_v29  ;;  %1275 = vmatprep.subr.bf16.mxu1 %v7964_v30  ;;  %v8013_v29 = vld [vmem:[%s10309_s21 + $0x384] ss:$16 sps:$4 sm:$0xff]   ;;  %v8050_v30 = vld [vmem:[%s10309_s21 + $0x448] ss:$16 sps:$4 sm:$0xff]  }
 0x171   :  { %1203 = vmatpush1.bf16.msra.mxu0 %v7959_v31  ;;  %1276 = vmatpush1.bf16.msra.mxu1 %v7962_v32  ;;  %v7985_v31 = vld [vmem:[%s10310_s26 + $0x50] sm:$0xff]  }
 0x172   :  { %1204 = vmatprep.subr.bf16.mxu0 %v7967_v33  ;;  %1277 = vmatprep.subr.bf16.mxu1 %v7970_v34  ;;  %v8011_v32 = vld [vmem:[%s10309_s21 + $0x380] ss:$16 sps:$4 sm:$0xff]   ;;  %v8019_v33 = vld [vmem:[%s10309_s21 + $0x3a4] ss:$16 sps:$4 sm:$0xff]  }
 0x173   :  { %v8017_v34 = vld [vmem:[%s10309_s21 + $0x3a0] ss:$16 sps:$4 sm:$0xff]  }
 0x175   :  { %1205 = vmatpush1.bf16.msra.mxu0 %v7965_v35  ;;  %1278 = vmatpush1.bf16.msra.mxu1 %v7968_v27  ;;  %v8025_v35 = vld [vmem:[%s10309_s21 + $0x3c4] ss:$16 sps:$4 sm:$0xff]   ;;  %v7986_v27 = vld [vmem:[%s10310_s26 + $0x58] sm:$0xff]  }
 0x176   :  { %1206 = vmatprep.subr.bf16.mxu0 %v7973_v36  ;;  %1279 = vmatprep.subr.bf16.mxu1 %v7976_v37  ;;  %v8023_v36 = vld [vmem:[%s10309_s21 + $0x3c0] ss:$16 sps:$4 sm:$0xff]   ;;  %v8031_v37 = vld [vmem:[%s10309_s21 + $0x3e4] ss:$16 sps:$4 sm:$0xff]  }
 0x179   :  { %1207 = vmatpush1.bf16.msra.mxu0 %v7971_v38  ;;  %1280 = vmatpush1.bf16.msra.mxu1 %v7974_v39  ;;  %v8029_v38 = vld [vmem:[%s10309_s21 + $0x3e0] ss:$16 sps:$4 sm:$0xff]   ;;  %v8037_v39 = vld [vmem:[%s10309_s21 + $0x404] ss:$16 sps:$4 sm:$0xff]  }
 0x17a   :  { %1208 = vmatprep.subr.bf16.mxu0 %v7979_v40  ;;  %1281 = vmatprep.subr.bf16.mxu1 %v7982_v41  ;;  %v8035_v40 = vld [vmem:[%s10309_s21 + $0x400] ss:$16 sps:$4 sm:$0xff]   ;;  %v8043_v41 = vld [vmem:[%s10309_s21 + $0x424] ss:$16 sps:$4 sm:$0xff]  }
 0x17d   :  { %1209 = vmatpush1.bf16.msra.mxu0 %v7977_v42  ;;  %1282 = vmatpush1.bf16.msra.mxu1 %v7980_v43  ;;  %v8041_v42 = vld [vmem:[%s10309_s21 + $0x420] ss:$16 sps:$4 sm:$0xff]   ;;  %v8049_v43 = vld [vmem:[%s10309_s21 + $0x444] ss:$16 sps:$4 sm:$0xff]  }
 0x17e   :  { %1365 = vmatprep.subr.bf16.mxu0 %v8788_v46  ;;  %1820 = vmatprep.subr.bf16.mxu1 %v7992_v45  ;;  %v8047_v45 = vld [vmem:[%s10309_s21 + $0x440] ss:$16 sps:$4 sm:$0xff]   ;;  %v8055_v46 = vld [vmem:[%s10309_s21 + $0x464] ss:$16 sps:$4 sm:$0xff]  }
 0x180   :  { %1219 = vmatmul.mubr.bf16.vlgmr.msra.gmra.mrb[16].mxu0 %v9394_v24  ;;  %1292 = vmatmul.mubr.bf16.vlgmr.msra.gmra.mrb[16].mxu1 %v9394_v24  ;;  %v7996_v24 = vld [vmem:[%s10309_s21 + $0x328] ss:$16 sps:$4 sm:$0xff]  }
 0x181   :  { %1366 = vmatpush1.bf16.msra.mxu0 %v8789_v50  ;;  %6996 = vmatprep.mubr.msk.bf16.mxu0 %vm775_vm0, %v9426_v47  ;;  %v8056_v50 = vld [vmem:[%s10309_s21 + $0x468] ss:$16 sps:$4 sm:$0xff]  }
 0x182   :  { %7000 = vmatprep.mubr.msk.bf16.mxu1 %vm775_vm0, %v9426_v47  ;;  %1367 = vmatprep.subr.bf16.mxu0 %v8790_v51  ;;  %v8792_v47 = vld [vmem:[%s10308_s5 + $0x24] ss:$8 sps:$4 sm:$0xff]  }
 0x183   :  { %1821 = vmatpush1.bf16.msra.mxu1 %v7990_v48  ;;  %v8058_v48 = vld [vmem:[%s10309_s21 + $0x46c] ss:$16 sps:$4 sm:$0xff]  }
 0x184   :  { %1822 = vmatprep.subr.bf16.mxu1 %v7998_v49  ;;  %v8053_v49 = vld [vmem:[%s10309_s21 + $0x460] ss:$16 sps:$4 sm:$0xff]  }
 0x185   :  { %1368 = vmatpush1.bf16.msra.mxu0 %v8791_v52 }
 0x186   :  { %1369 = vmatprep.subr.bf16.mxu0 %v8792_v47 }
 0x187   :  { %1823 = vmatpush1.bf16.msra.mxu1 %v7996_v24 }
 0x188   :  { %1229 = vmatmul.mubr.bf16.gmra.mrb[20].mxu0 %v9424_v44  ;;  %1302 = vmatmul.mubr.bf16.gmra.mrb[20].mxu1 %v9424_v44  ;;  %v8794_v44 = vld [vmem:[%s10308_s5 + $0x34] ss:$8 sps:$4 sm:$0xff]  }
 0x189   :  { %1370 = vmatpush1.bf16.msra.mxu0 %v8793_v55  ;;  %6997 = vmatprep.mubr.msk.bf16.mxu0 %vm775_vm0, %v9456_v4 }
 0x18a   :  { %7001 = vmatprep.mubr.msk.bf16.mxu1 %vm775_vm0, %v9456_v4  ;;  %1371 = vmatprep.subr.bf16.mxu0 %v8794_v44  ;;  %v8020_v4 = vld [vmem:[%s10309_s21 + $0x3a8] ss:$16 sps:$4 sm:$0xff]  }
 0x18b   :  { %1824 = vmatprep.subr.bf16.mxu1 %v8004_v53 }
 0x18c   :  { %1825 = vmatpush1.bf16.msra.mxu1 %v8002_v54 }
 0x18d   :  { %1372 = vmatpush1.bf16.msra.mxu0 %v8795_v57  ;;  %1826 = vmatprep.subr.bf16.mxu1 %v8010_v56 }
 0x18e   :  { %1373 = vmatprep.subr.bf16.mxu0 %v8796_v58 }
 0x190   :  { %1239 = vmatmul.mubr.bf16.gmra.mrb[24].mxu0 %v9454_v1  ;;  %1312 = vmatmul.mubr.bf16.gmra.mrb[24].mxu1 %v9454_v1  ;;  %v8799_v1 = vld [vmem:[%s10308_s5 + $0x50] ss:$8 sps:$4 sm:$0xff]  }
 0x191   :  { %1374 = vmatpush1.bf16.msra.mxu0 %v8797_v61  ;;  %6998 = vmatprep.mubr.msk.bf16.mxu0 %vm775_vm0, %v9486_v25 }
 0x192   :  { %7002 = vmatprep.mubr.msk.bf16.mxu1 %vm775_vm0, %v9486_v25  ;;  %1375 = vmatprep.subr.bf16.mxu0 %v8798_v62  ;;  %v8044_v25 = vld [vmem:[%s10309_s21 + $0x428] ss:$16 sps:$4 sm:$0xff]  }
 0x193   :  { %1827 = vmatpush1.bf16.msra.mxu1 %v8008_v59 }
 0x194   :  { %1828 = vmatprep.subr.bf16.mxu1 %v8016_v60 }
 0x195   :  { %1376 = vmatpush1.bf16.msra.mxu0 %v8799_v1 }
 0x196   :  { %1377 = vmatprep.subr.bf16.mxu0 %v8800_v2 }
 0x197   :  { %1829 = vmatpush1.bf16.msra.mxu1 %v8014_v63 }
 0x198   :  { %1249 = vmatmul.mubr.bf16.gmra.mrb[28].mxu0 %v9484_v21  ;;  %1322 = vmatmul.mubr.bf16.gmra.mrb[28].mxu1 %v9484_v21  ;;  %v8046_v21 = vld [vmem:[%s10309_s21 + $0x42c] ss:$16 sps:$4 sm:$0xff]  }
 0x199   :  { %1378 = vmatpush1.bf16.msra.mxu0 %v8801_v6  ;;  %1397 = vmatprep.mubr.bf16.mxu0 %v8974_v0 }
 0x19a   :  { %1379 = vmatprep.subr.bf16.mxu0 %v8802_v7  ;;  %1830 = vmatprep.subr.bf16.mxu1 %v8022_v3 }
 0x19b   :  { %1831 = vmatpush1.bf16.msra.mxu1 %v8020_v4 }
 0x19c   :  { %1832 = vmatprep.subr.bf16.mxu1 %v8028_v5 }
 0x19d   :  { %1380 = vmatpush1.bf16.msra.mxu0 %v8803_v12 }
 0x19e   :  { %1747 = vmatprep.subr.bf16.mxu0 %v7989_v8 }
 0x19f   :  { %1833 = vmatpush1.bf16.msra.mxu1 %v8026_v9  ;;  %v1927_v9 = vlaneseq }
 0x1a0   :  { %1398 = vmatmul.mubr.bf16.vlgmr.msra.gmra.mrb[32].mxu0 %v7983_v10  ;;  %1834 = vmatprep.subr.bf16.mxu1 %v8034_v11 }
 0x1a1   :  { %1407 = vmatprep.mubr.bf16.mxu0 %v8974_v0  ;;  %1748 = vmatpush1.bf16.msra.mxu0 %v7987_v13  ;;  %v1928_v10 = vshrl.u32 %v1927_v9, 7  ;;  %v1925_v13 = vld [vmem:[%s10311_s8] ss:$2 sm:$0xf] }
 0x1a2   :  { %1749 = vmatprep.subr.bf16.mxu0 %v7995_v14 }
 0x1a3   :  { %1835 = vmatpush1.bf16.msra.mxu1 %v8032_v15  ;;  %v9786_v11 = vsub.s32 0, %v1928_v10  ;;  %v1937_v12 = vsub.s32 2, %v1928_v10  ;;  %v9791_v14 = vsub.s32 1, %v1928_v10  ;;  %v1941_v15 = vsub.s32 3, %v1928_v10 }
 0x1a4   :  { %1836 = vmatprep.subr.bf16.mxu1 %v8040_v16  ;;  %v7119_v16 = vld [vmem:[%s10311_s8 + $0x1] ss:$2 sm:$0xf] }
 0x1a5   :  { %1750 = vmatpush1.bf16.msra.mxu0 %v7993_v17  ;;  %v9797_v17 = vrot.slane %v1925_v13, %v9786_v11 }
 0x1a6   :  { %1751 = vmatprep.subr.bf16.mxu0 %v8001_v18  ;;  %v9799_v18 = vrot.slane %v1925_v13, %v1937_v12 }
 0x1a7   :  { %1837 = vmatpush1.bf16.msra.mxu1 %v8038_v19  ;;  %v9802_v19 = vrot.slane %v1925_v13, %v9791_v14 }
 0x1a8   :  { %1408 = vmatmul.mubr.bf16.gmra.mrb[36].mxu0 %v7984_v20  ;;  %1838 = vmatprep.subr.bf16.mxu1 %v8046_v21  ;;  %v9804_v20 = vrot.slane %v1925_v13, %v1941_v15  ;;  %v9807_v21 = vrot.slane %v7119_v16, %v9786_v11 }
 0x1a9   :  { %1417 = vmatprep.mubr.bf16.mxu0 %v8974_v0  ;;  %1752 = vmatpush1.bf16.msra.mxu0 %v7999_v22  ;;  %v9809_v22 = vrot.slane %v7119_v16, %v1937_v12 }
 0x1aa   :  { %1753 = vmatprep.subr.bf16.mxu0 %v8007_v23 }
 0x1ab   :  { %1839 = vmatpush1.bf16.msra.mxu1 %v8044_v25 }
 0x1ac   :  { %1840 = vmatprep.subr.bf16.mxu1 %v8052_v26  ;;  %v9812_v26 = vrot.slane %v7119_v16, %v9791_v14 }
 0x1ad   :  { %1754 = vmatpush1.bf16.msra.mxu0 %v8005_v28  ;;  %v9814_v28 = vrot.slane %v7119_v16, %v1941_v15 }
 0x1ae   :  { %1755 = vmatprep.subr.bf16.mxu0 %v8013_v29 }
 0x1af   :  { %1841 = vmatpush1.bf16.msra.mxu1 %v8050_v30 }
 0x1b0   :  { %1418 = vmatmul.mubr.bf16.gmra.mrb[40].mxu0 %v7985_v31  ;;  %1842 = vmatprep.subr.bf16.mxu1 %v8058_v48 }
 0x1b1   :  { %1427 = vmatprep.mubr.bf16.mxu0 %v8974_v0  ;;  %1756 = vmatpush1.bf16.msra.mxu0 %v8011_v32 }
 0x1b2   :  { %1757 = vmatprep.subr.bf16.mxu0 %v8019_v33 }
 0x1b3   :  { %1843 = vmatpush1.bf16.msra.mxu1 %v8056_v50 }
 0x1b5   :  { %1758 = vmatpush1.bf16.msra.mxu0 %v8017_v34 }
 0x1b6   :  { %1759 = vmatprep.subr.bf16.mxu0 %v8025_v35 }
 0x1b8   :  { %1428 = vmatmul.mubr.bf16.gmra.mrb[44].mxu0 %v7986_v27 }
 0x1b9   :  { %1760 = vmatpush1.bf16.msra.mxu0 %v8023_v36 }
 0x1ba   :  { %1761 = vmatprep.subr.bf16.mxu0 %v8031_v37 }
 0x1bd   :  { %1762 = vmatpush1.bf16.msra.mxu0 %v8029_v38 }
 0x1be   :  { %1763 = vmatprep.subr.bf16.mxu0 %v8037_v39 }
 0x1c1   :  { %1764 = vmatpush1.bf16.msra.mxu0 %v8035_v40 }
 0x1c2   :  { %1765 = vmatprep.subr.bf16.mxu0 %v8043_v41 }
 0x1c5   :  { %1766 = vmatpush1.bf16.msra.mxu0 %v8041_v42 }
 0x1c6   :  { %1767 = vmatprep.subr.bf16.mxu0 %v8049_v43 }
 0x1c9   :  { %1768 = vmatpush1.bf16.msra.mxu0 %v8047_v45 }
 0x1ca   :  { %1769 = vmatprep.subr.bf16.mxu0 %v8055_v46 }
 0x1cd   :  { %1770 = vmatpush1.bf16.msra.mxu0 %v8053_v49 }
 0x273   :  { %v1399_v51 = vpop.f32.mrb[32].mxu0 }
 0x274   :  { %v1401_v24 = vpop.f32.mrb[33].mxu0 }
 0x275   :  { %v1403_v52 = vpop.f32.mrb[34].mxu0 }
 0x276   :  { %v1438_v47 = vpack.c.bf16 %v1403_v52, %v1399_v51  ;;  %v1405_v53 = vpop.f32.mrb[35].mxu0 }
 0x277   :  { %v1439_v54 = vpack.c.bf16 %v1405_v53, %v1401_v24 }
 0x279   :  { %7111 = vmatprep.mubr.msk.bf16.mxu0 %vm775_vm0, %v1439_v54  ;;  %7115 = vmatprep.mubr.msk.bf16.mxu1 %vm775_vm0, %v1439_v54 }
 0x27a   :  { %1780 = vmatmul.mubr.bf16.vlgmr.msra.gmra.mrb[16].mxu0 %v1438_v47  ;;  %1853 = vmatmul.mubr.bf16.vlgmr.msra.gmra.mrb[16].mxu1 %v1438_v47 }
 0x27b   :  { %v1409_v55 = vpop.f32.mrb[36].mxu0 }
 0x27c   :  { %v1411_v56 = vpop.f32.mrb[37].mxu0 }
 0x27d   :  { %v1413_v44 = vpop.f32.mrb[38].mxu0 }
 0x27e   :  { %v1440_v57 = vpack.c.bf16 %v1413_v44, %v1409_v55  ;;  %v1415_v58 = vpop.f32.mrb[39].mxu0 }
 0x27f   :  { %v1441_v59 = vpack.c.bf16 %v1415_v58, %v1411_v56 }
 0x281   :  { %7112 = vmatprep.mubr.msk.bf16.mxu0 %vm775_vm0, %v1441_v59  ;;  %7116 = vmatprep.mubr.msk.bf16.mxu1 %vm775_vm0, %v1441_v59 }
 0x282   :  { %1790 = vmatmul.mubr.bf16.gmra.mrb[20].mxu0 %v1440_v57  ;;  %1863 = vmatmul.mubr.bf16.gmra.mrb[20].mxu1 %v1440_v57 }
 0x283   :  { %v1419_v60 = vpop.f32.mrb[40].mxu0 }
 0x284   :  { %v1421_v61 = vpop.f32.mrb[41].mxu0 }
 0x285   :  { %v1423_v62 = vpop.f32.mrb[42].mxu0 }
 0x286   :  { %v1442_v63 = vpack.c.bf16 %v1423_v62, %v1419_v60  ;;  %v1425_v1 = vpop.f32.mrb[43].mxu0 }
 0x287   :  { %v1443_v2 = vpack.c.bf16 %v1425_v1, %v1421_v61 }
 0x289   :  { %7113 = vmatprep.mubr.msk.bf16.mxu0 %vm775_vm0, %v1443_v2  ;;  %7117 = vmatprep.mubr.msk.bf16.mxu1 %vm775_vm0, %v1443_v2 }
 0x28a   :  { %1800 = vmatmul.mubr.bf16.gmra.mrb[24].mxu0 %v1442_v63  ;;  %1873 = vmatmul.mubr.bf16.gmra.mrb[24].mxu1 %v1442_v63 }
 0x28b   :  { %v1429_v3 = vpop.f32.mrb[44].mxu0 }
 0x28c   :  { %v1431_v4 = vpop.f32.mrb[45].mxu0 }
 0x28d   :  { %v1433_v5 = vpop.f32.mrb[46].mxu0 }
 0x28e   :  { %v1444_v6 = vpack.c.bf16 %v1433_v5, %v1429_v3  ;;  %v1435_v7 = vpop.f32.mrb[47].mxu0 }
 0x28f   :  { %v1445_v8 = vpack.c.bf16 %v1435_v7, %v1431_v4 }
 0x291   :  { %7114 = vmatprep.mubr.msk.bf16.mxu0 %vm775_vm0, %v1445_v8  ;;  %7118 = vmatprep.mubr.msk.bf16.mxu1 %vm775_vm0, %v1445_v8 }
 0x292   :  { %1810 = vmatmul.mubr.bf16.gmra.mrb[28].mxu0 %v1444_v6  ;;  %1883 = vmatmul.mubr.bf16.gmra.mrb[28].mxu1 %v1444_v6 }
 0x293   :  { %2134 = vmatprep.mubr.bf16.mxu1 %v8974_v0  ;;  %2333 = vmatprep.mubr.bf16.mxu0 %v8974_v0 }
 0x34d   :  { %v1781_v23 = vpop.f32.mrb[16].mxu0  ;;  %v1854_v25 = vpop.f32.mrb[16].mxu1 }
 0x34e   :  { %v1947_v29 = vmul.f32 %v9797_v17, %v1781_v23  ;;  %v1949_v30 = vmul.f32 %v9799_v18, %v1854_v25  ;;  %v1783_v31 = vpop.f32.mrb[17].mxu0  ;;  %v1856_v32 = vpop.f32.mrb[17].mxu1 }
 0x34f   :  { %v1948_v33 = vmul.f32 %v9802_v19, %v1783_v31  ;;  %v1950_v34 = vmul.f32 %v9804_v20, %v1856_v32  ;;  %v1785_v35 = vpop.f32.mrb[18].mxu0  ;;  %v1858_v27 = vpop.f32.mrb[18].mxu1 }
 0x350   :  { %v2002_v36 = vadd.f32 %v9807_v21, %v1947_v29  ;;  %v2004_v37 = vadd.f32 %v9809_v22, %v1949_v30  ;;  %v1951_v38 = vmul.f32 %v9797_v17, %v1785_v35  ;;  %v1953_v39 = vmul.f32 %v9799_v18, %v1858_v27  ;;  %v1787_v40 = vpop.f32.mrb[19].mxu0  ;;  %v1860_v41 = vpop.f32.mrb[19].mxu1 }
 0x351   :  { %v2003_v42 = vadd.f32 %v9812_v26, %v1948_v33  ;;  %v2005_v43 = vadd.f32 %v9814_v28, %v1950_v34  ;;  %v1952_v45 = vmul.f32 %v9802_v19, %v1787_v40  ;;  %v1954_v46 = vmul.f32 %v9804_v20, %v1860_v41 }
 0x352   :  { %v2006_v48 = vadd.f32 %v9807_v21, %v1951_v38  ;;  %v2008_v49 = vadd.f32 %v9809_v22, %v1953_v39  ;;  %v2034_v24 = vmax.f32 %v2002_v36, 0.0  ;;  %v2036_v52 = vmax.f32 %v2004_v37, 0.0 }
 0x353   :  { %v2007_v50 = vadd.f32 %v9812_v26, %v1952_v45  ;;  %v2009_v51 = vadd.f32 %v9814_v28, %v1954_v46  ;;  %v2035_v54 = vmax.f32 %v2003_v42, 0.0  ;;  %v2037_v55 = vmax.f32 %v2005_v43, 0.0 }
 0x354   :  { %v2038_v47 = vmax.f32 %v2006_v48, 0.0  ;;  %v2040_v53 = vmax.f32 %v2008_v49, 0.0 }
 0x355   :  { %v2039_v56 = vmax.f32 %v2007_v50, 0.0  ;;  %v2041_v44 = vmax.f32 %v2009_v51, 0.0  ;;  %v1791_v57 = vpop.f32.mrb[20].mxu0  ;;  %v1864_v58 = vpop.f32.mrb[20].mxu1 }
 0x356   :  { %v9832_v59 = vpack.c.bf16 %v2038_v47, %v2034_v24  ;;  %v9834_v60 = vpack.c.bf16 %v2040_v53, %v2036_v52  ;;  %v1955_v61 = vmul.f32 %v9797_v17, %v1791_v57  ;;  %v1957_v62 = vmul.f32 %v9799_v18, %v1864_v58  ;;  %v1793_v63 = vpop.f32.mrb[21].mxu0  ;;  %v1866_v1 = vpop.f32.mrb[21].mxu1 }
 0x357   :  { %v1956_v2 = vmul.f32 %v9802_v19, %v1793_v63  ;;  %v1958_v3 = vmul.f32 %v9804_v20, %v1866_v1  ;;  %v1795_v4 = vpop.f32.mrb[22].mxu0  ;;  %v1868_v5 = vpop.f32.mrb[22].mxu1  ;;  %v9840_v6 = vpack.c.bf16 %v2039_v56, %v2035_v54  ;;  %v9842_v7 = vpack.c.bf16 %v2041_v44, %v2037_v55 }
 0x358   :  { %v2010_v8 = vadd.f32 %v9807_v21, %v1955_v61  ;;  %v2012_v9 = vadd.f32 %v9809_v22, %v1957_v62  ;;  %v1959_v10 = vmul.f32 %v9797_v17, %v1795_v4  ;;  %v1961_v12 = vmul.f32 %v9799_v18, %v1868_v5  ;;  %v1797_v13 = vpop.f32.mrb[23].mxu0  ;;  %v1870_v15 = vpop.f32.mrb[23].mxu1 }
 0x359   :  { %v2011_v16 = vadd.f32 %v9812_v26, %v1956_v2  ;;  %v2013_v23 = vadd.f32 %v9814_v28, %v1958_v3  ;;  %v1960_v25 = vmul.f32 %v9802_v19, %v1797_v13  ;;  %v1962_v29 = vmul.f32 %v9804_v20, %v1870_v15  ;;  %2102 = vmatprep.subr.bf16.mxu1 %v9840_v6 }
 0x35a   :  { %v2014_v30 = vadd.f32 %v9807_v21, %v1959_v10  ;;  %v2016_v31 = vadd.f32 %v9809_v22, %v1961_v12  ;;  %2301 = vmatprep.subr.bf16.mxu0 %v9840_v6  ;;  %2103 = vmatpush1.bf16.msra.mxu1 %v9832_v59  ;;  %v2042_v34 = vmax.f32 %v2010_v8, 0.0  ;;  %v2044_v35 = vmax.f32 %v2012_v9, 0.0 }
 0x35b   :  { %v2015_v32 = vadd.f32 %v9812_v26, %v1960_v25  ;;  %v2017_v33 = vadd.f32 %v9814_v28, %v1962_v29  ;;  %2302 = vmatpush1.bf16.msra.mxu0 %v9832_v59  ;;  %v2043_v37 = vmax.f32 %v2011_v16, 0.0  ;;  %v2045_v38 = vmax.f32 %v2013_v23, 0.0 }
 0x35c   :  { %v2046_v27 = vmax.f32 %v2014_v30, 0.0  ;;  %v2048_v36 = vmax.f32 %v2016_v31, 0.0 }
 0x35d   :  { %v2047_v39 = vmax.f32 %v2015_v32, 0.0  ;;  %v2049_v40 = vmax.f32 %v2017_v33, 0.0  ;;  %v1801_v41 = vpop.f32.mrb[24].mxu0  ;;  %v1874_v42 = vpop.f32.mrb[24].mxu1 }
 0x35e   :  { %v9860_v43 = vpack.c.bf16 %v2046_v27, %v2042_v34  ;;  %v9862_v45 = vpack.c.bf16 %v2048_v36, %v2044_v35  ;;  %v1963_v46 = vmul.f32 %v9797_v17, %v1801_v41  ;;  %v1965_v48 = vmul.f32 %v9799_v18, %v1874_v42  ;;  %v1803_v49 = vpop.f32.mrb[25].mxu0  ;;  %v1876_v50 = vpop.f32.mrb[25].mxu1 }
 0x35f   :  { %v1964_v51 = vmul.f32 %v9802_v19, %v1803_v49  ;;  %v1966_v24 = vmul.f32 %v9804_v20, %v1876_v50  ;;  %v1805_v52 = vpop.f32.mrb[26].mxu0  ;;  %v1878_v47 = vpop.f32.mrb[26].mxu1  ;;  %v9868_v53 = vpack.c.bf16 %v2047_v39, %v2043_v37  ;;  %v9870_v54 = vpack.c.bf16 %v2049_v40, %v2045_v38 }
 0x360   :  { %v2018_v55 = vadd.f32 %v9807_v21, %v1963_v46  ;;  %v2020_v56 = vadd.f32 %v9809_v22, %v1965_v48  ;;  %v1967_v44 = vmul.f32 %v9797_v17, %v1805_v52  ;;  %v1969_v57 = vmul.f32 %v9799_v18, %v1878_v47  ;;  %v1807_v58 = vpop.f32.mrb[27].mxu0  ;;  %v1880_v61 = vpop.f32.mrb[27].mxu1 }
 0x361   :  { %v2019_v62 = vadd.f32 %v9812_v26, %v1964_v51  ;;  %v2021_v63 = vadd.f32 %v9814_v28, %v1966_v24  ;;  %v1968_v1 = vmul.f32 %v9802_v19, %v1807_v58  ;;  %v1970_v2 = vmul.f32 %v9804_v20, %v1880_v61  ;;  %2104 = vmatprep.subr.bf16.mxu1 %v9868_v53 }
 0x362   :  { %v2022_v3 = vadd.f32 %v9807_v21, %v1967_v44  ;;  %v2024_v4 = vadd.f32 %v9809_v22, %v1969_v57  ;;  %2303 = vmatprep.subr.bf16.mxu0 %v9868_v53  ;;  %2105 = vmatpush1.bf16.msra.mxu1 %v9860_v43  ;;  %v2050_v9 = vmax.f32 %v2018_v55, 0.0  ;;  %v2052_v10 = vmax.f32 %v2020_v56, 0.0 }
 0x363   :  { %v2023_v5 = vadd.f32 %v9812_v26, %v1968_v1  ;;  %v2025_v8 = vadd.f32 %v9814_v28, %v1970_v2  ;;  %2304 = vmatpush1.bf16.msra.mxu0 %v9860_v43  ;;  %v2051_v15 = vmax.f32 %v2019_v62, 0.0  ;;  %v2053_v16 = vmax.f32 %v2021_v63, 0.0 }
 0x364   :  { %v2054_v12 = vmax.f32 %v2022_v3, 0.0  ;;  %v2056_v13 = vmax.f32 %v2024_v4, 0.0  ;;  %v9932_v4 = vld [vmem:[%s10284_s4 + $0x10] sm:$0xff]  }
 0x365   :  { %v2055_v23 = vmax.f32 %v2023_v5, 0.0  ;;  %v2057_v25 = vmax.f32 %v2025_v8, 0.0  ;;  %v1811_v29 = vpop.f32.mrb[28].mxu0  ;;  %v1884_v30 = vpop.f32.mrb[28].mxu1  ;;  %v8111_v5 = vld [vmem:[#allocation2 + $0x300] ss:$8 sps:$4 sm:$0xff]  }
 0x366   :  { %v9888_v31 = vpack.c.bf16 %v2054_v12, %v2050_v9  ;;  %v9890_v32 = vpack.c.bf16 %v2056_v13, %v2052_v10  ;;  %v1971_v33 = vmul.f32 %v9797_v17, %v1811_v29  ;;  %v1973_v34 = vmul.f32 %v9799_v18, %v1884_v30  ;;  %v1813_v35 = vpop.f32.mrb[29].mxu0  ;;  %v1886_v27 = vpop.f32.mrb[29].mxu1  ;;  %v8116_v8 = vld [vmem:[#allocation2 + $0x314] ss:$8 sps:$4 sm:$0xff]   ;;  %v8114_v9 = vld [vmem:[#allocation2 + $0x310] ss:$8 sps:$4 sm:$0xff]  }
 0x367   :  { %v1972_v36 = vmul.f32 %v9802_v19, %v1813_v35  ;;  %v1974_v37 = vmul.f32 %v9804_v20, %v1886_v27  ;;  %v1815_v38 = vpop.f32.mrb[30].mxu0  ;;  %v1888_v39 = vpop.f32.mrb[30].mxu1  ;;  %v9896_v40 = vpack.c.bf16 %v2055_v23, %v2051_v15  ;;  %v9898_v41 = vpack.c.bf16 %v2057_v25, %v2053_v16  ;;  %v8061_v10 = vld [vmem:[%s10284_s4 + $0x8] sm:$0xff]   ;;  %v8062_v12 = vld [vmem:[%s10284_s4 + $0x18] sm:$0xff]  }
 0x368   :  { %v2026_v42 = vadd.f32 %v9807_v21, %v1971_v33  ;;  %v2028_v46 = vadd.f32 %v9809_v22, %v1973_v34  ;;  %v1975_v48 = vmul.f32 %v9797_v17, %v1815_v38  ;;  %v1977_v49 = vmul.f32 %v9799_v18, %v1888_v39  ;;  %v1817_v50 = vpop.f32.mrb[31].mxu0  ;;  %v1890_v51 = vpop.f32.mrb[31].mxu1  ;;  %v8119_v13 = vld [vmem:[#allocation2 + $0x324] ss:$8 sps:$4 sm:$0xff]   ;;  %v8117_v15 = vld [vmem:[#allocation2 + $0x320] ss:$8 sps:$4 sm:$0xff]  }
 0x369   :  { %v2027_v24 = vadd.f32 %v9812_v26, %v1972_v36  ;;  %v2029_v52 = vadd.f32 %v9814_v28, %v1974_v37  ;;  %v1976_v47 = vmul.f32 %v9802_v19, %v1817_v50  ;;  %v1978_v55 = vmul.f32 %v9804_v20, %v1890_v51  ;;  %2106 = vmatprep.subr.bf16.mxu1 %v9896_v40  ;;  %v8122_v16 = vld [vmem:[#allocation2 + $0x334] ss:$8 sps:$4 sm:$0xff]   ;;  %v8120_v23 = vld [vmem:[#allocation2 + $0x330] ss:$8 sps:$4 sm:$0xff]   ;;  %v8125_v25 = vld [vmem:[#allocation2 + $0x344] ss:$8 sps:$4 sm:$0xff]  }
 0x36a   :  { %v2030_v56 = vadd.f32 %v9807_v21, %v1975_v48  ;;  %v2032_v44 = vadd.f32 %v9809_v22, %v1977_v49  ;;  %2305 = vmatprep.subr.bf16.mxu0 %v9896_v40  ;;  %2107 = vmatpush1.bf16.msra.mxu1 %v9888_v31  ;;  %v2058_v57 = vmax.f32 %v2026_v42, 0.0  ;;  %v2060_v19 = vmax.f32 %v2028_v46, 0.0  ;;  %v8123_v29 = vld [vmem:[#allocation2 + $0x340] ss:$8 sps:$4 sm:$0xff]   ;;  %v8128_v30 = vld [vmem:[#allocation2 + $0x354] ss:$8 sps:$4 sm:$0xff]  }
 0x36b   :  { %v2031_v17 = vadd.f32 %v9812_v26, %v1976_v47  ;;  %v2033_v18 = vadd.f32 %v9814_v28, %v1978_v55  ;;  %2306 = vmatpush1.bf16.msra.mxu0 %v9888_v31  ;;  %v2059_v61 = vmax.f32 %v2027_v24, 0.0  ;;  %v2061_v62 = vmax.f32 %v2029_v52, 0.0  ;;  %v8113_v26 = vld [vmem:[#allocation2 + $0x304] ss:$8 sps:$4 sm:$0xff]   ;;  %v8126_v33 = vld [vmem:[#allocation2 + $0x350] ss:$8 sps:$4 sm:$0xff]  }
 0x36c   :  { %v2062_v58 = vmax.f32 %v2030_v56, 0.0  ;;  %v2064_v20 = vmax.f32 %v2032_v44, 0.0  ;;  %v8059_v28 = vld [vmem:[%s10284_s4] sm:$0xff]   ;;  %v8068_v37 = vld [vmem:[#allocation2 + $0x214] ss:$8 sps:$4 sm:$0xff]  }
 0x36d   :  { %v2063_v63 = vmax.f32 %v2031_v17, 0.0  ;;  %v2065_v21 = vmax.f32 %v2033_v18, 0.0  ;;  %v8131_v34 = vld [vmem:[#allocation2 + $0x364] ss:$8 sps:$4 sm:$0xff]   ;;  %v8129_v35 = vld [vmem:[#allocation2 + $0x360] ss:$8 sps:$4 sm:$0xff]  }
 0x36e   :  { %v9916_v1 = vpack.c.bf16 %v2062_v58, %v2058_v57  ;;  %v9918_v22 = vpack.c.bf16 %v2064_v20, %v2060_v19  ;;  %v8065_v27 = vld [vmem:[#allocation2 + $0x204] ss:$8 sps:$4 sm:$0xff]   ;;  %v8063_v36 = vld [vmem:[#allocation2 + $0x200] ss:$8 sps:$4 sm:$0xff]   ;;  %v8066_v38 = vld [vmem:[#allocation2 + $0x210] ss:$8 sps:$4 sm:$0xff]  }
 0x36f   :  { %v9920_v2 = vpack.c.bf16 %v2063_v63, %v2059_v61  ;;  %v9922_v3 = vpack.c.bf16 %v2065_v21, %v2061_v62  ;;  %v8071_v39 = vld [vmem:[#allocation2 + $0x224] ss:$8 sps:$4 sm:$0xff]   ;;  %v8069_v42 = vld [vmem:[#allocation2 + $0x220] ss:$8 sps:$4 sm:$0xff]   ;;  %v8074_v46 = vld [vmem:[#allocation2 + $0x234] ss:$8 sps:$4 sm:$0xff]  }
 0x370   :  { %v8072_v48 = vld [vmem:[#allocation2 + $0x230] ss:$8 sps:$4 sm:$0xff]   ;;  %v8077_v49 = vld [vmem:[#allocation2 + $0x244] ss:$8 sps:$4 sm:$0xff]   ;;  %v8075_v50 = vld [vmem:[#allocation2 + $0x240] ss:$8 sps:$4 sm:$0xff]  }
 0x371   :  { %2108 = vmatprep.subr.bf16.mxu1 %v9920_v2  ;;  %2307 = vmatprep.subr.bf16.mxu0 %v9920_v2  ;;  %v8080_v51 = vld [vmem:[#allocation2 + $0x254] ss:$8 sps:$4 sm:$0xff]   ;;  %v8078_v24 = vld [vmem:[#allocation2 + $0x250] ss:$8 sps:$4 sm:$0xff]   ;;  %v8083_v52 = vld [vmem:[#allocation2 + $0x264] ss:$8 sps:$4 sm:$0xff]  }
 0x372   :  { %2109 = vmatpush1.bf16.msra.mxu1 %v9916_v1  ;;  %2308 = vmatpush1.bf16.msra.mxu0 %v9916_v1  ;;  %v8081_v47 = vld [vmem:[#allocation2 + $0x260] ss:$8 sps:$4 sm:$0xff]   ;;  %v8086_v55 = vld [vmem:[#allocation2 + $0x274] ss:$8 sps:$4 sm:$0xff]   ;;  %v8084_v56 = vld [vmem:[#allocation2 + $0x270] ss:$8 sps:$4 sm:$0xff]  }
 0x373   :  { %2155 = vmatprep.subr.bf16.mxu1 %v9842_v7  ;;  %2853 = vmatprep.subr.bf16.mxu0 %v8113_v26  ;;  %v8089_v44 = vld [vmem:[#allocation2 + $0x284] ss:$8 sps:$4 sm:$0xff]   ;;  %v8087_v17 = vld [vmem:[#allocation2 + $0x280] ss:$8 sps:$4 sm:$0xff]   ;;  %v8092_v18 = vld [vmem:[#allocation2 + $0x294] ss:$8 sps:$4 sm:$0xff]  }
 0x374   :  { %v8090_v57 = vld [vmem:[#allocation2 + $0x290] ss:$8 sps:$4 sm:$0xff]   ;;  %v8095_v19 = vld [vmem:[#allocation2 + $0x2a4] ss:$8 sps:$4 sm:$0xff]   ;;  %v8093_v58 = vld [vmem:[#allocation2 + $0x2a0] ss:$8 sps:$4 sm:$0xff]  }
 0x375   :  { %7122 = vmatmul.mubr.msk.bf16.vlgmr.msra.gmra.mrb[32].mxu1 %vm775_vm0, %v8059_v28  ;;  %7132 = vmatmul.mubr.msk.bf16.vlgmr.msra.gmra.mrb[48].mxu0 %vm775_vm0, %v9932_v4  ;;  %v8098_v20 = vld [vmem:[#allocation2 + $0x2b4] ss:$8 sps:$4 sm:$0xff]   ;;  %v8096_v61 = vld [vmem:[#allocation2 + $0x2b0] ss:$8 sps:$4 sm:$0xff]   ;;  %v8101_v62 = vld [vmem:[#allocation2 + $0x2c4] ss:$8 sps:$4 sm:$0xff]  }
 0x376   :  { %2156 = vmatpush1.bf16.msra.mxu1 %v9834_v60  ;;  %2144 = vmatprep.mubr.bf16.mxu1 %v8974_v0  ;;  %v8099_v63 = vld [vmem:[#allocation2 + $0x2c0] ss:$8 sps:$4 sm:$0xff]   ;;  %v8104_v21 = vld [vmem:[#allocation2 + $0x2d4] ss:$8 sps:$4 sm:$0xff]   ;;  %v8102_v26 = vld [vmem:[#allocation2 + $0x2d0] ss:$8 sps:$4 sm:$0xff]  }
 0x377   :  { %2157 = vmatprep.subr.bf16.mxu1 %v9870_v54  ;;  %2343 = vmatprep.mubr.bf16.mxu0 %v8974_v0 }
 0x378   :  { %2854 = vmatpush1.bf16.msra.mxu0 %v8111_v5  ;;  %v8105_v5 = vld [vmem:[#allocation2 + $0x2e0] ss:$8 sps:$4 sm:$0xff]  }
 0x379   :  { %2855 = vmatprep.subr.bf16.mxu0 %v8116_v8  ;;  %v8132_v8 = vld [vmem:[#allocation2 + $0x370] ss:$8 sps:$4 sm:$0xff]  }
 0x37a   :  { %2158 = vmatpush1.bf16.msra.mxu1 %v9862_v45 }
 0x37b   :  { %2159 = vmatprep.subr.bf16.mxu1 %v9898_v41 }
 0x37c   :  { %2856 = vmatpush1.bf16.msra.mxu0 %v8114_v9  ;;  %v8110_v9 = vld [vmem:[#allocation2 + $0x2f4] ss:$8 sps:$4 sm:$0xff]  }
 0x37d   :  { %7123 = vmatmul.mubr.msk.bf16.gmra.mrb[36].mxu1 %vm775_vm0, %v8061_v10  ;;  %7133 = vmatmul.mubr.msk.bf16.gmra.mrb[52].mxu0 %vm775_vm0, %v8062_v12 }
 0x37e   :  { %2160 = vmatpush1.bf16.msra.mxu1 %v9890_v32  ;;  %2187 = vmatprep.mubr.bf16.mxu1 %v8974_v0 }
 0x37f   :  { %2161 = vmatprep.subr.bf16.mxu1 %v9922_v3  ;;  %2857 = vmatprep.subr.bf16.mxu0 %v8119_v13  ;;  %v8135_v13 = vld [vmem:[#allocation2 + $0x380] ss:$8 sps:$4 sm:$0xff]  }
 0x380   :  { %2858 = vmatpush1.bf16.msra.mxu0 %v8117_v15  ;;  %v8140_v15 = vld [vmem:[#allocation2 + $0x394] ss:$8 sps:$4 sm:$0xff]  }
 0x381   :  { %2859 = vmatprep.subr.bf16.mxu0 %v8122_v16  ;;  %v8138_v16 = vld [vmem:[#allocation2 + $0x390] ss:$8 sps:$4 sm:$0xff]  }
 0x382   :  { %2162 = vmatpush1.bf16.msra.mxu1 %v9918_v22 }
 0x383   :  { %2354 = vmatprep.subr.bf16.mxu1 %v9842_v7 }
 0x384   :  { %2860 = vmatpush1.bf16.msra.mxu0 %v8120_v23  ;;  %v8143_v23 = vld [vmem:[#allocation2 + $0x3a4] ss:$8 sps:$4 sm:$0xff]  }
 0x385   :  { %7124 = vmatmul.mubr.msk.bf16.vlgmr.msra.gmra.mrb[40].mxu1 %vm775_vm0, %v8059_v28  ;;  %2861 = vmatprep.subr.bf16.mxu0 %v8125_v25  ;;  %v8107_v28 = vld [vmem:[#allocation2 + $0x2e4] ss:$8 sps:$4 sm:$0xff]   ;;  %v8141_v25 = vld [vmem:[#allocation2 + $0x3a0] ss:$8 sps:$4 sm:$0xff]  }
 0x386   :  { %2355 = vmatpush1.bf16.msra.mxu1 %v9834_v60  ;;  %2197 = vmatprep.mubr.bf16.mxu1 %v8974_v0 }
 0x387   :  { %2356 = vmatprep.subr.bf16.mxu1 %v9870_v54 }
 0x388   :  { %2862 = vmatpush1.bf16.msra.mxu0 %v8123_v29  ;;  %v8144_v29 = vld [vmem:[#allocation2 + $0x3b0] ss:$8 sps:$4 sm:$0xff]  }
 0x389   :  { %2863 = vmatprep.subr.bf16.mxu0 %v8128_v30  ;;  %v8146_v30 = vld [vmem:[#allocation2 + $0x3b4] ss:$8 sps:$4 sm:$0xff]  }
 0x38a   :  { %2357 = vmatpush1.bf16.msra.mxu1 %v9862_v45 }
 0x38b   :  { %2358 = vmatprep.subr.bf16.mxu1 %v9898_v41 }
 0x38c   :  { %2864 = vmatpush1.bf16.msra.mxu0 %v8126_v33  ;;  %v8147_v33 = vld [vmem:[#allocation2 + $0x3c0] ss:$8 sps:$4 sm:$0xff]  }
 0x38d   :  { %7125 = vmatmul.mubr.msk.bf16.gmra.mrb[44].mxu1 %vm775_vm0, %v8061_v10  ;;  %2865 = vmatprep.subr.bf16.mxu0 %v8131_v34  ;;  %v8137_v10 = vld [vmem:[#allocation2 + $0x384] ss:$8 sps:$4 sm:$0xff]  }
 0x38e   :  { %2359 = vmatpush1.bf16.msra.mxu1 %v9890_v32  ;;  %2386 = vmatprep.mubr.bf16.mxu1 %v8974_v0  ;;  %v8149_v34 = vld [vmem:[#allocation2 + $0x3c4] ss:$8 sps:$4 sm:$0xff]  }
 0x38f   :  { %2360 = vmatprep.subr.bf16.mxu1 %v9922_v3 }
 0x390   :  { %2866 = vmatpush1.bf16.msra.mxu0 %v8129_v35  ;;  %v8151_v35 = vld [vmem:[#allocation2 + $0x3d0] ss:$8 sps:$4 sm:$0xff]  }
 0x392   :  { %2361 = vmatpush1.bf16.msra.mxu1 %v9918_v22 }
 0x393   :  { %2800 = vmatprep.subr.bf16.mxu1 %v8065_v27  ;;  %v8153_v27 = vld [vmem:[#allocation2 + $0x3d4] ss:$8 sps:$4 sm:$0xff]  }
 0x395   :  { %7134 = vmatmul.mubr.msk.bf16.vlgmr.msra.gmra.mrb[48].mxu1 %vm775_vm0, %v9932_v4  ;;  %v8134_v4 = vld [vmem:[#allocation2 + $0x374] ss:$8 sps:$4 sm:$0xff]  }
 0x396   :  { %2801 = vmatpush1.bf16.msra.mxu1 %v8063_v36  ;;  %2396 = vmatprep.mubr.bf16.mxu1 %v8974_v0  ;;  %v8154_v36 = vld [vmem:[#allocation2 + $0x3e0] ss:$8 sps:$4 sm:$0xff]  }
 0x397   :  { %2802 = vmatprep.subr.bf16.mxu1 %v8068_v37  ;;  %2867 = vmatprep.subr.bf16.mxu0 %v8134_v4  ;;  %v8159_v37 = vld [vmem:[#allocation2 + $0x3f4] ss:$8 sps:$4 sm:$0xff]  }
 0x398   :  { %2868 = vmatpush1.bf16.msra.mxu0 %v8132_v8 }
 0x399   :  { %2869 = vmatprep.subr.bf16.mxu0 %v8137_v10 }
 0x39a   :  { %2803 = vmatpush1.bf16.msra.mxu1 %v8066_v38  ;;  %v8157_v38 = vld [vmem:[#allocation2 + $0x3f0] ss:$8 sps:$4 sm:$0xff]  }
 0x39b   :  { %2804 = vmatprep.subr.bf16.mxu1 %v8071_v39  ;;  %v8162_v39 = vld [vmem:[#allocation2 + $0x4] ss:$8 sps:$4 sm:$0xff]  }
 0x39c   :  { %2870 = vmatpush1.bf16.msra.mxu0 %v8135_v13 }
 0x39d   :  { %7135 = vmatmul.mubr.msk.bf16.gmra.mrb[52].mxu1 %vm775_vm0, %v8062_v12  ;;  %v8108_v12 = vld [vmem:[#allocation2 + $0x2f0] ss:$8 sps:$4 sm:$0xff]   ;;  %2871 = vmatprep.subr.bf16.mxu0 %v8140_v15 }
 0x39e   :  { %2805 = vmatpush1.bf16.msra.mxu1 %v8069_v42 }
 0x39f   :  { %2806 = vmatprep.subr.bf16.mxu1 %v8074_v46 }
 0x3a0   :  { %2872 = vmatpush1.bf16.msra.mxu0 %v8138_v16 }
 0x3a1   :  { %2873 = vmatprep.subr.bf16.mxu0 %v8143_v23 }
 0x3a2   :  { %2807 = vmatpush1.bf16.msra.mxu1 %v8072_v48 }
 0x3a3   :  { %2808 = vmatprep.subr.bf16.mxu1 %v8077_v49 }
 0x3a4   :  { %2874 = vmatpush1.bf16.msra.mxu0 %v8141_v25  ;;  %v8165_v25 = vld [vmem:[#allocation2 + $0x14] ss:$8 sps:$4 sm:$0xff]  }
 0x3a5   :  { %2875 = vmatprep.subr.bf16.mxu0 %v8146_v30 }
 0x3a6   :  { %2809 = vmatpush1.bf16.msra.mxu1 %v8075_v50 }
 0x3a7   :  { %2810 = vmatprep.subr.bf16.mxu1 %v8080_v51 }
 0x3a8   :  { %2876 = vmatpush1.bf16.msra.mxu0 %v8144_v29 }
 0x3a9   :  { %2877 = vmatprep.subr.bf16.mxu0 %v8149_v34 }
 0x3aa   :  { %2811 = vmatpush1.bf16.msra.mxu1 %v8078_v24 }
 0x3ab   :  { %2812 = vmatprep.subr.bf16.mxu1 %v8083_v52 }
 0x3ac   :  { %2878 = vmatpush1.bf16.msra.mxu0 %v8147_v33 }
 0x3ad   :  { %2879 = vmatprep.subr.bf16.mxu0 %v8153_v27  ;;  %v8171_v27 = vld [vmem:[#allocation2 + $0x34] ss:$8 sps:$4 sm:$0xff]  }
 0x3ae   :  { %2813 = vmatpush1.bf16.msra.mxu1 %v8081_v47 }
 0x3af   :  { %2814 = vmatprep.subr.bf16.mxu1 %v8086_v55 }
 0x3b0   :  { %2880 = vmatpush1.bf16.msra.mxu0 %v8151_v35 }
 0x3b2   :  { %2815 = vmatpush1.bf16.msra.mxu1 %v8084_v56 }
 0x3b3   :  { %2816 = vmatprep.subr.bf16.mxu1 %v8089_v44 }
 0x3b6   :  { %2817 = vmatpush1.bf16.msra.mxu1 %v8087_v17 }
 0x3b7   :  { %2818 = vmatprep.subr.bf16.mxu1 %v8092_v18 }
 0x3ba   :  { %2819 = vmatpush1.bf16.msra.mxu1 %v8090_v57 }
 0x3bb   :  { %2820 = vmatprep.subr.bf16.mxu1 %v8095_v19 }
 0x3be   :  { %2821 = vmatpush1.bf16.msra.mxu1 %v8093_v58 }
 0x3bf   :  { %2822 = vmatprep.subr.bf16.mxu1 %v8098_v20 }
 0x3c2   :  { %2823 = vmatpush1.bf16.msra.mxu1 %v8096_v61 }
 0x3c3   :  { %2824 = vmatprep.subr.bf16.mxu1 %v8101_v62 }
 0x3c6   :  { %2825 = vmatpush1.bf16.msra.mxu1 %v8099_v63 }
 0x3c7   :  { %2826 = vmatprep.subr.bf16.mxu1 %v8104_v21 }
 0x3ca   :  { %2827 = vmatpush1.bf16.msra.mxu1 %v8102_v26 }
 0x3cb   :  { %2828 = vmatprep.subr.bf16.mxu1 %v8107_v28 }
 0x3ce   :  { %2829 = vmatpush1.bf16.msra.mxu1 %v8105_v5 }
 0x3cf   :  { %2830 = vmatprep.subr.bf16.mxu1 %v8110_v9 }
 0x3d2   :  { %2831 = vmatpush1.bf16.msra.mxu1 %v8108_v12 }
 0x3d3   :  { %3353 = vmatprep.subr.bf16.mxu1 %v9840_v6  ;;  %v8156_v6 = vld [vmem:[#allocation2 + $0x3e4] ss:$8 sps:$4 sm:$0xff]  }
 0x3d4   :  { %2881 = vmatprep.subr.bf16.mxu0 %v8156_v6  ;;  %v8174_v6 = vld [vmem:[#allocation2 + $0x44] ss:$8 sps:$4 sm:$0xff]  }
 0x3d5   :  { %2882 = vmatpush1.bf16.msra.mxu0 %v8154_v36  ;;  %v8169_v36 = vld [vmem:[#allocation2 + $0x30] ss:$8 sps:$4 sm:$0xff]  }
 0x3d6   :  { %2883 = vmatprep.subr.bf16.mxu0 %v8159_v37  ;;  %v8172_v37 = vld [vmem:[#allocation2 + $0x40] ss:$8 sps:$4 sm:$0xff]  }
 0x3d9   :  { %2884 = vmatpush1.bf16.msra.mxu0 %v8157_v38  ;;  %v8177_v38 = vld [vmem:[#allocation2 + $0x54] ss:$8 sps:$4 sm:$0xff]  }
 0x3da   :  { %3226 = vmatprep.subr.bf16.mxu0 %v8162_v39  ;;  %v8175_v39 = vld [vmem:[#allocation2 + $0x50] ss:$8 sps:$4 sm:$0xff]  }
 0x448   :  { %v2335_v42 = vpop.f32.mrb[48].mxu0  ;;  %v9975_v46 = vpop.f32.mrb[32].mxu1 }
 0x449   :  { %v2337_v48 = vpop.f32.mrb[49].mxu0  ;;  %v9977_v49 = vpop.f32.mrb[33].mxu1 }
 0x44a   :  { %v2339_v50 = vpop.f32.mrb[50].mxu0  ;;  %v9979_v51 = vpop.f32.mrb[34].mxu1 }
 0x44b   :  { %v2407_v24 = vpack.c.bf16 %v2339_v50, %v2335_v42  ;;  %v2341_v52 = vpop.f32.mrb[51].mxu0  ;;  %v2208_v47 = vpack.c.bf16 %v9979_v51, %v9975_v46  ;;  %v9983_v55 = vpop.f32.mrb[35].mxu1  ;;  %v8180_v42 = vld [vmem:[#allocation2 + $0x64] ss:$8 sps:$4 sm:$0xff]   ;;  %v8183_v50 = vld [vmem:[#allocation2 + $0x74] ss:$8 sps:$4 sm:$0xff]  }
 0x44c   :  { %v2408_v56 = vpack.c.bf16 %v2341_v52, %v2337_v48  ;;  %v2209_v44 = vpack.c.bf16 %v9983_v55, %v9977_v49  ;;  %v8178_v48 = vld [vmem:[#allocation2 + $0x60] ss:$8 sps:$4 sm:$0xff]   ;;  %v8181_v49 = vld [vmem:[#allocation2 + $0x70] ss:$8 sps:$4 sm:$0xff]   ;;  %v8189_v55 = vld [vmem:[#allocation2 + $0x94] ss:$8 sps:$4 sm:$0xff]  }
 0x44d   :  { %v8184_v52 = vld [vmem:[#allocation2 + $0x80] ss:$8 sps:$4 sm:$0xff]   ;;  %v8218_v46 = vld [vmem:[#allocation2 + $0x130] ss:$8 sps:$4 sm:$0xff]   ;;  %v8223_v51 = vld [vmem:[#allocation2 + $0x144] ss:$8 sps:$4 sm:$0xff]  }
 0x44e   :  { %2832 = vmatprep.mubr.bf16.mxu1 %v2408_v56  ;;  %v8187_v56 = vld [vmem:[#allocation2 + $0x90] ss:$8 sps:$4 sm:$0xff]  }
 0x44f   :  { %2833 = vmatmul.mubr.bf16.vlgmr.msra.gmra.mrb[56].mxu1 %v2407_v24  ;;  %v8186_v24 = vld [vmem:[#allocation2 + $0x84] ss:$8 sps:$4 sm:$0xff]  }
 0x450   :  { %3354 = vmatpush1.bf16.msra.mxu1 %v9832_v59  ;;  %v2345_v17 = vpop.f32.mrb[52].mxu0  ;;  %v9988_v18 = vpop.f32.mrb[36].mxu1 }
 0x451   :  { %3355 = vmatprep.subr.bf16.mxu1 %v9868_v53  ;;  %v2347_v57 = vpop.f32.mrb[53].mxu0  ;;  %v9991_v19 = vpop.f32.mrb[37].mxu1 }
 0x452   :  { %v2349_v58 = vpop.f32.mrb[54].mxu0  ;;  %v9993_v20 = vpop.f32.mrb[38].mxu1 }
 0x453   :  { %v2411_v61 = vpack.c.bf16 %v2349_v58, %v2345_v17  ;;  %v2351_v62 = vpop.f32.mrb[55].mxu0  ;;  %v2212_v63 = vpack.c.bf16 %v9993_v20, %v9988_v18  ;;  %v9997_v21 = vpop.f32.mrb[39].mxu1  ;;  %v8191_v17 = vld [vmem:[#allocation2 + $0xa0] ss:$8 sps:$4 sm:$0xff]   ;;  %v8194_v58 = vld [vmem:[#allocation2 + $0xb0] ss:$8 sps:$4 sm:$0xff]  }
 0x454   :  { %v2412_v26 = vpack.c.bf16 %v2351_v62, %v2347_v57  ;;  %3356 = vmatpush1.bf16.msra.mxu1 %v9860_v43  ;;  %v2213_v59 = vpack.c.bf16 %v9997_v21, %v9991_v19  ;;  %v8150_v43 = vld [vmem:[%s10284_s4 + $0x20] sm:$0xff]   ;;  %v8196_v57 = vld [vmem:[#allocation2 + $0xb4] ss:$8 sps:$4 sm:$0xff]   ;;  %v8224_v21 = vld [vmem:[#allocation2 + $0x150] ss:$8 sps:$4 sm:$0xff]  }
 0x455   :  { %3357 = vmatprep.subr.bf16.mxu1 %v9896_v40  ;;  %v8197_v62 = vld [vmem:[#allocation2 + $0xc0] ss:$8 sps:$4 sm:$0xff]   ;;  %v8226_v19 = vld [vmem:[#allocation2 + $0x154] ss:$8 sps:$4 sm:$0xff]   ;;  %v8230_v20 = vld [vmem:[#allocation2 + $0x170] ss:$8 sps:$4 sm:$0xff]  }
 0x456   :  { %2842 = vmatprep.mubr.bf16.mxu1 %v2412_v26  ;;  %v8202_v26 = vld [vmem:[#allocation2 + $0xd4] ss:$8 sps:$4 sm:$0xff]  }
 0x457   :  { %2843 = vmatmul.mubr.bf16.gmra.mrb[60].mxu1 %v2411_v61  ;;  %v8199_v61 = vld [vmem:[#allocation2 + $0xc4] ss:$8 sps:$4 sm:$0xff]   ;;  %v8232_v18 = vld [vmem:[#allocation2 + $0x174] ss:$8 sps:$4 sm:$0xff]  }
 0x458   :  { %3358 = vmatpush1.bf16.msra.mxu1 %v9888_v31  ;;  %3385 = vmatprep.mubr.bf16.mxu1 %v8974_v0  ;;  %v10005_v53 = vpop.f32.mrb[40].mxu1 }
 0x459   :  { %3359 = vmatprep.subr.bf16.mxu1 %v9920_v2  ;;  %v10008_v28 = vpop.f32.mrb[41].mxu1 }
 0x45a   :  { %v10010_v4 = vpop.f32.mrb[42].mxu1 }
 0x45b   :  { %v2210_v40 = vpack.c.bf16 %v10010_v4, %v10005_v53  ;;  %v10017_v5 = vpop.f32.mrb[43].mxu1  ;;  %v8271_v53 = vld [vmem:[#allocation2 + $0x444] ss:$8 sps:$4 sm:$0xff]   ;;  %v8269_v4 = vld [vmem:[#allocation2 + $0x440] ss:$8 sps:$4 sm:$0xff]  }
 0x45c   :  { %3360 = vmatpush1.bf16.msra.mxu1 %v9916_v1  ;;  %v2211_v31 = vpack.c.bf16 %v10017_v5, %v10008_v28  ;;  %v8233_v28 = vld [vmem:[#allocation2 + $0x180] ss:$8 sps:$4 sm:$0xff]   ;;  %v8238_v5 = vld [vmem:[#allocation2 + $0x194] ss:$8 sps:$4 sm:$0xff]  }
 0x45d   :  { %3406 = vmatprep.subr.bf16.mxu1 %v9842_v7  ;;  %v8190_v7 = vld [vmem:[%s10284_s4 + $0x28] sm:$0xff]  }
 0x45f   :  { %7270 = vmatmul.mubr.msk.bf16.vlgmr.msra.gmra.mrb[64].mxu1 %vm775_vm0, %v8150_v43 }
 0x460   :  { %3407 = vmatpush1.bf16.msra.mxu1 %v9834_v60  ;;  %v10025_v2 = vpop.f32.mrb[44].mxu1  ;;  %3395 = vmatprep.mubr.bf16.mxu1 %v8974_v0 }
 0x461   :  { %3408 = vmatprep.subr.bf16.mxu1 %v9870_v54  ;;  %v10029_v8 = vpop.f32.mrb[45].mxu1 }
 0x462   :  { %v10031_v9 = vpop.f32.mrb[46].mxu1 }
 0x463   :  { %v2214_v1 = vpack.c.bf16 %v10031_v9, %v10025_v2  ;;  %v10035_v10 = vpop.f32.mrb[47].mxu1  ;;  %v8283_v2 = vld [vmem:[#allocation2 + $0x484] ss:$8 sps:$4 sm:$0xff]   ;;  %v8281_v9 = vld [vmem:[#allocation2 + $0x480] ss:$8 sps:$4 sm:$0xff]  }
 0x464   :  { %3409 = vmatpush1.bf16.msra.mxu1 %v9862_v45  ;;  %v2215_v60 = vpack.c.bf16 %v10035_v10, %v10029_v8  ;;  %v8160_v45 = vld [vmem:[#allocation2] ss:$8 sps:$4 sm:$0xff]   ;;  %v8272_v8 = vld [vmem:[#allocation2 + $0x450] ss:$8 sps:$4 sm:$0xff]   ;;  %v8277_v10 = vld [vmem:[#allocation2 + $0x464] ss:$8 sps:$4 sm:$0xff]  }
 0x465   :  { %3410 = vmatprep.subr.bf16.mxu1 %v9898_v41  ;;  %v8163_v41 = vld [vmem:[#allocation2 + $0x10] ss:$8 sps:$4 sm:$0xff]  }
 0x467   :  { %7271 = vmatmul.mubr.msk.bf16.gmra.mrb[68].mxu1 %vm775_vm0, %v8190_v7 }
 0x468   :  { %3411 = vmatpush1.bf16.msra.mxu1 %v9890_v32  ;;  %v2388_v54 = vpop.f32.mrb[48].mxu1  ;;  %3438 = vmatprep.mubr.bf16.mxu1 %v8974_v0 }
 0x469   :  { %3412 = vmatprep.subr.bf16.mxu1 %v9922_v3  ;;  %v2390_v12 = vpop.f32.mrb[49].mxu1  ;;  %v8168_v3 = vld [vmem:[#allocation2 + $0x24] ss:$8 sps:$4 sm:$0xff]  }
 0x46a   :  { %v2392_v13 = vpop.f32.mrb[50].mxu1 }
 0x46b   :  { %v2409_v15 = vpack.c.bf16 %v2392_v13, %v2388_v54  ;;  %v2394_v16 = vpop.f32.mrb[51].mxu1  ;;  %v8203_v54 = vld [vmem:[#allocation2 + $0xe0] ss:$8 sps:$4 sm:$0xff]   ;;  %v8206_v13 = vld [vmem:[#allocation2 + $0xf0] ss:$8 sps:$4 sm:$0xff]  }
 0x46c   :  { %v2410_v23 = vpack.c.bf16 %v2394_v16, %v2390_v12  ;;  %3413 = vmatpush1.bf16.msra.mxu1 %v9918_v22  ;;  %v8166_v22 = vld [vmem:[#allocation2 + $0x20] ss:$8 sps:$4 sm:$0xff]   ;;  %v8208_v12 = vld [vmem:[#allocation2 + $0xf4] ss:$8 sps:$4 sm:$0xff]  }
 0x46d   :  { %v8209_v16 = vld [vmem:[#allocation2 + $0x100] ss:$8 sps:$4 sm:$0xff]  }
 0x46e   :  { %2885 = vmatprep.mubr.bf16.mxu0 %v2410_v23  ;;  %v8214_v23 = vld [vmem:[#allocation2 + $0x114] ss:$8 sps:$4 sm:$0xff]  }
 0x46f   :  { %2886 = vmatmul.mubr.bf16.vlgmr.msra.gmra.mrb[56].mxu0 %v2409_v15  ;;  %7272 = vmatmul.mubr.msk.bf16.vlgmr.msra.gmra.mrb[72].mxu1 %vm775_vm0, %v8150_v43  ;;  %v8200_v43 = vld [vmem:[#allocation2 + $0xd0] ss:$8 sps:$4 sm:$0xff]   ;;  %v8211_v15 = vld [vmem:[#allocation2 + $0x104] ss:$8 sps:$4 sm:$0xff]  }
 0x470   :  { %3227 = vmatpush1.bf16.msra.mxu0 %v8160_v45  ;;  %v2398_v32 = vpop.f32.mrb[52].mxu1  ;;  %3448 = vmatprep.mubr.bf16.mxu1 %v8974_v0  ;;  %v8212_v45 = vld [vmem:[#allocation2 + $0x110] ss:$8 sps:$4 sm:$0xff]  }
 0x471   :  { %v2400_v29 = vpop.f32.mrb[53].mxu1  ;;  %3228 = vmatprep.subr.bf16.mxu0 %v8165_v25  ;;  %v8217_v25 = vld [vmem:[#allocation2 + $0x124] ss:$8 sps:$4 sm:$0xff]  }
 0x472   :  { %v2402_v30 = vpop.f32.mrb[54].mxu1 }
 0x473   :  { %v2413_v33 = vpack.c.bf16 %v2402_v30, %v2398_v32  ;;  %v2404_v34 = vpop.f32.mrb[55].mxu1  ;;  %v8215_v32 = vld [vmem:[#allocation2 + $0x120] ss:$8 sps:$4 sm:$0xff]  }
 0x474   :  { %v2414_v35 = vpack.c.bf16 %v2404_v34, %v2400_v29  ;;  %3229 = vmatpush1.bf16.msra.mxu0 %v8163_v41  ;;  %v8220_v41 = vld [vmem:[#allocation2 + $0x134] ss:$8 sps:$4 sm:$0xff]   ;;  %v8227_v29 = vld [vmem:[#allocation2 + $0x160] ss:$8 sps:$4 sm:$0xff]   ;;  %v8242_v34 = vld [vmem:[#allocation2 + $0x1b0] ss:$8 sps:$4 sm:$0xff]  }
 0x475   :  { %3230 = vmatprep.subr.bf16.mxu0 %v8168_v3  ;;  %v8241_v3 = vld [vmem:[#allocation2 + $0x1a4] ss:$8 sps:$4 sm:$0xff]   ;;  %v8239_v30 = vld [vmem:[#allocation2 + $0x1a0] ss:$8 sps:$4 sm:$0xff]  }
 0x476   :  { %2895 = vmatprep.mubr.bf16.mxu0 %v2414_v35  ;;  %v8247_v35 = vld [vmem:[#allocation2 + $0x1c4] ss:$8 sps:$4 sm:$0xff]  }
 0x477   :  { %2896 = vmatmul.mubr.bf16.gmra.mrb[60].mxu0 %v2413_v33  ;;  %7273 = vmatmul.mubr.msk.bf16.gmra.mrb[76].mxu1 %vm775_vm0, %v8190_v7  ;;  %v8205_v7 = vld [vmem:[#allocation2 + $0xe4] ss:$8 sps:$4 sm:$0xff]   ;;  %v8244_v33 = vld [vmem:[#allocation2 + $0x1b4] ss:$8 sps:$4 sm:$0xff]  }
 0x478   :  { %3231 = vmatpush1.bf16.msra.mxu0 %v8166_v22  ;;  %3258 = vmatprep.mubr.bf16.mxu0 %v2209_v44  ;;  %v8193_v44 = vld [vmem:[#allocation2 + $0xa4] ss:$8 sps:$4 sm:$0xff]   ;;  %v8245_v22 = vld [vmem:[#allocation2 + $0x1c0] ss:$8 sps:$4 sm:$0xff]  }
 0x479   :  { %3232 = vmatprep.subr.bf16.mxu0 %v8171_v27  ;;  %4086 = vmatprep.mubr.bf16.mxu1 %v8974_v0  ;;  %v8250_v27 = vld [vmem:[#allocation2 + $0x1d4] ss:$8 sps:$4 sm:$0xff]  }
 0x47c   :  { %3233 = vmatpush1.bf16.msra.mxu0 %v8169_v36  ;;  %v8248_v36 = vld [vmem:[#allocation2 + $0x1d0] ss:$8 sps:$4 sm:$0xff]  }
 0x47d   :  { %3234 = vmatprep.subr.bf16.mxu0 %v8174_v6  ;;  %v8253_v6 = vld [vmem:[#allocation2 + $0x1e4] ss:$8 sps:$4 sm:$0xff]  }
 0x480   :  { %3235 = vmatpush1.bf16.msra.mxu0 %v8172_v37  ;;  %v8251_v37 = vld [vmem:[#allocation2 + $0x1e0] ss:$8 sps:$4 sm:$0xff]  }
 0x481   :  { %3236 = vmatprep.subr.bf16.mxu0 %v8177_v38  ;;  %v8256_v38 = vld [vmem:[#allocation2 + $0x1f4] ss:$8 sps:$4 sm:$0xff]  }
 0x484   :  { %3237 = vmatpush1.bf16.msra.mxu0 %v8175_v39  ;;  %v8254_v39 = vld [vmem:[#allocation2 + $0x1f0] ss:$8 sps:$4 sm:$0xff]  }
 0x485   :  { %3238 = vmatprep.subr.bf16.mxu0 %v8180_v42  ;;  %v8259_v42 = vld [vmem:[#allocation2 + $0x404] ss:$8 sps:$4 sm:$0xff]  }
 0x488   :  { %3239 = vmatpush1.bf16.msra.mxu0 %v8178_v48  ;;  %v8257_v48 = vld [vmem:[#allocation2 + $0x400] ss:$8 sps:$4 sm:$0xff]  }
 0x489   :  { %3240 = vmatprep.subr.bf16.mxu0 %v8183_v50  ;;  %v8262_v50 = vld [vmem:[#allocation2 + $0x414] ss:$8 sps:$4 sm:$0xff]  }
 0x48c   :  { %3241 = vmatpush1.bf16.msra.mxu0 %v8181_v49  ;;  %v8260_v49 = vld [vmem:[#allocation2 + $0x410] ss:$8 sps:$4 sm:$0xff]  }
 0x48d   :  { %3242 = vmatprep.subr.bf16.mxu0 %v8186_v24  ;;  %v8265_v24 = vld [vmem:[#allocation2 + $0x424] ss:$8 sps:$4 sm:$0xff]  }
 0x490   :  { %3243 = vmatpush1.bf16.msra.mxu0 %v8184_v52  ;;  %v8263_v52 = vld [vmem:[#allocation2 + $0x420] ss:$8 sps:$4 sm:$0xff]  }
 0x491   :  { %3244 = vmatprep.subr.bf16.mxu0 %v8189_v55  ;;  %v8268_v55 = vld [vmem:[#allocation2 + $0x434] ss:$8 sps:$4 sm:$0xff]  }
 0x494   :  { %3245 = vmatpush1.bf16.msra.mxu0 %v8187_v56  ;;  %v8266_v56 = vld [vmem:[#allocation2 + $0x430] ss:$8 sps:$4 sm:$0xff]  }
 0x495   :  { %3246 = vmatprep.subr.bf16.mxu0 %v8193_v44  ;;  %v8280_v44 = vld [vmem:[#allocation2 + $0x474] ss:$8 sps:$4 sm:$0xff]  }
 0x498   :  { %3247 = vmatpush1.bf16.msra.mxu0 %v8191_v17  ;;  %v8278_v17 = vld [vmem:[#allocation2 + $0x470] ss:$8 sps:$4 sm:$0xff]  }
 0x499   :  { %3248 = vmatprep.subr.bf16.mxu0 %v8196_v57  ;;  %v8284_v57 = vld [vmem:[#allocation2 + $0x490] ss:$8 sps:$4 sm:$0xff]  }
 0x49c   :  { %3249 = vmatpush1.bf16.msra.mxu0 %v8194_v58  ;;  %v8289_v58 = vld [vmem:[#allocation2 + $0x4a4] ss:$8 sps:$4 sm:$0xff]  }
 0x49d   :  { %3250 = vmatprep.subr.bf16.mxu0 %v8199_v61  ;;  %v8287_v61 = vld [vmem:[#allocation2 + $0x4a0] ss:$8 sps:$4 sm:$0xff]  }
 0x4a0   :  { %3251 = vmatpush1.bf16.msra.mxu0 %v8197_v62  ;;  %v8292_v62 = vld [vmem:[#allocation2 + $0x4b4] ss:$8 sps:$4 sm:$0xff]  }
 0x4a1   :  { %3252 = vmatprep.subr.bf16.mxu0 %v8202_v26  ;;  %v8290_v26 = vld [vmem:[#allocation2 + $0x4b0] ss:$8 sps:$4 sm:$0xff]  }
 0x4a4   :  { %3253 = vmatpush1.bf16.msra.mxu0 %v8200_v43  ;;  %v8295_v43 = vld [vmem:[#allocation2 + $0x4c4] ss:$8 sps:$4 sm:$0xff]  }
 0x4a5   :  { %3254 = vmatprep.subr.bf16.mxu0 %v8205_v7  ;;  %v8293_v7 = vld [vmem:[#allocation2 + $0x4c0] ss:$8 sps:$4 sm:$0xff]  }
 0x4a8   :  { %3255 = vmatpush1.bf16.msra.mxu0 %v8203_v54  ;;  %v8298_v54 = vld [vmem:[#allocation2 + $0x4d4] ss:$8 sps:$4 sm:$0xff]  }
 0x4a9   :  { %3256 = vmatprep.subr.bf16.mxu0 %v8208_v12  ;;  %v8296_v12 = vld [vmem:[#allocation2 + $0x4d0] ss:$8 sps:$4 sm:$0xff]  }
 0x4ac   :  { %3257 = vmatpush1.bf16.msra.mxu0 %v8206_v13  ;;  %v8301_v13 = vld [vmem:[#allocation2 + $0x4e4] ss:$8 sps:$4 sm:$0xff]  }
 0x4ad   :  { %3279 = vmatprep.subr.bf16.mxu0 %v8211_v15 }
 0x4af   :  { %3259 = vmatmul.mubr.bf16.vlgmr.msra.gmra.mrb[56].mxu0 %v2208_v47  ;;  %v8221_v47 = vld [vmem:[#allocation2 + $0x140] ss:$8 sps:$4 sm:$0xff]  }
 0x4b0   :  { %3268 = vmatprep.mubr.bf16.mxu0 %v2213_v59  ;;  %3280 = vmatpush1.bf16.msra.mxu0 %v8209_v16  ;;  %v8229_v59 = vld [vmem:[#allocation2 + $0x164] ss:$8 sps:$4 sm:$0xff]  }
 0x4b1   :  { %3281 = vmatprep.subr.bf16.mxu0 %v8214_v23 }
 0x4b4   :  { %3282 = vmatpush1.bf16.msra.mxu0 %v8212_v45  ;;  %v8299_v45 = vld [vmem:[#allocation2 + $0x4e0] ss:$8 sps:$4 sm:$0xff]  }
 0x4b5   :  { %3283 = vmatprep.subr.bf16.mxu0 %v8217_v25 }
 0x4b7   :  { %3269 = vmatmul.mubr.bf16.gmra.mrb[60].mxu0 %v2212_v63  ;;  %v8235_v63 = vld [vmem:[#allocation2 + $0x184] ss:$8 sps:$4 sm:$0xff]  }
 0x4b8   :  { %3284 = vmatpush1.bf16.msra.mxu0 %v8215_v32  ;;  %3311 = vmatprep.mubr.bf16.mxu0 %v2211_v31  ;;  %v8236_v31 = vld [vmem:[#allocation2 + $0x190] ss:$8 sps:$4 sm:$0xff]   ;;  %v8304_v32 = vld [vmem:[#allocation2 + $0x4f4] ss:$8 sps:$4 sm:$0xff]  }
 0x4b9   :  { %3285 = vmatprep.subr.bf16.mxu0 %v8220_v41  ;;  %v8302_v41 = vld [vmem:[#allocation2 + $0x4f0] ss:$8 sps:$4 sm:$0xff]  }
 0x4bc   :  { %3286 = vmatpush1.bf16.msra.mxu0 %v8218_v46  ;;  %v8307_v46 = vld [vmem:[#allocation2 + $0x504] ss:$8 sps:$4 sm:$0xff]  }
 0x4bd   :  { %3287 = vmatprep.subr.bf16.mxu0 %v8223_v51 }
 0x4c0   :  { %3288 = vmatpush1.bf16.msra.mxu0 %v8221_v47 }
 0x4c1   :  { %3289 = vmatprep.subr.bf16.mxu0 %v8226_v19 }
 0x4c4   :  { %3290 = vmatpush1.bf16.msra.mxu0 %v8224_v21 }
 0x4c5   :  { %3291 = vmatprep.subr.bf16.mxu0 %v8229_v59 }
 0x4c8   :  { %3292 = vmatpush1.bf16.msra.mxu0 %v8227_v29 }
 0x4c9   :  { %3293 = vmatprep.subr.bf16.mxu0 %v8232_v18 }
 0x4cc   :  { %3294 = vmatpush1.bf16.msra.mxu0 %v8230_v20 }
 0x4cd   :  { %3295 = vmatprep.subr.bf16.mxu0 %v8235_v63 }
 0x4d0   :  { %3296 = vmatpush1.bf16.msra.mxu0 %v8233_v28 }
 0x4d1   :  { %3297 = vmatprep.subr.bf16.mxu0 %v8238_v5  ;;  %v8305_v5 = vld [vmem:[#allocation2 + $0x500] ss:$8 sps:$4 sm:$0xff]  }
 0x4d4   :  { %3298 = vmatpush1.bf16.msra.mxu0 %v8236_v31  ;;  %v8310_v31 = vld [vmem:[#allocation2 + $0x514] ss:$8 sps:$4 sm:$0xff]  }
 0x4d5   :  { %3299 = vmatprep.subr.bf16.mxu0 %v8241_v3  ;;  %v8308_v3 = vld [vmem:[#allocation2 + $0x510] ss:$8 sps:$4 sm:$0xff]  }
 0x4d8   :  { %3300 = vmatpush1.bf16.msra.mxu0 %v8239_v30 }
 0x4d9   :  { %3301 = vmatprep.subr.bf16.mxu0 %v8244_v33  ;;  %v8313_v33 = vld [vmem:[#allocation2 + $0x524] ss:$8 sps:$4 sm:$0xff]  }
 0x4dc   :  { %3302 = vmatpush1.bf16.msra.mxu0 %v8242_v34 }
 0x4dd   :  { %3303 = vmatprep.subr.bf16.mxu0 %v8247_v35 }
 0x4e0   :  { %3304 = vmatpush1.bf16.msra.mxu0 %v8245_v22 }
 0x4e1   :  { %3305 = vmatprep.subr.bf16.mxu0 %v8250_v27 }
 0x4e4   :  { %3306 = vmatpush1.bf16.msra.mxu0 %v8248_v36  ;;  %v8311_v36 = vld [vmem:[#allocation2 + $0x520] ss:$8 sps:$4 sm:$0xff]  }
 0x4e5   :  { %3307 = vmatprep.subr.bf16.mxu0 %v8253_v6 }
 0x4e8   :  { %3308 = vmatpush1.bf16.msra.mxu0 %v8251_v37  ;;  %v8316_v37 = vld [vmem:[#allocation2 + $0x534] ss:$8 sps:$4 sm:$0xff]  }
 0x4e9   :  { %3309 = vmatprep.subr.bf16.mxu0 %v8256_v38  ;;  %v8314_v38 = vld [vmem:[#allocation2 + $0x530] ss:$8 sps:$4 sm:$0xff]  }
 0x4ec   :  { %3310 = vmatpush1.bf16.msra.mxu0 %v8254_v39 }
 0x4ed   :  { %3852 = vmatprep.subr.bf16.mxu0 %v8259_v42  ;;  %v8319_v42 = vld [vmem:[#allocation2 + $0x544] ss:$8 sps:$4 sm:$0xff]  }
 0x4ef   :  { %3312 = vmatmul.mubr.bf16.vlgmr.msra.gmra.mrb[56].mxu0 %v2210_v40  ;;  %v8274_v40 = vld [vmem:[#allocation2 + $0x454] ss:$8 sps:$4 sm:$0xff]  }
 0x4f0   :  { %3321 = vmatprep.mubr.bf16.mxu0 %v2215_v60  ;;  %3853 = vmatpush1.bf16.msra.mxu0 %v8257_v48  ;;  %v8275_v60 = vld [vmem:[#allocation2 + $0x460] ss:$8 sps:$4 sm:$0xff]  }
 0x4f1   :  { %3854 = vmatprep.subr.bf16.mxu0 %v8262_v50 }
 0x4f4   :  { %3855 = vmatpush1.bf16.msra.mxu0 %v8260_v49 }
 0x4f5   :  { %3856 = vmatprep.subr.bf16.mxu0 %v8265_v24 }
 0x4f7   :  { %3322 = vmatmul.mubr.bf16.gmra.mrb[60].mxu0 %v2214_v1  ;;  %v8286_v1 = vld [vmem:[#allocation2 + $0x494] ss:$8 sps:$4 sm:$0xff]  }
 0x4f8   :  { %3857 = vmatpush1.bf16.msra.mxu0 %v8263_v52  ;;  %v8317_v52 = vld [vmem:[#allocation2 + $0x540] ss:$8 sps:$4 sm:$0xff]  }
 0x4f9   :  { %3858 = vmatprep.subr.bf16.mxu0 %v8268_v55 }
 0x4fc   :  { %3859 = vmatpush1.bf16.msra.mxu0 %v8266_v56  ;;  %v8322_v56 = vld [vmem:[#allocation2 + $0x554] ss:$8 sps:$4 sm:$0xff]  }
 0x4fd   :  { %3860 = vmatprep.subr.bf16.mxu0 %v8271_v53  ;;  %v8320_v53 = vld [vmem:[#allocation2 + $0x550] ss:$8 sps:$4 sm:$0xff]  }
 0x500   :  { %3861 = vmatpush1.bf16.msra.mxu0 %v8269_v4 }
 0x501   :  { %3862 = vmatprep.subr.bf16.mxu0 %v8274_v40  ;;  %v8325_v40 = vld [vmem:[#allocation2 + $0x564] ss:$8 sps:$4 sm:$0xff]  }
 0x504   :  { %3863 = vmatpush1.bf16.msra.mxu0 %v8272_v8 }
 0x505   :  { %3864 = vmatprep.subr.bf16.mxu0 %v8277_v10 }
 0x508   :  { %3865 = vmatpush1.bf16.msra.mxu0 %v8275_v60 }
 0x509   :  { %3866 = vmatprep.subr.bf16.mxu0 %v8280_v44 }
 0x50c   :  { %3867 = vmatpush1.bf16.msra.mxu0 %v8278_v17  ;;  %v8323_v17 = vld [vmem:[#allocation2 + $0x560] ss:$8 sps:$4 sm:$0xff]  }
 0x50d   :  { %3868 = vmatprep.subr.bf16.mxu0 %v8283_v2 }
 0x510   :  { %3869 = vmatpush1.bf16.msra.mxu0 %v8281_v9  ;;  %v8328_v9 = vld [vmem:[#allocation2 + $0x574] ss:$8 sps:$4 sm:$0xff]  }
 0x511   :  { %3870 = vmatprep.subr.bf16.mxu0 %v8286_v1  ;;  %v8326_v1 = vld [vmem:[#allocation2 + $0x570] ss:$8 sps:$4 sm:$0xff]  }
 0x514   :  { %3871 = vmatpush1.bf16.msra.mxu0 %v8284_v57  ;;  %v8331_v57 = vld [vmem:[#allocation2 + $0x584] ss:$8 sps:$4 sm:$0xff]  }
 0x515   :  { %3872 = vmatprep.subr.bf16.mxu0 %v8289_v58  ;;  %v8329_v58 = vld [vmem:[#allocation2 + $0x580] ss:$8 sps:$4 sm:$0xff]  }
 0x518   :  { %3873 = vmatpush1.bf16.msra.mxu0 %v8287_v61  ;;  %v8334_v61 = vld [vmem:[#allocation2 + $0x594] ss:$8 sps:$4 sm:$0xff]  }
 0x519   :  { %3874 = vmatprep.subr.bf16.mxu0 %v8292_v62  ;;  %v8332_v62 = vld [vmem:[#allocation2 + $0x590] ss:$8 sps:$4 sm:$0xff]  }
 0x51c   :  { %3875 = vmatpush1.bf16.msra.mxu0 %v8290_v26  ;;  %v8337_v26 = vld [vmem:[#allocation2 + $0x5a4] ss:$8 sps:$4 sm:$0xff]  }
 0x51d   :  { %3876 = vmatprep.subr.bf16.mxu0 %v8295_v43  ;;  %v8335_v43 = vld [vmem:[#allocation2 + $0x5a0] ss:$8 sps:$4 sm:$0xff]  }
 0x520   :  { %3877 = vmatpush1.bf16.msra.mxu0 %v8293_v7  ;;  %v8340_v7 = vld [vmem:[#allocation2 + $0x5b4] ss:$8 sps:$4 sm:$0xff]  }
 0x521   :  { %3878 = vmatprep.subr.bf16.mxu0 %v8298_v54  ;;  %v8338_v54 = vld [vmem:[#allocation2 + $0x5b0] ss:$8 sps:$4 sm:$0xff]  }
 0x522   :  { %v10077_v15 = vpop.f32.mrb[56].mxu1 }
 0x523   :  { %v10079_v16 = vpop.f32.mrb[57].mxu1 }
 0x524   :  { %v10081_v23 = vpop.f32.mrb[58].mxu1  ;;  %3879 = vmatpush1.bf16.msra.mxu0 %v8296_v12  ;;  %v8343_v12 = vld [vmem:[#allocation2 + $0x5c4] ss:$8 sps:$4 sm:$0xff]  }
 0x525   :  { %v10083_v25 = vpop.f32.mrb[59].mxu1  ;;  %3880 = vmatprep.subr.bf16.mxu0 %v8301_v13  ;;  %v8341_v13 = vld [vmem:[#allocation2 + $0x5c0] ss:$8 sps:$4 sm:$0xff]  }
 0x528   :  { %3881 = vmatpush1.bf16.msra.mxu0 %v8299_v45  ;;  %v8346_v45 = vld [vmem:[#allocation2 + $0x5d4] ss:$8 sps:$4 sm:$0xff]  }
 0x529   :  { %3882 = vmatprep.subr.bf16.mxu0 %v8304_v32  ;;  %v8344_v32 = vld [vmem:[#allocation2 + $0x5d0] ss:$8 sps:$4 sm:$0xff]  }
 0x52a   :  { %v10085_v51 = vpop.f32.mrb[60].mxu1 }
 0x52b   :  { %v10087_v47 = vpop.f32.mrb[61].mxu1 }
 0x52c   :  { %v10089_v19 = vpop.f32.mrb[62].mxu1  ;;  %3883 = vmatpush1.bf16.msra.mxu0 %v8302_v41  ;;  %v8349_v41 = vld [vmem:[#allocation2 + $0x5e4] ss:$8 sps:$4 sm:$0xff]  }
 0x52d   :  { %v10091_v21 = vpop.f32.mrb[63].mxu1  ;;  %3905 = vmatprep.subr.bf16.mxu0 %v8307_v46  ;;  %v8347_v46 = vld [vmem:[#allocation2 + $0x5e0] ss:$8 sps:$4 sm:$0xff]  }
 0x532   :  { %v3387_v59 = vpop.f32.mrb[64].mxu1 }
 0x533   :  { %v3389_v29 = vpop.f32.mrb[65].mxu1 }
 0x534   :  { %v3391_v18 = vpop.f32.mrb[66].mxu1 }
 0x535   :  { %v3459_v20 = vpack.c.bf16 %v3391_v18, %v3387_v59  ;;  %v3393_v63 = vpop.f32.mrb[67].mxu1  ;;  %v8352_v59 = vld [vmem:[#allocation2 + $0x5f4] ss:$8 sps:$4 sm:$0xff]   ;;  %v3966_v18 = vld [vmem:[%s10286_s6] ss:$2 sm:$0x3] }
 0x536   :  { %v3460_v28 = vpack.c.bf16 %v3393_v63, %v3389_v29  ;;  %v8350_v29 = vld [vmem:[#allocation2 + $0x5f0] ss:$8 sps:$4 sm:$0xff]   ;;  %v3971_v63 = vrot.slane %v3966_v18, %v9786_v11 }
 0x538   :  { %3884 = vmatprep.mubr.bf16.mxu0 %v3460_v28 }
 0x539   :  { %3885 = vmatmul.mubr.bf16.vlgmr.msra.gmra.mrb[56].mxu0 %v3459_v20  ;;  %v7338_v20 = vld [vmem:[%s10286_s6 + $0x1] ss:$2 sm:$0x3] }
 0x53a   :  { %3906 = vmatpush1.bf16.msra.mxu0 %v8305_v5  ;;  %v3397_v30 = vpop.f32.mrb[68].mxu1  ;;  %v3975_v5 = vrot.slane %v3966_v18, %v9791_v14  ;;  %v8361_v18 = vld [vmem:[#allocation5 + $0x120] ss:$8 sps:$4 sm:$0xff]  }
 0x53b   :  { %3907 = vmatprep.subr.bf16.mxu0 %v8310_v31  ;;  %v3399_v34 = vpop.f32.mrb[69].mxu1 }
 0x53c   :  { %v3401_v35 = vpop.f32.mrb[70].mxu1 }
 0x53d   :  { %v3463_v22 = vpack.c.bf16 %v3401_v35, %v3397_v30  ;;  %v3403_v27 = vpop.f32.mrb[71].mxu1 }
 0x53e   :  { %3908 = vmatpush1.bf16.msra.mxu0 %v8308_v3  ;;  %v3464_v6 = vpack.c.bf16 %v3403_v27, %v3399_v34  ;;  %v3992_v3 = vrot.slane %v7338_v20, %v9786_v11  ;;  %v3996_v34 = vrot.slane %v7338_v20, %v9791_v14  ;;  %v8366_v20 = vld [vmem:[#allocation5 + $0x134] ss:$8 sps:$4 sm:$0xff]  }
 0x53f   :  { %3909 = vmatprep.subr.bf16.mxu0 %v8313_v33 }
 0x540   :  { %3894 = vmatprep.mubr.bf16.mxu0 %v3464_v6 }
 0x541   :  { %3895 = vmatmul.mubr.bf16.gmra.mrb[60].mxu0 %v3463_v22 }
 0x542   :  { %3910 = vmatpush1.bf16.msra.mxu0 %v8311_v36  ;;  %v10093_v39 = vpop.f32.mrb[72].mxu1 }
 0x543   :  { %3911 = vmatprep.subr.bf16.mxu0 %v8316_v37  ;;  %v3442_v48 = vpop.f32.mrb[73].mxu1 }
 0x544   :  { %v3444_v50 = vpop.f32.mrb[74].mxu1 }
 0x545   :  { %v3461_v49 = vpack.c.bf16 %v3444_v50, %v10093_v39  ;;  %v3446_v24 = vpop.f32.mrb[75].mxu1 }
 0x546   :  { %3912 = vmatpush1.bf16.msra.mxu0 %v8314_v38  ;;  %v3462_v55 = vpack.c.bf16 %v3446_v24, %v3442_v48 }
 0x547   :  { %3913 = vmatprep.subr.bf16.mxu0 %v8319_v42 }
 0x548   :  { %3937 = vmatprep.mubr.bf16.mxu0 %v3462_v55 }
 0x54a   :  { %3914 = vmatpush1.bf16.msra.mxu0 %v8317_v52  ;;  %v3450_v4 = vpop.f32.mrb[76].mxu1 }
 0x54b   :  { %3915 = vmatprep.subr.bf16.mxu0 %v8322_v56  ;;  %v3452_v8 = vpop.f32.mrb[77].mxu1 }
 0x54c   :  { %v3454_v10 = vpop.f32.mrb[78].mxu1 }
 0x54d   :  { %v3465_v60 = vpack.c.bf16 %v3454_v10, %v3450_v4  ;;  %v3456_v44 = vpop.f32.mrb[79].mxu1 }
 0x54e   :  { %3916 = vmatpush1.bf16.msra.mxu0 %v8320_v53  ;;  %v3466_v2 = vpack.c.bf16 %v3456_v44, %v3452_v8 }
 0x54f   :  { %3917 = vmatprep.subr.bf16.mxu0 %v8325_v40 }
 0x552   :  { %3918 = vmatpush1.bf16.msra.mxu0 %v8323_v17 }
 0x553   :  { %3919 = vmatprep.subr.bf16.mxu0 %v8328_v9 }
 0x556   :  { %3920 = vmatpush1.bf16.msra.mxu0 %v8326_v1 }
 0x557   :  { %3921 = vmatprep.subr.bf16.mxu0 %v8331_v57 }
 0x55a   :  { %3922 = vmatpush1.bf16.msra.mxu0 %v8329_v58 }
 0x55b   :  { %3923 = vmatprep.subr.bf16.mxu0 %v8334_v61 }
 0x55e   :  { %3924 = vmatpush1.bf16.msra.mxu0 %v8332_v62 }
 0x55f   :  { %3925 = vmatprep.subr.bf16.mxu0 %v8337_v26 }
 0x562   :  { %3926 = vmatpush1.bf16.msra.mxu0 %v8335_v43 }
 0x563   :  { %3927 = vmatprep.subr.bf16.mxu0 %v8340_v7 }
 0x566   :  { %3928 = vmatpush1.bf16.msra.mxu0 %v8338_v54 }
 0x567   :  { %3929 = vmatprep.subr.bf16.mxu0 %v8343_v12 }
 0x56a   :  { %3930 = vmatpush1.bf16.msra.mxu0 %v8341_v13  ;;  %v8353_v13 = vld [vmem:[%s10287_s7] sm:$0xff]  }
 0x56b   :  { %3931 = vmatprep.subr.bf16.mxu0 %v8346_v45  ;;  %v8357_v45 = vld [vmem:[#allocation5 + $0x104] ss:$8 sps:$4 sm:$0xff]  }
 0x56e   :  { %3932 = vmatpush1.bf16.msra.mxu0 %v8344_v32  ;;  %v8354_v32 = vld [vmem:[%s10287_s7 + $0x8] sm:$0xff]  }
 0x56f   :  { %3933 = vmatprep.subr.bf16.mxu0 %v8349_v41  ;;  %v8355_v41 = vld [vmem:[#allocation5 + $0x100] ss:$8 sps:$4 sm:$0xff]  }
 0x572   :  { %3934 = vmatpush1.bf16.msra.mxu0 %v8347_v46  ;;  %v8360_v46 = vld [vmem:[#allocation5 + $0x114] ss:$8 sps:$4 sm:$0xff]  }
 0x573   :  { %3935 = vmatprep.subr.bf16.mxu0 %v8352_v59  ;;  %v8358_v59 = vld [vmem:[#allocation5 + $0x110] ss:$8 sps:$4 sm:$0xff]  }
 0x576   :  { %3936 = vmatpush1.bf16.msra.mxu0 %v8350_v29  ;;  %v8363_v29 = vld [vmem:[#allocation5 + $0x124] ss:$8 sps:$4 sm:$0xff]  }
 0x579   :  { %3938 = vmatmul.mubr.bf16.vlgmr.msra.gmra.mrb[56].mxu0 %v3461_v49 }
 0x57a   :  { %3947 = vmatprep.mubr.bf16.mxu0 %v3466_v2 }
 0x581   :  { %3948 = vmatmul.mubr.bf16.gmra.mrb[60].mxu0 %v3465_v60 }
 0x582   :  { %5573 = vmatprep.mubr.bf16.mxu0 %v8974_v0 }
 0x64c   :  { %v3939_v28 = vpop.f32.mrb[56].mxu0 }
 0x64d   :  { %v7669_v31 = vadd.f32 %v3939_v28, %v10077_v15  ;;  %v3941_v30 = vpop.f32.mrb[57].mxu0  ;;  %v8369_v28 = vld [vmem:[#allocation5 + $0x144] ss:$8 sps:$4 sm:$0xff]  }
 0x64e   :  { %v7670_v33 = vadd.f32 %v3941_v30, %v10079_v16  ;;  %v3943_v35 = vpop.f32.mrb[58].mxu0  ;;  %v8375_v30 = vld [vmem:[#allocation5 + $0x164] ss:$8 sps:$4 sm:$0xff]  }
 0x64f   :  { %v3978_v22 = vmul.f32 %v7669_v31, %v3971_v63  ;;  %v7671_v27 = vadd.f32 %v3943_v35, %v10081_v23  ;;  %v3945_v36 = vpop.f32.mrb[59].mxu0  ;;  %v8372_v31 = vld [vmem:[#allocation5 + $0x154] ss:$8 sps:$4 sm:$0xff]   ;;  %v8376_v35 = vld [vmem:[#allocation5 + $0x170] ss:$8 sps:$4 sm:$0xff]  }
 0x650   :  { %v3979_v6 = vmul.f32 %v7670_v33, %v3975_v5  ;;  %v7672_v37 = vadd.f32 %v3945_v36, %v10083_v25  ;;  %v8373_v33 = vld [vmem:[#allocation5 + $0x160] ss:$8 sps:$4 sm:$0xff]   ;;  %v8384_v36 = vld [vmem:[#allocation5 + $0x194] ss:$8 sps:$4 sm:$0xff]  }
 0x651   :  { %v3999_v38 = vadd.f32 %v3992_v3, %v3978_v22  ;;  %v3980_v39 = vmul.f32 %v7671_v27, %v3971_v63  ;;  %v8381_v22 = vld [vmem:[#allocation5 + $0x184] ss:$8 sps:$4 sm:$0xff]   ;;  %v8379_v27 = vld [vmem:[#allocation5 + $0x180] ss:$8 sps:$4 sm:$0xff]  }
 0x652   :  { %v4000_v42 = vadd.f32 %v3996_v34, %v3979_v6  ;;  %v3981_v48 = vmul.f32 %v7672_v37, %v3975_v5  ;;  %v8382_v6 = vld [vmem:[#allocation5 + $0x190] ss:$8 sps:$4 sm:$0xff]   ;;  %v8387_v37 = vld [vmem:[#allocation5 + $0x1a4] ss:$8 sps:$4 sm:$0xff]  }
 0x653   :  { %v4007_v15 = vmax.f32 %v3999_v38, 0.0  ;;  %v4001_v50 = vadd.f32 %v3992_v3, %v3980_v39  ;;  %v8385_v38 = vld [vmem:[#allocation5 + $0x1a0] ss:$8 sps:$4 sm:$0xff]   ;;  %v8390_v39 = vld [vmem:[#allocation5 + $0x1b4] ss:$8 sps:$4 sm:$0xff]  }
 0x654   :  { %v4008_v49 = vmax.f32 %v4000_v42, 0.0  ;;  %v4002_v24 = vadd.f32 %v3996_v34, %v3981_v48  ;;  %v3949_v52 = vpop.f32.mrb[60].mxu0  ;;  %v8388_v42 = vld [vmem:[#allocation5 + $0x1b0] ss:$8 sps:$4 sm:$0xff]   ;;  %v8393_v48 = vld [vmem:[#allocation5 + $0x1c4] ss:$8 sps:$4 sm:$0xff]  }
 0x655   :  { %v4009_v16 = vmax.f32 %v4001_v50, 0.0  ;;  %v7673_v55 = vadd.f32 %v3949_v52, %v10085_v51  ;;  %v3951_v56 = vpop.f32.mrb[61].mxu0  ;;  %v8396_v50 = vld [vmem:[#allocation5 + $0x1d4] ss:$8 sps:$4 sm:$0xff]   ;;  %v8399_v52 = vld [vmem:[#allocation5 + $0x1e4] ss:$8 sps:$4 sm:$0xff]  }
 0x656   :  { %v7662_v53 = vpack.c.bf16 %v4008_v49, %v4007_v15  ;;  %v4010_v4 = vmax.f32 %v4002_v24, 0.0  ;;  %v7674_v23 = vadd.f32 %v3951_v56, %v10087_v47  ;;  %v3953_v40 = vpop.f32.mrb[62].mxu0  ;;  %v8397_v24 = vld [vmem:[#allocation5 + $0x1e0] ss:$8 sps:$4 sm:$0xff]   ;;  %v8405_v56 = vld [vmem:[#allocation5 + $0x4] ss:$8 sps:$4 sm:$0xff]  }
 0x657   :  { %v10113_v8 = vpack.c.bf16 %v4009_v16, %v4007_v15  ;;  %v3982_v25 = vmul.f32 %v7673_v55, %v3971_v63  ;;  %v7675_v10 = vadd.f32 %v3953_v40, %v10089_v19  ;;  %v3955_v60 = vpop.f32.mrb[63].mxu0  ;;  %v8391_v15 = vld [vmem:[#allocation5 + $0x1c0] ss:$8 sps:$4 sm:$0xff]   ;;  %v8400_v55 = vld [vmem:[#allocation5 + $0x1f0] ss:$8 sps:$4 sm:$0xff]  }
 0x658   :  { %4039 = vst [vmem:[#allocation10] sm:$0xff] %v7662_v53  ;;  %v7663_v44 = vpack.c.bf16 %v4010_v4, %v4009_v16  ;;  %v3983_v17 = vmul.f32 %v7674_v23, %v3975_v5  ;;  %v7676_v2 = vadd.f32 %v3955_v60, %v10091_v21  ;;  %v10117_v9 = vpack.c.bf16 %v4010_v4, %v4008_v49  ;;  %v8394_v49 = vld [vmem:[#allocation5 + $0x1d0] ss:$8 sps:$4 sm:$0xff]   ;;  %v8402_v16 = vld [vmem:[#allocation5 + $0x1f4] ss:$8 sps:$4 sm:$0xff]  }
 0x659   :  { %v4003_v51 = vadd.f32 %v3992_v3, %v3982_v25  ;;  %v3984_v1 = vmul.f32 %v7675_v10, %v3971_v63  ;;  %v8364_v63 = vld [vmem:[#allocation5 + $0x130] ss:$8 sps:$4 sm:$0xff]  }
 0x65a   :  { %4040 = vst [vmem:[#allocation10 + $0x8] sm:$0xff] %v7663_v44  ;;  %v4004_v57 = vadd.f32 %v3996_v34, %v3983_v17  ;;  %v3985_v58 = vmul.f32 %v7676_v2, %v3975_v5  ;;  %4054 = vmatprep.subr.bf16.mxu1 %v10117_v9  ;;  %v8367_v5 = vld [vmem:[#allocation5 + $0x140] ss:$8 sps:$4 sm:$0xff]  }
 0x65b   :  { %v4011_v47 = vmax.f32 %v4003_v51, 0.0  ;;  %v4005_v61 = vadd.f32 %v3992_v3, %v3984_v1  ;;  %4055 = vmatpush1.bf16.msra.mxu1 %v10113_v8  ;;  %v8370_v3 = vld [vmem:[#allocation5 + $0x150] ss:$8 sps:$4 sm:$0xff]  }
 0x65c   :  { %v4012_v19 = vmax.f32 %v4004_v57, 0.0  ;;  %v4006_v62 = vadd.f32 %v3996_v34, %v3985_v58  ;;  %v8378_v34 = vld [vmem:[#allocation5 + $0x174] ss:$8 sps:$4 sm:$0xff]   ;;  %v8403_v57 = vld [vmem:[#allocation5] ss:$8 sps:$4 sm:$0xff]  }
 0x65d   :  { %v4013_v26 = vmax.f32 %v4005_v61, 0.0  ;;  %v8408_v58 = vld [vmem:[#allocation5 + $0x14] ss:$8 sps:$4 sm:$0xff]   ;;  %v8411_v61 = vld [vmem:[#allocation5 + $0x24] ss:$8 sps:$4 sm:$0xff]  }
 0x65e   :  { %v7664_v43 = vpack.c.bf16 %v4012_v19, %v4011_v47  ;;  %v4014_v7 = vmax.f32 %v4006_v62, 0.0  ;;  %v8414_v62 = vld [vmem:[#allocation5 + $0x34] ss:$8 sps:$4 sm:$0xff]  }
 0x65f   :  { %v10121_v54 = vpack.c.bf16 %v4013_v26, %v4011_v47  ;;  %v8406_v47 = vld [vmem:[#allocation5 + $0x10] ss:$8 sps:$4 sm:$0xff]  }
 0x660   :  { %4041 = vst [vmem:[#allocation10 + $0x10] sm:$0xff] %v7664_v43  ;;  %v7665_v21 = vpack.c.bf16 %v4014_v7, %v4013_v26  ;;  %v10123_v12 = vpack.c.bf16 %v4014_v7, %v4012_v19  ;;  %v8409_v19 = vld [vmem:[#allocation5 + $0x20] ss:$8 sps:$4 sm:$0xff]   ;;  %v8412_v26 = vld [vmem:[#allocation5 + $0x30] ss:$8 sps:$4 sm:$0xff]  }
 0x661   :  { %v8417_v43 = vld [vmem:[#allocation5 + $0x44] ss:$8 sps:$4 sm:$0xff]   ;;  %v8415_v7 = vld [vmem:[#allocation5 + $0x40] ss:$8 sps:$4 sm:$0xff]  }
 0x662   :  { %4042 = vst [vmem:[#allocation10 + $0x18] sm:$0xff] %v7665_v21  ;;  %4056 = vmatprep.subr.bf16.mxu1 %v10123_v12  ;;  %v8420_v21 = vld [vmem:[#allocation5 + $0x54] ss:$8 sps:$4 sm:$0xff]  }
 0x663   :  { %4057 = vmatpush1.bf16.msra.mxu1 %v10121_v54 }
 0x664   :  { %4142 = vmatprep.subr.bf16.mxu1 %v10117_v9 }
 0x666   :  { %7344 = vmatmul.mubr.msk.bf16.vlgmr.msra.gmra.mrb[80].mxu1 %vm4050_vm1, %v8353_v13  ;;  %v8418_v13 = vld [vmem:[#allocation5 + $0x50] ss:$8 sps:$4 sm:$0xff]  }
 0x667   :  { %4143 = vmatpush1.bf16.msra.mxu1 %v10113_v8  ;;  %4174 = vmatprep.mubr.bf16.mxu1 %v8974_v0 }
 0x668   :  { %4144 = vmatprep.subr.bf16.mxu1 %v10123_v12 }
 0x66b   :  { %4145 = vmatpush1.bf16.msra.mxu1 %v10121_v54 }
 0x66c   :  { %4380 = vmatprep.subr.bf16.mxu1 %v8357_v45  ;;  %v8423_v45 = vld [vmem:[#allocation5 + $0x64] ss:$8 sps:$4 sm:$0xff]  }
 0x66e   :  { %7348 = vmatmul.mubr.msk.bf16.vlgmr.msra.gmra.mrb[84].mxu1 %vm4050_vm1, %v8354_v32  ;;  %v8421_v32 = vld [vmem:[#allocation5 + $0x60] ss:$8 sps:$4 sm:$0xff]  }
 0x66f   :  { %4381 = vmatpush1.bf16.msra.mxu1 %v8355_v41  ;;  %v8426_v41 = vld [vmem:[#allocation5 + $0x74] ss:$8 sps:$4 sm:$0xff]  }
 0x670   :  { %4382 = vmatprep.subr.bf16.mxu1 %v8360_v46  ;;  %v8424_v46 = vld [vmem:[#allocation5 + $0x70] ss:$8 sps:$4 sm:$0xff]  }
 0x673   :  { %4383 = vmatpush1.bf16.msra.mxu1 %v8358_v59  ;;  %v8429_v59 = vld [vmem:[#allocation5 + $0x84] ss:$8 sps:$4 sm:$0xff]  }
 0x674   :  { %4384 = vmatprep.subr.bf16.mxu1 %v8363_v29  ;;  %v8427_v29 = vld [vmem:[#allocation5 + $0x80] ss:$8 sps:$4 sm:$0xff]  }
 0x677   :  { %4385 = vmatpush1.bf16.msra.mxu1 %v8361_v18  ;;  %v8432_v18 = vld [vmem:[#allocation5 + $0x94] ss:$8 sps:$4 sm:$0xff]  }
 0x678   :  { %4386 = vmatprep.subr.bf16.mxu1 %v8366_v20  ;;  %v8430_v20 = vld [vmem:[#allocation5 + $0x90] ss:$8 sps:$4 sm:$0xff]  }
 0x67b   :  { %4387 = vmatpush1.bf16.msra.mxu1 %v8364_v63  ;;  %v8435_v63 = vld [vmem:[#allocation5 + $0xa4] ss:$8 sps:$4 sm:$0xff]  }
 0x67c   :  { %4388 = vmatprep.subr.bf16.mxu1 %v8369_v28  ;;  %v8433_v28 = vld [vmem:[#allocation5 + $0xa0] ss:$8 sps:$4 sm:$0xff]  }
 0x67f   :  { %4389 = vmatpush1.bf16.msra.mxu1 %v8367_v5  ;;  %v8438_v5 = vld [vmem:[#allocation5 + $0xb4] ss:$8 sps:$4 sm:$0xff]  }
 0x680   :  { %4390 = vmatprep.subr.bf16.mxu1 %v8372_v31  ;;  %v8436_v31 = vld [vmem:[#allocation5 + $0xb0] ss:$8 sps:$4 sm:$0xff]  }
 0x683   :  { %4391 = vmatpush1.bf16.msra.mxu1 %v8370_v3  ;;  %v8441_v3 = vld [vmem:[#allocation5 + $0xc4] ss:$8 sps:$4 sm:$0xff]  }
 0x684   :  { %4392 = vmatprep.subr.bf16.mxu1 %v8375_v30  ;;  %v8439_v30 = vld [vmem:[#allocation5 + $0xc0] ss:$8 sps:$4 sm:$0xff]  }
 0x687   :  { %4393 = vmatpush1.bf16.msra.mxu1 %v8373_v33  ;;  %v8444_v33 = vld [vmem:[#allocation5 + $0xd4] ss:$8 sps:$4 sm:$0xff]  }
 0x688   :  { %4394 = vmatprep.subr.bf16.mxu1 %v8378_v34  ;;  %v8442_v34 = vld [vmem:[#allocation5 + $0xd0] ss:$8 sps:$4 sm:$0xff]  }
 0x68b   :  { %4395 = vmatpush1.bf16.msra.mxu1 %v8376_v35  ;;  %v8447_v35 = vld [vmem:[#allocation5 + $0xe4] ss:$8 sps:$4 sm:$0xff]  }
 0x68c   :  { %4396 = vmatprep.subr.bf16.mxu1 %v8381_v22  ;;  %v8445_v22 = vld [vmem:[#allocation5 + $0xe0] ss:$8 sps:$4 sm:$0xff]  }
 0x68f   :  { %4397 = vmatpush1.bf16.msra.mxu1 %v8379_v27  ;;  %v8450_v27 = vld [vmem:[#allocation5 + $0xf4] ss:$8 sps:$4 sm:$0xff]  }
 0x690   :  { %4398 = vmatprep.subr.bf16.mxu1 %v8384_v36  ;;  %v8448_v36 = vld [vmem:[#allocation5 + $0xf0] ss:$8 sps:$4 sm:$0xff]  }
 0x693   :  { %4399 = vmatpush1.bf16.msra.mxu1 %v8382_v6  ;;  %v8454_v6 = vld [vmem:[#allocation5 + $0x204] ss:$8 sps:$4 sm:$0xff]  }
 0x694   :  { %4400 = vmatprep.subr.bf16.mxu1 %v8387_v37  ;;  %v8451_v37 = vld [vmem:[%s10287_s7 + $0x10] sm:$0xff]  }
 0x697   :  { %4401 = vmatpush1.bf16.msra.mxu1 %v8385_v38  ;;  %v8452_v38 = vld [vmem:[#allocation5 + $0x200] ss:$8 sps:$4 sm:$0xff]  }
 0x698   :  { %4402 = vmatprep.subr.bf16.mxu1 %v8390_v39  ;;  %v8455_v39 = vld [vmem:[#allocation5 + $0x210] ss:$8 sps:$4 sm:$0xff]  }
 0x69b   :  { %4403 = vmatpush1.bf16.msra.mxu1 %v8388_v42  ;;  %v8458_v42 = vld [vmem:[#allocation5 + $0x220] ss:$8 sps:$4 sm:$0xff]  }
 0x69c   :  { %4404 = vmatprep.subr.bf16.mxu1 %v8393_v48  ;;  %v8461_v48 = vld [vmem:[#allocation5 + $0x230] ss:$8 sps:$4 sm:$0xff]  }
 0x69f   :  { %4405 = vmatpush1.bf16.msra.mxu1 %v8391_v15  ;;  %v8466_v15 = vld [vmem:[#allocation5 + $0x244] ss:$8 sps:$4 sm:$0xff]  }
 0x6a0   :  { %4406 = vmatprep.subr.bf16.mxu1 %v8396_v50  ;;  %v8464_v50 = vld [vmem:[#allocation5 + $0x240] ss:$8 sps:$4 sm:$0xff]  }
 0x6a3   :  { %4407 = vmatpush1.bf16.msra.mxu1 %v8394_v49  ;;  %v8467_v49 = vld [vmem:[#allocation5 + $0x250] ss:$8 sps:$4 sm:$0xff]  }
 0x6a4   :  { %4408 = vmatprep.subr.bf16.mxu1 %v8399_v52  ;;  %v8470_v52 = vld [vmem:[#allocation5 + $0x260] ss:$8 sps:$4 sm:$0xff]  }
 0x6a7   :  { %4409 = vmatpush1.bf16.msra.mxu1 %v8397_v24  ;;  %v8472_v24 = vld [vmem:[#allocation5 + $0x264] ss:$8 sps:$4 sm:$0xff]  }
 0x6a8   :  { %4410 = vmatprep.subr.bf16.mxu1 %v8402_v16  ;;  %v8475_v16 = vld [vmem:[#allocation5 + $0x274] ss:$8 sps:$4 sm:$0xff]  }
 0x6ab   :  { %4411 = vmatpush1.bf16.msra.mxu1 %v8400_v55  ;;  %v8473_v55 = vld [vmem:[#allocation5 + $0x270] ss:$8 sps:$4 sm:$0xff]  }
 0x6ac   :  { %4583 = vmatprep.subr.bf16.mxu1 %v8405_v56  ;;  %v8478_v56 = vld [vmem:[#allocation5 + $0x284] ss:$8 sps:$4 sm:$0xff]  }
 0x739   :  { %v10140_v53 = vpop.f32.mrb[80].mxu1 }
 0x73a   :  { %v4090_v4 = vpop.f32.mrb[81].mxu1 }
 0x73b   :  { %v10142_v23 = vpop.f32.mrb[82].mxu1 }
 0x73c   :  { %v4097_v40 = vpack.c.bf16 %v10142_v23, %v10140_v53  ;;  %v4094_v25 = vpop.f32.mrb[83].mxu1  ;;  %v8476_v53 = vld [vmem:[#allocation5 + $0x280] ss:$8 sps:$4 sm:$0xff]   ;;  %v8479_v23 = vld [vmem:[#allocation5 + $0x290] ss:$8 sps:$4 sm:$0xff]  }
 0x73d   :  { %v4098_v10 = vpack.c.bf16 %v4094_v25, %v4090_v4  ;;  %v8481_v4 = vld [vmem:[#allocation5 + $0x294] ss:$8 sps:$4 sm:$0xff]   ;;  %v8482_v25 = vld [vmem:[#allocation5 + $0x2a0] ss:$8 sps:$4 sm:$0xff]  }
 0x741   :  { %v4176_v60 = vpop.f32.mrb[84].mxu1 }
 0x742   :  { %v4178_v44 = vpop.f32.mrb[85].mxu1 }
 0x743   :  { %v4180_v17 = vpop.f32.mrb[86].mxu1 }
 0x744   :  { %v4185_v2 = vpack.c.bf16 %v4180_v17, %v4176_v60  ;;  %v4182_v51 = vpop.f32.mrb[87].mxu1  ;;  %v8485_v60 = vld [vmem:[#allocation5 + $0x2b0] ss:$8 sps:$4 sm:$0xff]   ;;  %v8488_v17 = vld [vmem:[#allocation5 + $0x2c0] ss:$8 sps:$4 sm:$0xff]  }
 0x745   :  { %v4186_v1 = vpack.c.bf16 %v4182_v51, %v4178_v44  ;;  %v8490_v44 = vld [vmem:[#allocation5 + $0x2c4] ss:$8 sps:$4 sm:$0xff]   ;;  %v8491_v51 = vld [vmem:[#allocation5 + $0x2d0] ss:$8 sps:$4 sm:$0xff]  }
 0x747   :  { %4412 = vmatprep.mubr.bf16.mxu1 %v4186_v1  ;;  %v8496_v1 = vld [vmem:[#allocation5 + $0x2e4] ss:$8 sps:$4 sm:$0xff]  }
 0x748   :  { %4413 = vmatmul.mubr.bf16.vlgmr.msra.gmra.mrb[88].mxu1 %v4185_v2  ;;  %v8493_v2 = vld [vmem:[#allocation5 + $0x2d4] ss:$8 sps:$4 sm:$0xff]  }
 0x749   :  { %4584 = vmatpush1.bf16.msra.mxu1 %v8403_v57  ;;  %4615 = vmatprep.mubr.bf16.mxu1 %v4098_v10  ;;  %v8487_v10 = vld [vmem:[#allocation5 + $0x2b4] ss:$8 sps:$4 sm:$0xff]   ;;  %v8494_v57 = vld [vmem:[#allocation5 + $0x2e0] ss:$8 sps:$4 sm:$0xff]  }
 0x74a   :  { %4585 = vmatprep.subr.bf16.mxu1 %v8408_v58  ;;  %v8499_v58 = vld [vmem:[#allocation5 + $0x2f4] ss:$8 sps:$4 sm:$0xff]  }
 0x74d   :  { %4586 = vmatpush1.bf16.msra.mxu1 %v8406_v47  ;;  %v8497_v47 = vld [vmem:[#allocation5 + $0x2f0] ss:$8 sps:$4 sm:$0xff]  }
 0x74e   :  { %4587 = vmatprep.subr.bf16.mxu1 %v8411_v61 }
 0x751   :  { %4588 = vmatpush1.bf16.msra.mxu1 %v8409_v19 }
 0x752   :  { %4589 = vmatprep.subr.bf16.mxu1 %v8414_v62 }
 0x755   :  { %4590 = vmatpush1.bf16.msra.mxu1 %v8412_v26 }
 0x756   :  { %4591 = vmatprep.subr.bf16.mxu1 %v8417_v43 }
 0x759   :  { %4592 = vmatpush1.bf16.msra.mxu1 %v8415_v7 }
 0x75a   :  { %4593 = vmatprep.subr.bf16.mxu1 %v8420_v21  ;;  %v4922_v21 = vld [vmem:[%s10289_s9] ss:$2 sm:$0x3] }
 0x75d   :  { %4594 = vmatpush1.bf16.msra.mxu1 %v8418_v13  ;;  %v7449_v13 = vld [vmem:[%s10289_s9 + $0x1] ss:$2 sm:$0x3] }
 0x75e   :  { %4595 = vmatprep.subr.bf16.mxu1 %v8423_v45  ;;  %v4927_v45 = vrot.slane %v4922_v21, %v9786_v11 }
 0x761   :  { %4596 = vmatpush1.bf16.msra.mxu1 %v8421_v32  ;;  %v4931_v32 = vrot.slane %v4922_v21, %v9791_v14  ;;  %v8550_v21 = vld [vmem:[#allocation7 + $0x4] ss:$8 sps:$4 sm:$0xff]  }
 0x762   :  { %4597 = vmatprep.subr.bf16.mxu1 %v8426_v41  ;;  %v4944_v41 = vrot.slane %v7449_v13, %v9786_v11 }
 0x765   :  { %4598 = vmatpush1.bf16.msra.mxu1 %v8424_v46 }
 0x766   :  { %4599 = vmatprep.subr.bf16.mxu1 %v8429_v59  ;;  %v4948_v59 = vrot.slane %v7449_v13, %v9791_v14 }
 0x769   :  { %4600 = vmatpush1.bf16.msra.mxu1 %v8427_v29 }
 0x76a   :  { %4601 = vmatprep.subr.bf16.mxu1 %v8432_v18 }
 0x76d   :  { %4602 = vmatpush1.bf16.msra.mxu1 %v8430_v20 }
 0x76e   :  { %4603 = vmatprep.subr.bf16.mxu1 %v8435_v63 }
 0x771   :  { %4604 = vmatpush1.bf16.msra.mxu1 %v8433_v28 }
 0x772   :  { %4605 = vmatprep.subr.bf16.mxu1 %v8438_v5 }
 0x775   :  { %4606 = vmatpush1.bf16.msra.mxu1 %v8436_v31 }
 0x776   :  { %4607 = vmatprep.subr.bf16.mxu1 %v8441_v3 }
 0x779   :  { %4608 = vmatpush1.bf16.msra.mxu1 %v8439_v30 }
 0x77a   :  { %4609 = vmatprep.subr.bf16.mxu1 %v8444_v33 }
 0x77d   :  { %4610 = vmatpush1.bf16.msra.mxu1 %v8442_v34 }
 0x77e   :  { %4611 = vmatprep.subr.bf16.mxu1 %v8447_v35 }
 0x781   :  { %4612 = vmatpush1.bf16.msra.mxu1 %v8445_v22 }
 0x782   :  { %4613 = vmatprep.subr.bf16.mxu1 %v8450_v27 }
 0x785   :  { %4614 = vmatpush1.bf16.msra.mxu1 %v8448_v36 }
 0x786   :  { %4637 = vmatprep.subr.bf16.mxu1 %v10117_v9  ;;  %v8457_v9 = vld [vmem:[#allocation5 + $0x214] ss:$8 sps:$4 sm:$0xff]  }
 0x788   :  { %4616 = vmatmul.mubr.bf16.vlgmr.msra.gmra.mrb[88].mxu1 %v4097_v40  ;;  %v8484_v40 = vld [vmem:[#allocation5 + $0x2a4] ss:$8 sps:$4 sm:$0xff]  }
 0x789   :  { %4638 = vmatpush1.bf16.msra.mxu1 %v10113_v8  ;;  %4669 = vmatprep.mubr.bf16.mxu1 %v8974_v0  ;;  %v8460_v8 = vld [vmem:[#allocation5 + $0x224] ss:$8 sps:$4 sm:$0xff]  }
 0x78a   :  { %4639 = vmatprep.subr.bf16.mxu1 %v10123_v12  ;;  %v8463_v12 = vld [vmem:[#allocation5 + $0x234] ss:$8 sps:$4 sm:$0xff]  }
 0x78d   :  { %4640 = vmatpush1.bf16.msra.mxu1 %v10121_v54  ;;  %v8469_v54 = vld [vmem:[#allocation5 + $0x254] ss:$8 sps:$4 sm:$0xff]  }
 0x78e   :  { %4875 = vmatprep.subr.bf16.mxu1 %v8454_v6 }
 0x790   :  { %7416 = vmatmul.mubr.msk.bf16.vlgmr.msra.gmra.mrb[92].mxu1 %vm4050_vm1, %v8451_v37 }
 0x791   :  { %4876 = vmatpush1.bf16.msra.mxu1 %v8452_v38 }
 0x792   :  { %4877 = vmatprep.subr.bf16.mxu1 %v8457_v9 }
 0x795   :  { %4878 = vmatpush1.bf16.msra.mxu1 %v8455_v39  ;;  %v4973_v39 = vld [vmem:[%s10290_s10] sm:$0xf] }
 0x796   :  { %4879 = vmatprep.subr.bf16.mxu1 %v8460_v8  ;;  %v7519_v8 = vld [vmem:[%s10290_s10 + $0x8] sm:$0xf] }
 0x799   :  { %4880 = vmatpush1.bf16.msra.mxu1 %v8458_v42  ;;  %v8502_v42 = vld [vmem:[#allocation7 + $0x104] ss:$8 sps:$4 sm:$0xff]  }
 0x79a   :  { %4881 = vmatprep.subr.bf16.mxu1 %v8463_v12  ;;  %v7453_v12 = vld [vmem:[%s10290_s10 + $0x4] sm:$0xf] }
 0x79d   :  { %4882 = vmatpush1.bf16.msra.mxu1 %v8461_v48  ;;  %v8500_v48 = vld [vmem:[#allocation7 + $0x100] ss:$8 sps:$4 sm:$0xff]  }
 0x79e   :  { %4883 = vmatprep.subr.bf16.mxu1 %v8466_v15  ;;  %v8505_v15 = vld [vmem:[#allocation7 + $0x114] ss:$8 sps:$4 sm:$0xff]  }
 0x7a1   :  { %4884 = vmatpush1.bf16.msra.mxu1 %v8464_v50  ;;  %v8503_v50 = vld [vmem:[#allocation7 + $0x110] ss:$8 sps:$4 sm:$0xff]  }
 0x7a2   :  { %4885 = vmatprep.subr.bf16.mxu1 %v8469_v54  ;;  %v8508_v54 = vld [vmem:[#allocation7 + $0x124] ss:$8 sps:$4 sm:$0xff]  }
 0x7a5   :  { %4886 = vmatpush1.bf16.msra.mxu1 %v8467_v49  ;;  %v8506_v49 = vld [vmem:[#allocation7 + $0x120] ss:$8 sps:$4 sm:$0xff]  }
 0x7a6   :  { %4887 = vmatprep.subr.bf16.mxu1 %v8472_v24  ;;  %v8511_v24 = vld [vmem:[#allocation7 + $0x134] ss:$8 sps:$4 sm:$0xff]  }
 0x7a9   :  { %4888 = vmatpush1.bf16.msra.mxu1 %v8470_v52  ;;  %v8509_v52 = vld [vmem:[#allocation7 + $0x130] ss:$8 sps:$4 sm:$0xff]  }
 0x7aa   :  { %4889 = vmatprep.subr.bf16.mxu1 %v8475_v16  ;;  %v8514_v16 = vld [vmem:[#allocation7 + $0x144] ss:$8 sps:$4 sm:$0xff]  }
 0x7ad   :  { %4890 = vmatpush1.bf16.msra.mxu1 %v8473_v55  ;;  %v8512_v55 = vld [vmem:[#allocation7 + $0x140] ss:$8 sps:$4 sm:$0xff]  }
 0x7ae   :  { %4891 = vmatprep.subr.bf16.mxu1 %v8478_v56  ;;  %v8517_v56 = vld [vmem:[#allocation7 + $0x154] ss:$8 sps:$4 sm:$0xff]  }
 0x7b1   :  { %4892 = vmatpush1.bf16.msra.mxu1 %v8476_v53  ;;  %v8515_v53 = vld [vmem:[#allocation7 + $0x150] ss:$8 sps:$4 sm:$0xff]  }
 0x7b2   :  { %4893 = vmatprep.subr.bf16.mxu1 %v8481_v4  ;;  %v8520_v4 = vld [vmem:[#allocation7 + $0x164] ss:$8 sps:$4 sm:$0xff]  }
 0x7b5   :  { %4894 = vmatpush1.bf16.msra.mxu1 %v8479_v23  ;;  %v8518_v23 = vld [vmem:[#allocation7 + $0x160] ss:$8 sps:$4 sm:$0xff]  }
 0x7b6   :  { %4895 = vmatprep.subr.bf16.mxu1 %v8484_v40  ;;  %v8523_v40 = vld [vmem:[#allocation7 + $0x174] ss:$8 sps:$4 sm:$0xff]  }
 0x7b9   :  { %4896 = vmatpush1.bf16.msra.mxu1 %v8482_v25  ;;  %v8521_v25 = vld [vmem:[#allocation7 + $0x170] ss:$8 sps:$4 sm:$0xff]  }
 0x7ba   :  { %4897 = vmatprep.subr.bf16.mxu1 %v8487_v10  ;;  %v8526_v10 = vld [vmem:[#allocation7 + $0x184] ss:$8 sps:$4 sm:$0xff]  }
 0x7bd   :  { %4898 = vmatpush1.bf16.msra.mxu1 %v8485_v60  ;;  %v8524_v60 = vld [vmem:[#allocation7 + $0x180] ss:$8 sps:$4 sm:$0xff]  }
 0x7be   :  { %4899 = vmatprep.subr.bf16.mxu1 %v8490_v44  ;;  %v8529_v44 = vld [vmem:[#allocation7 + $0x194] ss:$8 sps:$4 sm:$0xff]  }
 0x7c1   :  { %4900 = vmatpush1.bf16.msra.mxu1 %v8488_v17  ;;  %v8527_v17 = vld [vmem:[#allocation7 + $0x190] ss:$8 sps:$4 sm:$0xff]  }
 0x7c2   :  { %4901 = vmatprep.subr.bf16.mxu1 %v8493_v2  ;;  %v8532_v2 = vld [vmem:[#allocation7 + $0x1a4] ss:$8 sps:$4 sm:$0xff]  }
 0x7c5   :  { %4902 = vmatpush1.bf16.msra.mxu1 %v8491_v51  ;;  %v8530_v51 = vld [vmem:[#allocation7 + $0x1a0] ss:$8 sps:$4 sm:$0xff]  }
 0x7c6   :  { %4903 = vmatprep.subr.bf16.mxu1 %v8496_v1  ;;  %v8535_v1 = vld [vmem:[#allocation7 + $0x1b4] ss:$8 sps:$4 sm:$0xff]  }
 0x7c9   :  { %4904 = vmatpush1.bf16.msra.mxu1 %v8494_v57  ;;  %v8533_v57 = vld [vmem:[#allocation7 + $0x1b0] ss:$8 sps:$4 sm:$0xff]  }
 0x7ca   :  { %4905 = vmatprep.subr.bf16.mxu1 %v8499_v58  ;;  %v8538_v58 = vld [vmem:[#allocation7 + $0x1c4] ss:$8 sps:$4 sm:$0xff]  }
 0x7cd   :  { %4906 = vmatpush1.bf16.msra.mxu1 %v8497_v47  ;;  %v8536_v47 = vld [vmem:[#allocation7 + $0x1c0] ss:$8 sps:$4 sm:$0xff]  }
 0x863   :  { %v4671_v61 = vpop.f32.mrb[92].mxu1 }
 0x864   :  { %v4673_v19 = vpop.f32.mrb[93].mxu1 }
 0x865   :  { %v4675_v62 = vpop.f32.mrb[94].mxu1 }
 0x866   :  { %v4680_v26 = vpack.c.bf16 %v4675_v62, %v4671_v61  ;;  %v4677_v43 = vpop.f32.mrb[95].mxu1  ;;  %v8541_v61 = vld [vmem:[#allocation7 + $0x1d4] ss:$8 sps:$4 sm:$0xff]   ;;  %v8544_v62 = vld [vmem:[#allocation7 + $0x1e4] ss:$8 sps:$4 sm:$0xff]  }
 0x867   :  { %v4681_v7 = vpack.c.bf16 %v4677_v43, %v4673_v19  ;;  %v8539_v19 = vld [vmem:[#allocation7 + $0x1d0] ss:$8 sps:$4 sm:$0xff]   ;;  %v8547_v43 = vld [vmem:[#allocation7 + $0x1f4] ss:$8 sps:$4 sm:$0xff]  }
 0x869   :  { %4907 = vmatprep.mubr.bf16.mxu1 %v4681_v7  ;;  %v8545_v7 = vld [vmem:[#allocation7 + $0x1f0] ss:$8 sps:$4 sm:$0xff]  }
 0x86a   :  { %4908 = vmatmul.mubr.bf16.vlgmr.msra.gmra.mrb[88].mxu1 %v4680_v26  ;;  %v8542_v26 = vld [vmem:[#allocation7 + $0x1e0] ss:$8 sps:$4 sm:$0xff]  }
 0x86b   :  { %5010 = vmatprep.mubr.bf16.mxu1 %v8974_v0 }
 0x93d   :  { %v4909_v46 = vpop.f32.mrb[88].mxu1 }
 0x93e   :  { %v4934_v29 = vmul.f32 %v4927_v45, %v4909_v46  ;;  %v4911_v18 = vpop.f32.mrb[89].mxu1 }
 0x93f   :  { %v4935_v20 = vmul.f32 %v4931_v32, %v4911_v18  ;;  %v4913_v63 = vpop.f32.mrb[90].mxu1 }
 0x940   :  { %v4951_v28 = vadd.f32 %v4944_v41, %v4934_v29  ;;  %v4936_v5 = vmul.f32 %v4927_v45, %v4913_v63  ;;  %v4915_v31 = vpop.f32.mrb[91].mxu1 }
 0x941   :  { %v4952_v3 = vadd.f32 %v4948_v59, %v4935_v20  ;;  %v4937_v30 = vmul.f32 %v4931_v32, %v4915_v31  ;;  %v8548_v31 = vld [vmem:[#allocation7] ss:$8 sps:$4 sm:$0xff]  }
 0x942   :  { %v4955_v33 = vmax.f32 %v4951_v28, 0.0  ;;  %v4953_v34 = vadd.f32 %v4944_v41, %v4936_v5 }
 0x943   :  { %v4956_v35 = vmax.f32 %v4952_v3, 0.0  ;;  %v4954_v22 = vadd.f32 %v4948_v59, %v4937_v30 }
 0x944   :  { %v4957_v27 = vmax.f32 %v4953_v34, 0.0 }
 0x945   :  { %v7666_v36 = vpack.c.bf16 %v4956_v35, %v4955_v33  ;;  %v4958_v6 = vmax.f32 %v4954_v22, 0.0  ;;  %v8556_v22 = vld [vmem:[#allocation7 + $0x24] ss:$8 sps:$4 sm:$0xff]  }
 0x946   :  { %v4959_v37 = vpack.c.bf16 %v4957_v27, %v4955_v33  ;;  %v8553_v33 = vld [vmem:[#allocation7 + $0x14] ss:$8 sps:$4 sm:$0xff]  }
 0x947   :  { %4971 = vst [vmem:[#allocation11] sm:$0xff] %v7666_v36  ;;  %v7667_v38 = vpack.c.bf16 %v4958_v6, %v4957_v27  ;;  %v4960_v9 = vpack.c.bf16 %v4958_v6, %v4956_v35  ;;  %v8551_v35 = vld [vmem:[#allocation7 + $0x10] ss:$8 sps:$4 sm:$0xff]   ;;  %v8554_v27 = vld [vmem:[#allocation7 + $0x20] ss:$8 sps:$4 sm:$0xff]  }
 0x948   :  { %v8559_v36 = vld [vmem:[#allocation7 + $0x34] ss:$8 sps:$4 sm:$0xff]   ;;  %v8557_v6 = vld [vmem:[#allocation7 + $0x30] ss:$8 sps:$4 sm:$0xff]  }
 0x949   :  { %4972 = vst [vmem:[#allocation11 + $0x8] sm:$0xff] %v7667_v38  ;;  %4978 = vmatprep.subr.bf16.mxu1 %v4960_v9  ;;  %5541 = vmatprep.subr.bf16.mxu0 %v4960_v9  ;;  %v8560_v38 = vld [vmem:[#allocation7 + $0x40] ss:$8 sps:$4 sm:$0xff]  }
 0x94a   :  { %4979 = vmatpush1.bf16.msra.mxu1 %v4959_v37  ;;  %5542 = vmatpush1.bf16.msra.mxu0 %v4959_v37 }
 0x94b   :  { %5058 = vmatprep.subr.bf16.mxu1 %v4960_v9  ;;  %v8565_v9 = vld [vmem:[#allocation7 + $0x54] ss:$8 sps:$4 sm:$0xff]  }
 0x94d   :  { %7452 = vmatmul.mubr.msk.bf16.vlgmr.msra.gmra.mrb[96].mxu1 %vm4974_vm2, %v4973_v39  ;;  %7520 = vmatmul.mubr.msk.bf16.vlgmr.msra.gmra.mrb[64].mxu0 %vm4974_vm2, %v7519_v8  ;;  %v8563_v39 = vld [vmem:[#allocation7 + $0x50] ss:$8 sps:$4 sm:$0xff]   ;;  %v8568_v8 = vld [vmem:[#allocation7 + $0x64] ss:$8 sps:$4 sm:$0xff]  }
 0x94e   :  { %5059 = vmatpush1.bf16.msra.mxu1 %v4959_v37  ;;  %5090 = vmatprep.mubr.bf16.mxu1 %v8974_v0  ;;  %v8562_v37 = vld [vmem:[#allocation7 + $0x44] ss:$8 sps:$4 sm:$0xff]  }
 0x94f   :  { %5294 = vmatprep.subr.bf16.mxu1 %v8502_v42  ;;  %5904 = vmatprep.mubr.bf16.mxu0 %v8974_v0  ;;  %v8566_v42 = vld [vmem:[#allocation7 + $0x60] ss:$8 sps:$4 sm:$0xff]  }
 0x955   :  { %7454 = vmatmul.mubr.msk.bf16.vlgmr.msra.gmra.mrb[100].mxu1 %vm4974_vm2, %v7453_v12  ;;  %v8571_v12 = vld [vmem:[#allocation7 + $0x74] ss:$8 sps:$4 sm:$0xff]  }
 0x956   :  { %5295 = vmatpush1.bf16.msra.mxu1 %v8500_v48  ;;  %v8569_v48 = vld [vmem:[#allocation7 + $0x70] ss:$8 sps:$4 sm:$0xff]  }
 0x957   :  { %5296 = vmatprep.subr.bf16.mxu1 %v8505_v15  ;;  %v8574_v15 = vld [vmem:[#allocation7 + $0x84] ss:$8 sps:$4 sm:$0xff]  }
 0x95a   :  { %5297 = vmatpush1.bf16.msra.mxu1 %v8503_v50  ;;  %v8572_v50 = vld [vmem:[#allocation7 + $0x80] ss:$8 sps:$4 sm:$0xff]  }
 0x95b   :  { %5298 = vmatprep.subr.bf16.mxu1 %v8508_v54  ;;  %v8577_v54 = vld [vmem:[#allocation7 + $0x94] ss:$8 sps:$4 sm:$0xff]  }
 0x95e   :  { %5299 = vmatpush1.bf16.msra.mxu1 %v8506_v49  ;;  %v8575_v49 = vld [vmem:[#allocation7 + $0x90] ss:$8 sps:$4 sm:$0xff]  }
 0x95f   :  { %5300 = vmatprep.subr.bf16.mxu1 %v8511_v24  ;;  %v8580_v24 = vld [vmem:[#allocation7 + $0xa4] ss:$8 sps:$4 sm:$0xff]  }
 0x962   :  { %5301 = vmatpush1.bf16.msra.mxu1 %v8509_v52  ;;  %v8578_v52 = vld [vmem:[#allocation7 + $0xa0] ss:$8 sps:$4 sm:$0xff]  }
 0x963   :  { %5302 = vmatprep.subr.bf16.mxu1 %v8514_v16  ;;  %v8583_v16 = vld [vmem:[#allocation7 + $0xb4] ss:$8 sps:$4 sm:$0xff]  }
 0x966   :  { %5303 = vmatpush1.bf16.msra.mxu1 %v8512_v55  ;;  %v8581_v55 = vld [vmem:[#allocation7 + $0xb0] ss:$8 sps:$4 sm:$0xff]  }
 0x967   :  { %5304 = vmatprep.subr.bf16.mxu1 %v8517_v56  ;;  %v8586_v56 = vld [vmem:[#allocation7 + $0xc4] ss:$8 sps:$4 sm:$0xff]  }
 0x96a   :  { %5305 = vmatpush1.bf16.msra.mxu1 %v8515_v53  ;;  %v8584_v53 = vld [vmem:[#allocation7 + $0xc0] ss:$8 sps:$4 sm:$0xff]  }
 0x96b   :  { %5306 = vmatprep.subr.bf16.mxu1 %v8520_v4  ;;  %v8589_v4 = vld [vmem:[#allocation7 + $0xd4] ss:$8 sps:$4 sm:$0xff]  }
 0x96e   :  { %5307 = vmatpush1.bf16.msra.mxu1 %v8518_v23  ;;  %v8587_v23 = vld [vmem:[#allocation7 + $0xd0] ss:$8 sps:$4 sm:$0xff]  }
 0x96f   :  { %5308 = vmatprep.subr.bf16.mxu1 %v8523_v40  ;;  %v8592_v40 = vld [vmem:[#allocation7 + $0xe4] ss:$8 sps:$4 sm:$0xff]  }
 0x972   :  { %5309 = vmatpush1.bf16.msra.mxu1 %v8521_v25  ;;  %v8590_v25 = vld [vmem:[#allocation7 + $0xe0] ss:$8 sps:$4 sm:$0xff]  }
 0x973   :  { %5310 = vmatprep.subr.bf16.mxu1 %v8526_v10  ;;  %v8595_v10 = vld [vmem:[#allocation7 + $0xf4] ss:$8 sps:$4 sm:$0xff]  }
 0x976   :  { %5311 = vmatpush1.bf16.msra.mxu1 %v8524_v60  ;;  %v8593_v60 = vld [vmem:[#allocation7 + $0xf0] ss:$8 sps:$4 sm:$0xff]  }
 0x977   :  { %5312 = vmatprep.subr.bf16.mxu1 %v8529_v44  ;;  %v8598_v44 = vld [vmem:[#allocation7 + $0x204] ss:$8 sps:$4 sm:$0xff]  }
 0x97a   :  { %5313 = vmatpush1.bf16.msra.mxu1 %v8527_v17  ;;  %v8596_v17 = vld [vmem:[#allocation7 + $0x200] ss:$8 sps:$4 sm:$0xff]  }
 0x97b   :  { %5314 = vmatprep.subr.bf16.mxu1 %v8532_v2 }
 0x97e   :  { %5315 = vmatpush1.bf16.msra.mxu1 %v8530_v51 }
 0x97f   :  { %5316 = vmatprep.subr.bf16.mxu1 %v8535_v1  ;;  %v8601_v1 = vld [vmem:[#allocation7 + $0x214] ss:$8 sps:$4 sm:$0xff]  }
 0x982   :  { %5317 = vmatpush1.bf16.msra.mxu1 %v8533_v57  ;;  %v8599_v57 = vld [vmem:[#allocation7 + $0x210] ss:$8 sps:$4 sm:$0xff]  }
 0x983   :  { %5318 = vmatprep.subr.bf16.mxu1 %v8538_v58  ;;  %v8604_v58 = vld [vmem:[#allocation7 + $0x224] ss:$8 sps:$4 sm:$0xff]  }
 0x986   :  { %5319 = vmatpush1.bf16.msra.mxu1 %v8536_v47  ;;  %v8602_v47 = vld [vmem:[#allocation7 + $0x220] ss:$8 sps:$4 sm:$0xff]  }
 0x987   :  { %5320 = vmatprep.subr.bf16.mxu1 %v8541_v61  ;;  %v8607_v61 = vld [vmem:[#allocation7 + $0x234] ss:$8 sps:$4 sm:$0xff]  }
 0x98a   :  { %5321 = vmatpush1.bf16.msra.mxu1 %v8539_v19  ;;  %v8605_v19 = vld [vmem:[#allocation7 + $0x230] ss:$8 sps:$4 sm:$0xff]  }
 0x98b   :  { %5322 = vmatprep.subr.bf16.mxu1 %v8544_v62  ;;  %v8610_v62 = vld [vmem:[#allocation7 + $0x244] ss:$8 sps:$4 sm:$0xff]  }
 0x98e   :  { %5323 = vmatpush1.bf16.msra.mxu1 %v8542_v26  ;;  %v8608_v26 = vld [vmem:[#allocation7 + $0x240] ss:$8 sps:$4 sm:$0xff]  }
 0x98f   :  { %5324 = vmatprep.subr.bf16.mxu1 %v8547_v43  ;;  %v8613_v43 = vld [vmem:[#allocation7 + $0x254] ss:$8 sps:$4 sm:$0xff]  }
 0x992   :  { %5325 = vmatpush1.bf16.msra.mxu1 %v8545_v7  ;;  %v8611_v7 = vld [vmem:[#allocation7 + $0x250] ss:$8 sps:$4 sm:$0xff]  }
 0x993   :  { %5495 = vmatprep.subr.bf16.mxu1 %v8550_v21  ;;  %v8616_v21 = vld [vmem:[#allocation7 + $0x264] ss:$8 sps:$4 sm:$0xff]  }
 0xa20   :  { %v10180_v13 = vpop.f32.mrb[96].mxu1  ;;  %v10182_v41 = vpop.f32.mrb[64].mxu0 }
 0xa21   :  { %v5014_v45 = vpop.f32.mrb[97].mxu1  ;;  %v10184_v59 = vpop.f32.mrb[65].mxu0  ;;  %v5019_v51 = vpack.c.bf16 %v10180_v13, %v10180_v13  ;;  %v8614_v13 = vld [vmem:[#allocation7 + $0x260] ss:$8 sps:$4 sm:$0xff]  }
 0xa22   :  { %v5016_v32 = vpop.f32.mrb[98].mxu1  ;;  %v5579_v29 = vpop.f32.mrb[66].mxu0  ;;  %v5020_v34 = vpack.c.bf16 %v5014_v45, %v5014_v45  ;;  %v5583_v2 = vpack.c.bf16 %v10184_v59, %v10184_v59  ;;  %v8619_v45 = vld [vmem:[#allocation7 + $0x274] ss:$8 sps:$4 sm:$0xff]   ;;  %v8620_v59 = vld [vmem:[#allocation7 + $0x280] ss:$8 sps:$4 sm:$0xff]  }
 0xa23   :  { %v5017_v46 = vpop.f32.mrb[99].mxu1  ;;  %v5580_v18 = vpop.f32.mrb[67].mxu0  ;;  %v8617_v32 = vld [vmem:[#allocation7 + $0x270] ss:$8 sps:$4 sm:$0xff]   ;;  %v8625_v29 = vld [vmem:[#allocation7 + $0x294] ss:$8 sps:$4 sm:$0xff]  }
 0xa24   :  { %v8622_v46 = vld [vmem:[#allocation7 + $0x284] ss:$8 sps:$4 sm:$0xff]   ;;  %v8623_v18 = vld [vmem:[#allocation7 + $0x290] ss:$8 sps:$4 sm:$0xff]  }
 0xa28   :  { %v5092_v20 = vpop.f32.mrb[100].mxu1 }
 0xa29   :  { %v5094_v63 = vpop.f32.mrb[101].mxu1  ;;  %v5099_v3 = vpack.c.bf16 %v5092_v20, %v5092_v20  ;;  %v8628_v20 = vld [vmem:[#allocation7 + $0x2a4] ss:$8 sps:$4 sm:$0xff]  }
 0xa2a   :  { %v5100_v28 = vpack.c.bf16 %v5094_v63, %v5094_v63  ;;  %v5096_v5 = vpop.f32.mrb[102].mxu1  ;;  %v8626_v63 = vld [vmem:[#allocation7 + $0x2a0] ss:$8 sps:$4 sm:$0xff]  }
 0xa2b   :  { %v5097_v30 = vpop.f32.mrb[103].mxu1  ;;  %v8629_v5 = vld [vmem:[#allocation7 + $0x2b0] ss:$8 sps:$4 sm:$0xff]  }
 0xa2c   :  { %5326 = vmatprep.mubr.bf16.mxu1 %v5100_v28  ;;  %v8631_v28 = vld [vmem:[#allocation7 + $0x2b4] ss:$8 sps:$4 sm:$0xff]  }
 0xa2d   :  { %5327 = vmatmul.mubr.bf16.vlgmr.msra.gmra.mrb[104].mxu1 %v5099_v3  ;;  %v8632_v3 = vld [vmem:[#allocation7 + $0x2c0] ss:$8 sps:$4 sm:$0xff]   ;;  %v8637_v30 = vld [vmem:[#allocation7 + $0x2d4] ss:$8 sps:$4 sm:$0xff]  }
 0xa2e   :  { %5496 = vmatpush1.bf16.msra.mxu1 %v8548_v31  ;;  %5527 = vmatprep.mubr.bf16.mxu1 %v5020_v34  ;;  %v8634_v31 = vld [vmem:[#allocation7 + $0x2c4] ss:$8 sps:$4 sm:$0xff]  }
 0xa2f   :  { %5497 = vmatprep.subr.bf16.mxu1 %v8553_v33  ;;  %v8635_v33 = vld [vmem:[#allocation7 + $0x2d0] ss:$8 sps:$4 sm:$0xff]   ;;  %v8640_v34 = vld [vmem:[#allocation7 + $0x2e4] ss:$8 sps:$4 sm:$0xff]  }
 0xa32   :  { %5498 = vmatpush1.bf16.msra.mxu1 %v8551_v35  ;;  %v8638_v35 = vld [vmem:[#allocation7 + $0x2e0] ss:$8 sps:$4 sm:$0xff]  }
 0xa33   :  { %5499 = vmatprep.subr.bf16.mxu1 %v8556_v22  ;;  %v8643_v22 = vld [vmem:[#allocation7 + $0x2f4] ss:$8 sps:$4 sm:$0xff]  }
 0xa36   :  { %5500 = vmatpush1.bf16.msra.mxu1 %v8554_v27  ;;  %v8641_v27 = vld [vmem:[#allocation7 + $0x2f0] ss:$8 sps:$4 sm:$0xff]  }
 0xa37   :  { %5501 = vmatprep.subr.bf16.mxu1 %v8559_v36  ;;  %v5582_v36 = vpack.c.bf16 %v10182_v41, %v10182_v41 }
 0xa3a   :  { %5502 = vmatpush1.bf16.msra.mxu1 %v8557_v6  ;;  %v5820_v6 = vld [vmem:[%s10292_s12] ss:$2 sm:$0x3] }
 0xa3b   :  { %5503 = vmatprep.subr.bf16.mxu1 %v8562_v37  ;;  %v7553_v37 = vld [vmem:[%s10292_s12 + $0x1] ss:$2 sm:$0x3] }
 0xa3c   :  { %v5844_v41 = vrot.slane %v7553_v37, %v9791_v14 }
 0xa3e   :  { %5504 = vmatpush1.bf16.msra.mxu1 %v8560_v38  ;;  %v5825_v38 = vrot.slane %v5820_v6, %v9786_v11 }
 0xa3f   :  { %5505 = vmatprep.subr.bf16.mxu1 %v8565_v9  ;;  %v5829_v9 = vrot.slane %v5820_v6, %v9791_v14 }
 0xa42   :  { %5506 = vmatpush1.bf16.msra.mxu1 %v8563_v39  ;;  %v5840_v39 = vrot.slane %v7553_v37, %v9786_v11 }
 0xa43   :  { %5507 = vmatprep.subr.bf16.mxu1 %v8568_v8 }
 0xa46   :  { %5508 = vmatpush1.bf16.msra.mxu1 %v8566_v42 }
 0xa47   :  { %5509 = vmatprep.subr.bf16.mxu1 %v8571_v12 }
 0xa4a   :  { %5510 = vmatpush1.bf16.msra.mxu1 %v8569_v48 }
 0xa4b   :  { %5511 = vmatprep.subr.bf16.mxu1 %v8574_v15 }
 0xa4e   :  { %5512 = vmatpush1.bf16.msra.mxu1 %v8572_v50 }
 0xa4f   :  { %5513 = vmatprep.subr.bf16.mxu1 %v8577_v54 }
 0xa52   :  { %5514 = vmatpush1.bf16.msra.mxu1 %v8575_v49 }
 0xa53   :  { %5515 = vmatprep.subr.bf16.mxu1 %v8580_v24 }
 0xa56   :  { %5516 = vmatpush1.bf16.msra.mxu1 %v8578_v52 }
 0xa57   :  { %5517 = vmatprep.subr.bf16.mxu1 %v8583_v16 }
 0xa5a   :  { %5518 = vmatpush1.bf16.msra.mxu1 %v8581_v55 }
 0xa5b   :  { %5519 = vmatprep.subr.bf16.mxu1 %v8586_v56 }
 0xa5e   :  { %5520 = vmatpush1.bf16.msra.mxu1 %v8584_v53 }
 0xa5f   :  { %5521 = vmatprep.subr.bf16.mxu1 %v8589_v4  ;;  %v5860_v4 = vld [vmem:[%s10293_s13] sm:$0x3] }
 0xa62   :  { %5522 = vmatpush1.bf16.msra.mxu1 %v8587_v23  ;;  %v7624_v23 = vld [vmem:[%s10293_s13 + $0x4] sm:$0x3] }
 0xa63   :  { %5523 = vmatprep.subr.bf16.mxu1 %v8592_v40  ;;  %v8646_v40 = vld [vmem:[#allocation8 + $0x104] ss:$8 sps:$4 sm:$0xff]  }
 0xa66   :  { %5524 = vmatpush1.bf16.msra.mxu1 %v8590_v25  ;;  %v7557_v25 = vld [vmem:[%s10293_s13 + $0x2] sm:$0x3]  ;;  %s8975_s13 = smov [#allocation11]  }
 0xa67   :  { %5525 = vmatprep.subr.bf16.mxu1 %v8595_v10  ;;  %v8644_v10 = vld [vmem:[#allocation8 + $0x100] ss:$8 sps:$4 sm:$0xff]   ;;  %s6776_s30 = sshll.u32 %s8975_s13, 4  ;;  %s6777_s30 = int_to_ptr.vmem [resolvable:$true] %s6776_s30 }
 0xa68   :  { %s8892_s7 = scalar_lea.vmem %s6777_s30, 256  ;;  %p8897_p5 = scmp.lt.s32.totalorder %s6777_s30, %s6777_s30 }
 0xa69   :  { %p8893_p4 = scmp.ne.s32.totalorder %s6777_s30, %s8892_s7  ;;  %p8898_p6 = scmp.lt.s32.totalorder %s8892_s7, %s8892_s7 }
 0xa6a   :  { %5526 = vmatpush1.bf16.msra.mxu1 %v8593_v60  ;;  %v8649_v60 = vld [vmem:[#allocation8 + $0x114] ss:$8 sps:$4 sm:$0xff]  }
 0xa6b   :  { %5777 = vmatprep.subr.bf16.mxu1 %v8598_v44  ;;  %v8647_v44 = vld [vmem:[#allocation8 + $0x110] ss:$8 sps:$4 sm:$0xff]   ;;  %p8899_p7 = por %p8898_p6, %p8897_p5 }
 0xa6d   :  { %5528 = vmatmul.mubr.bf16.vlgmr.msra.gmra.mrb[104].mxu1 %v5019_v51  ;;  %v8655_v51 = vld [vmem:[#allocation8 + $0x134] ss:$8 sps:$4 sm:$0xff]   ;;  %p8900_p8 = pnand %p8899_p7, %p8893_p4 }
 0xa6e   :  { %5778 = vmatpush1.bf16.msra.mxu1 %v8596_v17  ;;  %5809 = vmatprep.mubr.bf16.mxu1 %v5583_v2  ;;  %v8652_v17 = vld [vmem:[#allocation8 + $0x124] ss:$8 sps:$4 sm:$0xff]   ;;  %v8650_v2 = vld [vmem:[#allocation8 + $0x120] ss:$8 sps:$4 sm:$0xff]  }
 0xa6f   :  { %5779 = vmatprep.subr.bf16.mxu1 %v8601_v1  ;;  %v8653_v1 = vld [vmem:[#allocation8 + $0x130] ss:$8 sps:$4 sm:$0xff]  }
 0xa72   :  { %5780 = vmatpush1.bf16.msra.mxu1 %v8599_v57  ;;  %v8656_v57 = vld [vmem:[#allocation8 + $0x140] ss:$8 sps:$4 sm:$0xff]  }
 0xa73   :  { %5781 = vmatprep.subr.bf16.mxu1 %v8604_v58  ;;  %v8661_v58 = vld [vmem:[#allocation8 + $0x154] ss:$8 sps:$4 sm:$0xff]  }
 0xa76   :  { %5782 = vmatpush1.bf16.msra.mxu1 %v8602_v47  ;;  %v8659_v47 = vld [vmem:[#allocation8 + $0x150] ss:$8 sps:$4 sm:$0xff]  }
 0xa77   :  { %5783 = vmatprep.subr.bf16.mxu1 %v8607_v61  ;;  %v8664_v61 = vld [vmem:[#allocation8 + $0x164] ss:$8 sps:$4 sm:$0xff]  }
 0xa7a   :  { %5784 = vmatpush1.bf16.msra.mxu1 %v8605_v19  ;;  %v8662_v19 = vld [vmem:[#allocation8 + $0x160] ss:$8 sps:$4 sm:$0xff]  }
 0xa7b   :  { %5785 = vmatprep.subr.bf16.mxu1 %v8610_v62  ;;  %v8667_v62 = vld [vmem:[#allocation8 + $0x174] ss:$8 sps:$4 sm:$0xff]  }
 0xa7e   :  { %5786 = vmatpush1.bf16.msra.mxu1 %v8608_v26  ;;  %v8665_v26 = vld [vmem:[#allocation8 + $0x170] ss:$8 sps:$4 sm:$0xff]  }
 0xa7f   :  { %5787 = vmatprep.subr.bf16.mxu1 %v8613_v43  ;;  %v8670_v43 = vld [vmem:[#allocation8 + $0x184] ss:$8 sps:$4 sm:$0xff]  }
 0xa82   :  { %5788 = vmatpush1.bf16.msra.mxu1 %v8611_v7  ;;  %v8668_v7 = vld [vmem:[#allocation8 + $0x180] ss:$8 sps:$4 sm:$0xff]  }
 0xa83   :  { %5789 = vmatprep.subr.bf16.mxu1 %v8616_v21  ;;  %v8673_v21 = vld [vmem:[#allocation8 + $0x194] ss:$8 sps:$4 sm:$0xff]  }
 0xa86   :  { %5790 = vmatpush1.bf16.msra.mxu1 %v8614_v13  ;;  %v8671_v13 = vld [vmem:[#allocation8 + $0x190] ss:$8 sps:$4 sm:$0xff]  }
 0xa87   :  { %5791 = vmatprep.subr.bf16.mxu1 %v8619_v45  ;;  %v8676_v45 = vld [vmem:[#allocation8 + $0x1a4] ss:$8 sps:$4 sm:$0xff]  }
 0xa8a   :  { %5792 = vmatpush1.bf16.msra.mxu1 %v8617_v32  ;;  %v8674_v32 = vld [vmem:[#allocation8 + $0x1a0] ss:$8 sps:$4 sm:$0xff]  }
 0xa8b   :  { %5793 = vmatprep.subr.bf16.mxu1 %v8622_v46  ;;  %v8679_v46 = vld [vmem:[#allocation8 + $0x1b4] ss:$8 sps:$4 sm:$0xff]  }
 0xa8e   :  { %5794 = vmatpush1.bf16.msra.mxu1 %v8620_v59  ;;  %v8677_v59 = vld [vmem:[#allocation8 + $0x1b0] ss:$8 sps:$4 sm:$0xff]  }
 0xa8f   :  { %5795 = vmatprep.subr.bf16.mxu1 %v8625_v29  ;;  %v8682_v29 = vld [vmem:[#allocation8 + $0x1c4] ss:$8 sps:$4 sm:$0xff]  }
 0xa92   :  { %5796 = vmatpush1.bf16.msra.mxu1 %v8623_v18  ;;  %v8680_v18 = vld [vmem:[#allocation8 + $0x1c0] ss:$8 sps:$4 sm:$0xff]  }
 0xa93   :  { %5797 = vmatprep.subr.bf16.mxu1 %v8628_v20  ;;  %v8685_v20 = vld [vmem:[#allocation8 + $0x1d4] ss:$8 sps:$4 sm:$0xff]  }
 0xa96   :  { %5798 = vmatpush1.bf16.msra.mxu1 %v8626_v63  ;;  %v8683_v63 = vld [vmem:[#allocation8 + $0x1d0] ss:$8 sps:$4 sm:$0xff]  }
 0xa97   :  { %5799 = vmatprep.subr.bf16.mxu1 %v8631_v28  ;;  %v8686_v28 = vld [vmem:[#allocation8 + $0x1e0] ss:$8 sps:$4 sm:$0xff]  }
 0xa9a   :  { %5800 = vmatpush1.bf16.msra.mxu1 %v8629_v5  ;;  %v8688_v5 = vld [vmem:[#allocation8 + $0x1e4] ss:$8 sps:$4 sm:$0xff]  }
 0xa9b   :  { %5801 = vmatprep.subr.bf16.mxu1 %v8634_v31  ;;  %v8691_v31 = vld [vmem:[#allocation8 + $0x1f4] ss:$8 sps:$4 sm:$0xff]  }
 0xa9e   :  { %5802 = vmatpush1.bf16.msra.mxu1 %v8632_v3  ;;  %v8689_v3 = vld [vmem:[#allocation8 + $0x1f0] ss:$8 sps:$4 sm:$0xff]  }
 0xa9f   :  { %5803 = vmatprep.subr.bf16.mxu1 %v8637_v30  ;;  %v8694_v30 = vld [vmem:[#allocation8 + $0x4] ss:$8 sps:$4 sm:$0xff]  }
 0xaa2   :  { %5804 = vmatpush1.bf16.msra.mxu1 %v8635_v33 }
 0xaa3   :  { %5805 = vmatprep.subr.bf16.mxu1 %v8640_v34 }
 0xaa6   :  { %5806 = vmatpush1.bf16.msra.mxu1 %v8638_v35 }
 0xaa7   :  { %5807 = vmatprep.subr.bf16.mxu1 %v8643_v22 }
 0xaaa   :  { %5808 = vmatpush1.bf16.msra.mxu1 %v8641_v27 }
 0xaad   :  { %5810 = vmatmul.mubr.bf16.vlgmr.msra.gmra.mrb[104].mxu1 %v5582_v36 }
 0xaae   :  { %6467 = vmatprep.mubr.bf16.mxu1 %v8974_v0 }
 0xb80   :  { %v5811_v8 = vpop.f32.mrb[104].mxu1 }
 0xb81   :  { %v5832_v42 = vmul.f32 %v5825_v38, %v5811_v8  ;;  %v5813_v12 = vpop.f32.mrb[105].mxu1 }
 0xb82   :  { %v5833_v48 = vmul.f32 %v5829_v9, %v5813_v12  ;;  %v5815_v15 = vpop.f32.mrb[106].mxu1 }
 0xb83   :  { %v5847_v50 = vadd.f32 %v5840_v39, %v5832_v42  ;;  %v5816_v54 = vpop.f32.mrb[107].mxu1 }
 0xb84   :  { %v5848_v49 = vadd.f32 %v5844_v41, %v5833_v48  ;;  %v8692_v41 = vld [vmem:[#allocation8] ss:$8 sps:$4 sm:$0xff]   ;;  %v8697_v48 = vld [vmem:[#allocation8 + $0x14] ss:$8 sps:$4 sm:$0xff]   ;;  %v8700_v54 = vld [vmem:[#allocation8 + $0x24] ss:$8 sps:$4 sm:$0xff]  }
 0xb85   :  { %v5849_v24 = vmax.f32 %v5847_v50, 0.0  ;;  %v8695_v50 = vld [vmem:[#allocation8 + $0x10] ss:$8 sps:$4 sm:$0xff]  }
 0xb86   :  { %v5850_v52 = vmax.f32 %v5848_v49, 0.0  ;;  %v8698_v49 = vld [vmem:[#allocation8 + $0x20] ss:$8 sps:$4 sm:$0xff]  }
 0xb87   :  { %v5851_v16 = vpack.c.bf16 %v5849_v24, %v5849_v24 }
 0xb88   :  { %v5852_v55 = vpack.c.bf16 %v5850_v52, %v5850_v52  ;;  %v7668_v56 = vpack.c.bf16 %v5850_v52, %v5849_v24  ;;  %v8703_v24 = vld [vmem:[#allocation8 + $0x34] ss:$8 sps:$4 sm:$0xff]   ;;  %v8701_v52 = vld [vmem:[#allocation8 + $0x30] ss:$8 sps:$4 sm:$0xff]  }
 0xb89   :  { %v5867_v53 = vsel %vm5865_vm3, %v5851_v16, 0  ;;  %v8706_v16 = vld [vmem:[#allocation8 + $0x44] ss:$8 sps:$4 sm:$0xff]  }
 0xb8a   :  { %5859 = vst [vmem:[#allocation13] sm:$0xff] %v7668_v56  ;;  %7555 = vmatprep.subr.msk.bf16.mxu0 %vm5865_vm3, %v5852_v55  ;;  %7625 = vmatprep.subr.msk.bf16.mxu1 %vm5865_vm3, %v5852_v55  ;;  %v8709_v56 = vld [vmem:[#allocation8 + $0x54] ss:$8 sps:$4 sm:$0xff]  }
 0xb8b   :  { %5873 = vmatpush1.bf16.msra.mxu0 %v5867_v53  ;;  %6436 = vmatpush1.bf16.msra.mxu1 %v5867_v53 }
 0xb8c   :  { %7558 = vmatprep.subr.msk.bf16.mxu0 %vm5865_vm3, %v5852_v55  ;;  %v8704_v55 = vld [vmem:[#allocation8 + $0x40] ss:$8 sps:$4 sm:$0xff]  }
 0xb8e   :  { %7556 = vmatmul.mubr.msk.bf16.vlgmr.msra.gmra.mrb[68].mxu0 %vm5861_vm4, %v5860_v4  ;;  %7626 = vmatmul.mubr.msk.bf16.vlgmr.msra.gmra.mrb[108].mxu1 %vm5861_vm4, %v7624_v23  ;;  %v8712_v4 = vld [vmem:[#allocation8 + $0x64] ss:$8 sps:$4 sm:$0xff]   ;;  %v8710_v23 = vld [vmem:[#allocation8 + $0x60] ss:$8 sps:$4 sm:$0xff]  }
 0xb8f   :  { %5953 = vmatpush1.bf16.msra.mxu0 %v5867_v53  ;;  %5984 = vmatprep.mubr.bf16.mxu0 %v8974_v0  ;;  %v8658_v0 = vld [vmem:[#allocation8 + $0x144] ss:$8 sps:$4 sm:$0xff]   ;;  %v8707_v53 = vld [vmem:[#allocation8 + $0x50] ss:$8 sps:$4 sm:$0xff]  }
 0xb90   :  { %6188 = vmatprep.subr.bf16.mxu0 %v8646_v40  ;;  %v8715_v40 = vld [vmem:[#allocation8 + $0x74] ss:$8 sps:$4 sm:$0xff]  }
 0xb96   :  { %7559 = vmatmul.mubr.msk.bf16.vlgmr.msra.gmra.mrb[72].mxu0 %vm5861_vm4, %v7557_v25  ;;  %v8713_v25 = vld [vmem:[#allocation8 + $0x70] ss:$8 sps:$4 sm:$0xff]  }
 0xb97   :  { %6189 = vmatpush1.bf16.msra.mxu0 %v8644_v10  ;;  %v8718_v10 = vld [vmem:[#allocation8 + $0x84] ss:$8 sps:$4 sm:$0xff]  }
 0xb98   :  { %6190 = vmatprep.subr.bf16.mxu0 %v8649_v60  ;;  %v8716_v60 = vld [vmem:[#allocation8 + $0x80] ss:$8 sps:$4 sm:$0xff]  }
 0xb9b   :  { %6191 = vmatpush1.bf16.msra.mxu0 %v8647_v44  ;;  %v8721_v44 = vld [vmem:[#allocation8 + $0x94] ss:$8 sps:$4 sm:$0xff]  }
 0xb9c   :  { %6192 = vmatprep.subr.bf16.mxu0 %v8652_v17  ;;  %v8719_v17 = vld [vmem:[#allocation8 + $0x90] ss:$8 sps:$4 sm:$0xff]  }
 0xb9f   :  { %6193 = vmatpush1.bf16.msra.mxu0 %v8650_v2  ;;  %v8724_v2 = vld [vmem:[#allocation8 + $0xa4] ss:$8 sps:$4 sm:$0xff]  }
 0xba0   :  { %6194 = vmatprep.subr.bf16.mxu0 %v8655_v51  ;;  %v8722_v51 = vld [vmem:[#allocation8 + $0xa0] ss:$8 sps:$4 sm:$0xff]  }
 0xba3   :  { %6195 = vmatpush1.bf16.msra.mxu0 %v8653_v1  ;;  %v8727_v1 = vld [vmem:[#allocation8 + $0xb4] ss:$8 sps:$4 sm:$0xff]  }
 0xba4   :  { %6196 = vmatprep.subr.bf16.mxu0 %v8658_v0  ;;  %v8725_v0 = vld [vmem:[#allocation8 + $0xb0] ss:$8 sps:$4 sm:$0xff]  }
 0xba7   :  { %6197 = vmatpush1.bf16.msra.mxu0 %v8656_v57  ;;  %v8730_v57 = vld [vmem:[#allocation8 + $0xc4] ss:$8 sps:$4 sm:$0xff]  }
 0xba8   :  { %6198 = vmatprep.subr.bf16.mxu0 %v8661_v58  ;;  %v8728_v58 = vld [vmem:[#allocation8 + $0xc0] ss:$8 sps:$4 sm:$0xff]  }
 0xbab   :  { %6199 = vmatpush1.bf16.msra.mxu0 %v8659_v47  ;;  %v8733_v47 = vld [vmem:[#allocation8 + $0xd4] ss:$8 sps:$4 sm:$0xff]  }
 0xbac   :  { %6200 = vmatprep.subr.bf16.mxu0 %v8664_v61  ;;  %v8731_v61 = vld [vmem:[#allocation8 + $0xd0] ss:$8 sps:$4 sm:$0xff]  }
 0xbaf   :  { %6201 = vmatpush1.bf16.msra.mxu0 %v8662_v19  ;;  %v8736_v19 = vld [vmem:[#allocation8 + $0xe4] ss:$8 sps:$4 sm:$0xff]  }
 0xbb0   :  { %6202 = vmatprep.subr.bf16.mxu0 %v8667_v62  ;;  %v8734_v62 = vld [vmem:[#allocation8 + $0xe0] ss:$8 sps:$4 sm:$0xff]  }
 0xbb3   :  { %6203 = vmatpush1.bf16.msra.mxu0 %v8665_v26  ;;  %v8739_v26 = vld [vmem:[#allocation8 + $0xf4] ss:$8 sps:$4 sm:$0xff]  }
 0xbb4   :  { %6204 = vmatprep.subr.bf16.mxu0 %v8670_v43  ;;  %v8737_v43 = vld [vmem:[#allocation8 + $0xf0] ss:$8 sps:$4 sm:$0xff]  }
 0xbb7   :  { %6205 = vmatpush1.bf16.msra.mxu0 %v8668_v7  ;;  %v8742_v7 = vld [vmem:[#allocation8 + $0x204] ss:$8 sps:$4 sm:$0xff]  }
 0xbb8   :  { %6206 = vmatprep.subr.bf16.mxu0 %v8673_v21  ;;  %v8740_v21 = vld [vmem:[#allocation8 + $0x200] ss:$8 sps:$4 sm:$0xff]  }
 0xbbb   :  { %6207 = vmatpush1.bf16.msra.mxu0 %v8671_v13 }
 0xbbc   :  { %6208 = vmatprep.subr.bf16.mxu0 %v8676_v45 }
 0xbbf   :  { %6209 = vmatpush1.bf16.msra.mxu0 %v8674_v32  ;;  %v8745_v32 = vld [vmem:[#allocation8 + $0x214] ss:$8 sps:$4 sm:$0xff]  }
 0xbc0   :  { %6210 = vmatprep.subr.bf16.mxu0 %v8679_v46  ;;  %v8743_v46 = vld [vmem:[#allocation8 + $0x210] ss:$8 sps:$4 sm:$0xff]  }
 0xbc3   :  { %6211 = vmatpush1.bf16.msra.mxu0 %v8677_v59  ;;  %v8748_v59 = vld [vmem:[#allocation8 + $0x224] ss:$8 sps:$4 sm:$0xff]  }
 0xbc4   :  { %6212 = vmatprep.subr.bf16.mxu0 %v8682_v29  ;;  %v8746_v29 = vld [vmem:[#allocation8 + $0x220] ss:$8 sps:$4 sm:$0xff]  }
 0xbc7   :  { %6213 = vmatpush1.bf16.msra.mxu0 %v8680_v18  ;;  %v8751_v18 = vld [vmem:[#allocation8 + $0x234] ss:$8 sps:$4 sm:$0xff]  }
 0xbc8   :  { %6214 = vmatprep.subr.bf16.mxu0 %v8685_v20  ;;  %v8749_v20 = vld [vmem:[#allocation8 + $0x230] ss:$8 sps:$4 sm:$0xff]  }
 0xbcb   :  { %6215 = vmatpush1.bf16.msra.mxu0 %v8683_v63  ;;  %v8754_v63 = vld [vmem:[#allocation8 + $0x244] ss:$8 sps:$4 sm:$0xff]  }
 0xbcc   :  { %6216 = vmatprep.subr.bf16.mxu0 %v8688_v5  ;;  %v8757_v5 = vld [vmem:[#allocation8 + $0x254] ss:$8 sps:$4 sm:$0xff]  }
 0xbcf   :  { %6217 = vmatpush1.bf16.msra.mxu0 %v8686_v28  ;;  %v8752_v28 = vld [vmem:[#allocation8 + $0x240] ss:$8 sps:$4 sm:$0xff]  }
 0xbd0   :  { %6218 = vmatprep.subr.bf16.mxu0 %v8691_v31  ;;  %v8755_v31 = vld [vmem:[#allocation8 + $0x250] ss:$8 sps:$4 sm:$0xff]  }
 0xbd3   :  { %6219 = vmatpush1.bf16.msra.mxu0 %v8689_v3  ;;  %v8760_v3 = vld [vmem:[#allocation8 + $0x264] ss:$8 sps:$4 sm:$0xff]  }
 0xbd4   :  { %6389 = vmatprep.subr.bf16.mxu0 %v8694_v30  ;;  %v8758_v30 = vld [vmem:[#allocation8 + $0x260] ss:$8 sps:$4 sm:$0xff]  }
 0xc61   :  { %v10213_v33 = vpop.f32.mrb[68].mxu0  ;;  %v10215_v27 = vpop.f32.mrb[108].mxu1 }
 0xc62   :  { %v5908_v34 = vpop.f32.mrb[69].mxu0  ;;  %v10217_v36 = vpop.f32.mrb[109].mxu1  ;;  %v5913_v45 = vpack.c.bf16 %v10213_v33, %v10213_v33  ;;  %v8763_v33 = vld [vmem:[#allocation8 + $0x274] ss:$8 sps:$4 sm:$0xff]  }
 0xc63   :  { %v5910_v35 = vpop.f32.mrb[70].mxu0  ;;  %v6473_v6 = vpop.f32.mrb[110].mxu1  ;;  %v5914_v15 = vpack.c.bf16 %v5908_v34, %v5908_v34  ;;  %v6477_v13 = vpack.c.bf16 %v10217_v36, %v10217_v36  ;;  %v8761_v34 = vld [vmem:[#allocation8 + $0x270] ss:$8 sps:$4 sm:$0xff]   ;;  %v8769_v36 = vld [vmem:[#allocation8 + $0x294] ss:$8 sps:$4 sm:$0xff]  }
 0xc64   :  { %v5911_v22 = vpop.f32.mrb[71].mxu0  ;;  %v6474_v38 = vpop.f32.mrb[111].mxu1  ;;  %v8766_v35 = vld [vmem:[#allocation8 + $0x284] ss:$8 sps:$4 sm:$0xff]   ;;  %v8767_v6 = vld [vmem:[#allocation8 + $0x290] ss:$8 sps:$4 sm:$0xff]  }
 0xc65   :  { %v8764_v22 = vld [vmem:[#allocation8 + $0x280] ss:$8 sps:$4 sm:$0xff]  }
 0xc66   :  { %v8770_v38 = vld [vmem:[#allocation8 + $0x2a0] ss:$8 sps:$4 sm:$0xff]  }
 0xc69   :  { %v5986_v37 = vpop.f32.mrb[72].mxu0 }
 0xc6a   :  { %v5988_v9 = vpop.f32.mrb[73].mxu0  ;;  %v5993_v42 = vpack.c.bf16 %v5986_v37, %v5986_v37  ;;  %v8772_v37 = vld [vmem:[#allocation8 + $0x2a4] ss:$8 sps:$4 sm:$0xff]  }
 0xc6b   :  { %v5994_v39 = vpack.c.bf16 %v5988_v9, %v5988_v9  ;;  %v5990_v8 = vpop.f32.mrb[74].mxu0  ;;  %v8775_v9 = vld [vmem:[#allocation8 + $0x2b4] ss:$8 sps:$4 sm:$0xff]  }
 0xc6c   :  { %v5991_v12 = vpop.f32.mrb[75].mxu0  ;;  %v8778_v8 = vld [vmem:[#allocation8 + $0x2c4] ss:$8 sps:$4 sm:$0xff]  }
 0xc6d   :  { %6220 = vmatprep.mubr.bf16.mxu0 %v5994_v39  ;;  %v8773_v39 = vld [vmem:[#allocation8 + $0x2b0] ss:$8 sps:$4 sm:$0xff]  }
 0xc6e   :  { %6221 = vmatmul.mubr.bf16.vlgmr.msra.gmra.mrb[76].mxu0 %v5993_v42  ;;  %v8781_v42 = vld [vmem:[#allocation8 + $0x2d4] ss:$8 sps:$4 sm:$0xff]   ;;  %v8779_v12 = vld [vmem:[#allocation8 + $0x2d0] ss:$8 sps:$4 sm:$0xff]  }
 0xc6f   :  { %6390 = vmatpush1.bf16.msra.mxu0 %v8692_v41  ;;  %6421 = vmatprep.mubr.bf16.mxu0 %v5914_v15  ;;  %v8776_v41 = vld [vmem:[#allocation8 + $0x2c0] ss:$8 sps:$4 sm:$0xff]  }
 0xc70   :  { %6391 = vmatprep.subr.bf16.mxu0 %v8697_v48  ;;  %v8784_v48 = vld [vmem:[#allocation8 + $0x2e4] ss:$8 sps:$4 sm:$0xff]   ;;  %v8782_v15 = vld [vmem:[#allocation8 + $0x2e0] ss:$8 sps:$4 sm:$0xff]  }
 0xc73   :  { %6392 = vmatpush1.bf16.msra.mxu0 %v8695_v50  ;;  %v8787_v50 = vld [vmem:[#allocation8 + $0x2f4] ss:$8 sps:$4 sm:$0xff]  }
 0xc74   :  { %6393 = vmatprep.subr.bf16.mxu0 %v8700_v54  ;;  %v8785_v54 = vld [vmem:[#allocation8 + $0x2f0] ss:$8 sps:$4 sm:$0xff]  }
 0xc77   :  { %6394 = vmatpush1.bf16.msra.mxu0 %v8698_v49  ;;  %v6476_v49 = vpack.c.bf16 %v10215_v27, %v10215_v27 }
 0xc78   :  { %6395 = vmatprep.subr.bf16.mxu0 %v8703_v24 }
 0xc7b   :  { %6396 = vmatpush1.bf16.msra.mxu0 %v8701_v52 }
 0xc7c   :  { %6397 = vmatprep.subr.bf16.mxu0 %v8706_v16 }
 0xc7f   :  { %6398 = vmatpush1.bf16.msra.mxu0 %v8704_v55 }
 0xc80   :  { %6399 = vmatprep.subr.bf16.mxu0 %v8709_v56 }
 0xc83   :  { %6400 = vmatpush1.bf16.msra.mxu0 %v8707_v53 }
 0xc84   :  { %6401 = vmatprep.subr.bf16.mxu0 %v8712_v4 }
 0xc87   :  { %6402 = vmatpush1.bf16.msra.mxu0 %v8710_v23 }
 0xc88   :  { %6403 = vmatprep.subr.bf16.mxu0 %v8715_v40 }
 0xc8b   :  { %6404 = vmatpush1.bf16.msra.mxu0 %v8713_v25 }
 0xc8c   :  { %6405 = vmatprep.subr.bf16.mxu0 %v8718_v10 }
 0xc8f   :  { %6406 = vmatpush1.bf16.msra.mxu0 %v8716_v60 }
 0xc90   :  { %6407 = vmatprep.subr.bf16.mxu0 %v8721_v44 }
 0xc93   :  { %6408 = vmatpush1.bf16.msra.mxu0 %v8719_v17 }
 0xc94   :  { %6409 = vmatprep.subr.bf16.mxu0 %v8724_v2 }
 0xc97   :  { %6410 = vmatpush1.bf16.msra.mxu0 %v8722_v51 }
 0xc98   :  { %6411 = vmatprep.subr.bf16.mxu0 %v8727_v1 }
 0xc9b   :  { %6412 = vmatpush1.bf16.msra.mxu0 %v8725_v0 }
 0xc9c   :  { %6413 = vmatprep.subr.bf16.mxu0 %v8730_v57 }
 0xc9f   :  { %6414 = vmatpush1.bf16.msra.mxu0 %v8728_v58 }
 0xca0   :  { %6415 = vmatprep.subr.bf16.mxu0 %v8733_v47 }
 0xca3   :  { %6416 = vmatpush1.bf16.msra.mxu0 %v8731_v61 }
 0xca4   :  { %6417 = vmatprep.subr.bf16.mxu0 %v8736_v19 }
 0xca7   :  { %6418 = vmatpush1.bf16.msra.mxu0 %v8734_v62 }
 0xca8   :  { %6419 = vmatprep.subr.bf16.mxu0 %v8739_v26 }
 0xcab   :  { %6420 = vmatpush1.bf16.msra.mxu0 %v8737_v43 }
 0xcac   :  { %6671 = vmatprep.subr.bf16.mxu0 %v8742_v7 }
 0xcae   :  { %6422 = vmatmul.mubr.bf16.vlgmr.msra.gmra.mrb[76].mxu0 %v5913_v45 }
 0xcaf   :  { %6672 = vmatpush1.bf16.msra.mxu0 %v8740_v21  ;;  %6703 = vmatprep.mubr.bf16.mxu0 %v6477_v13 }
 0xcb0   :  { %6673 = vmatprep.subr.bf16.mxu0 %v8745_v32 }
 0xcb3   :  { %6674 = vmatpush1.bf16.msra.mxu0 %v8743_v46 }
 0xcb4   :  { %6675 = vmatprep.subr.bf16.mxu0 %v8748_v59 }
 0xcb7   :  { %6676 = vmatpush1.bf16.msra.mxu0 %v8746_v29 }
 0xcb8   :  { %6677 = vmatprep.subr.bf16.mxu0 %v8751_v18 }
 0xcbb   :  { %6678 = vmatpush1.bf16.msra.mxu0 %v8749_v20 }
 0xcbc   :  { %6679 = vmatprep.subr.bf16.mxu0 %v8754_v63 }
 0xcbf   :  { %6680 = vmatpush1.bf16.msra.mxu0 %v8752_v28 }
 0xcc0   :  { %6681 = vmatprep.subr.bf16.mxu0 %v8757_v5 }
 0xcc3   :  { %6682 = vmatpush1.bf16.msra.mxu0 %v8755_v31 }
 0xcc4   :  { %6683 = vmatprep.subr.bf16.mxu0 %v8760_v3 }
 0xcc7   :  { %6684 = vmatpush1.bf16.msra.mxu0 %v8758_v30 }
 0xcc8   :  { %6685 = vmatprep.subr.bf16.mxu0 %v8763_v33 }
 0xccb   :  { %6686 = vmatpush1.bf16.msra.mxu0 %v8761_v34 }
 0xccc   :  { %6687 = vmatprep.subr.bf16.mxu0 %v8766_v35 }
 0xccf   :  { %6688 = vmatpush1.bf16.msra.mxu0 %v8764_v22 }
 0xcd0   :  { %6689 = vmatprep.subr.bf16.mxu0 %v8769_v36 }
 0xcd3   :  { %6690 = vmatpush1.bf16.msra.mxu0 %v8767_v6 }
 0xcd4   :  { %6691 = vmatprep.subr.bf16.mxu0 %v8772_v37 }
 0xcd7   :  { %6692 = vmatpush1.bf16.msra.mxu0 %v8770_v38 }
 0xcd8   :  { %6693 = vmatprep.subr.bf16.mxu0 %v8775_v9 }
 0xcdb   :  { %6694 = vmatpush1.bf16.msra.mxu0 %v8773_v39 }
 0xcdc   :  { %6695 = vmatprep.subr.bf16.mxu0 %v8778_v8 }
 0xcdf   :  { %6696 = vmatpush1.bf16.msra.mxu0 %v8776_v41 }
 0xce0   :  { %6697 = vmatprep.subr.bf16.mxu0 %v8781_v42 }
 0xce3   :  { %6698 = vmatpush1.bf16.msra.mxu0 %v8779_v12 }
 0xce4   :  { %6699 = vmatprep.subr.bf16.mxu0 %v8784_v48 }
 0xce7   :  { %6700 = vmatpush1.bf16.msra.mxu0 %v8782_v15 }
 0xce8   :  { %6701 = vmatprep.subr.bf16.mxu0 %v8787_v50 }
 0xceb   :  { %6702 = vmatpush1.bf16.msra.mxu0 %v8785_v54 }
 0xcee   :  { %6704 = vmatmul.mubr.bf16.vlgmr.msra.gmra.mrb[76].mxu0 %v6476_v49 }
 0xcef   :  { %8903 = shalt.err (!%p8900_p8)
}
 0xcf0   :  { %s8904_s23 = scalar_lea.hbm %s10297_s17, 256 }
 0xcf1   :  { %p8905_p9 = scmp.ne.s32.totalorder %s10297_s17, %s8904_s23  ;;  %p8908_p10 = scmp.lt.u32.totalorder %s8904_s23, %s10297_s17 }
 0xcf3   :  { %p8910_p11 = pnand %p8908_p10, %p8905_p9 }
 0xcf5   :  { %8913 = shalt.err (!%p8910_p11)
}
 0xcf6   :  { %6782 = dma.vmem_to_hbm [thread:$0]  %s6777_s30, 256, %s10297_s17, [#allocation12], %s8970_s27, %s8970_s27, %s8971_s28  }
 0xcf7   :  { %s8914_s10 = scalar_lea.vmem %s6765_s1, 512  ;;  %p8919_p13 = scmp.lt.s32.totalorder %s6765_s1, %s6765_s1 }
 0xcf8   :  { %p8915_p12 = scmp.ne.s32.totalorder %s6765_s1, %s8914_s10  ;;  %p8920_p0 = scmp.lt.s32.totalorder %s8914_s10, %s8914_s10 }
 0xcfa   :  { %p8921_p1 = por %p8920_p0, %p8919_p13 }
 0xcfc   :  { %p8922_p2 = pnand %p8921_p1, %p8915_p12 }
 0xcfe   :  { %8925 = shalt.err (!%p8922_p2)
}
 0xcff   :  { %s8926_s21 = scalar_lea.hbm %s10296_s16, 512 }
 0xd00   :  { %p8927_p3 = scmp.ne.s32.totalorder %s10296_s16, %s8926_s21  ;;  %p8930_p4 = scmp.lt.u32.totalorder %s8926_s21, %s10296_s16 }
 0xd02   :  { %p8932_p5 = pnand %p8930_p4, %p8927_p3 }
 0xd04   :  { %8935 = shalt.err (!%p8932_p5)
}
 0xd05   :  { %6770 = dma.vmem_to_hbm [thread:$0]  %s6765_s1, 512, %s10296_s16, [#allocation4], %s8970_s27, %s8970_s27, %s8971_s28  }
 0xd06   :  { %s8977_s20 = smov [#allocation13]  }
 0xd07   :  { %s6789_s13 = sshll.u32 %s8977_s20, 4  ;;  %s6790_s13 = int_to_ptr.vmem [resolvable:$true] %s6789_s13 }
 0xd08   :  { %s8936_s30 = scalar_lea.vmem %s6790_s13, 128  ;;  %p8941_p7 = scmp.lt.s32.totalorder %s6790_s13, %s6790_s13 }
 0xd09   :  { %p8937_p6 = scmp.ne.s32.totalorder %s6790_s13, %s8936_s30  ;;  %p8942_p8 = scmp.lt.s32.totalorder %s8936_s30, %s8936_s30 }
 0xd0b   :  { %p8943_p9 = por %p8942_p8, %p8941_p7 }
 0xd0d   :  { %p8944_p10 = pnand %p8943_p9, %p8937_p6 }
 0xd0f   :  { %8947 = shalt.err (!%p8944_p10)
}
 0xd10   :  { %s8948_s22 = scalar_lea.hbm %s10298_s18, 128 }
 0xd11   :  { %p8949_p11 = scmp.ne.s32.totalorder %s10298_s18, %s8948_s22  ;;  %p8952_p12 = scmp.lt.u32.totalorder %s8948_s22, %s10298_s18 }
 0xd13   :  { %p8954_p13 = pnand %p8952_p12, %p8949_p11 }
 0xd15   :  { %8957 = shalt.err (!%p8954_p13)
}
 0xd16   :  { %6792 = dma.vmem_to_hbm [thread:$0]  %s6790_s13, 128, %s10298_s18, [#allocation12]   ;;  %v6714_v27 = vld [vmem:[%s10295_s15] ss:$2 sm:$0x3] }
 0xd17   :  { %v7659_v24 = vld [vmem:[%s10295_s15 + $0x1] ss:$2 sm:$0x3]  ;;  %v6719_v52 = vrot.slane %v6714_v27, %v9786_v11  ;;  %v6723_v16 = vrot.slane %v6714_v27, %v9791_v14 }
 0xd18   :  { %v6734_v55 = vrot.slane %v7659_v24, %v9786_v11  ;;  %v6738_v53 = vrot.slane %v7659_v24, %v9791_v14 }
 0xdc1   :  { %v6705_v56 = vpop.f32.mrb[76].mxu0 }
 0xdc2   :  { %v6726_v4 = vmul.f32 %v6719_v52, %v6705_v56  ;;  %v6707_v23 = vpop.f32.mrb[77].mxu0 }
 0xdc3   :  { %v6727_v40 = vmul.f32 %v6723_v16, %v6707_v23  ;;  %v6709_v25 = vpop.f32.mrb[78].mxu0 }
 0xdc4   :  { %v6741_v10 = vadd.f32 %v6734_v55, %v6726_v4  ;;  %v6710_v60 = vpop.f32.mrb[79].mxu0 }
 0xdc5   :  { %v6742_v44 = vadd.f32 %v6738_v53, %v6727_v40 }
 0xdc6   :  { %v6743_v17 = vmax.f32 %v6741_v10, 0.0 }
 0xdc7   :  { %v6744_v2 = vmax.f32 %v6742_v44, 0.0 }
 0xdc9   :  { %v7660_v51 = vpack.c.bf16 %v6744_v2, %v6743_v17 }
 0xdcb   :  { %7661 = vst.sshfl [vmem:[%s10299_s19] sm:$0x33 pattern:$0x76325410] %v7660_v51 }
 0xdcc   :  { %8964 = dma.done.wait [#allocation4], 512  }
 0xdcd   :  { %8965 = vsyncadd [#allocation4], 4294966784 }
 0xdce   :  { %8966 = dma.done.wait [#allocation12], 384  }
 0xdcf   :  { %8967 = vsyncadd [#allocation12], 4294966912 }
 0xdd0   :  { %6806 = vsyncpa [#allocation3], 1 }
 0xdd1   :  { %6807 = vsyncpa [#allocation6], 1 }
 0xdd2   :  { %6808 = vsyncpa [#allocation9], 1 }
 0xdd3   :  { %6809 = vsyncpa [#allocation4], 1 }
 0xdd4   :  { %6810 = vsyncpa [#allocation12], 1 }

</bundles_post_ra>
